<compile_context>
chip_gen: v5e
topology: v5e:2x2
jax: 0.10.0
libtpu: 0.0.40
codegen_flags: <defaults>
</compile_context>

<pallas_src>
import functools
import numpy as np
import jax
import jax.numpy as jnp
from jax.experimental import pallas as pl
from jax.experimental.pallas import tpu as pltpu


_MIB = 1024 * 1024


# ---------------------------------------------------------------------------
# Helpers
# ---------------------------------------------------------------------------

def _nbytes(shape, dtype):
    return int(np.prod(shape)) * jnp.dtype(dtype).itemsize


def _vmem_limit(estimate_bytes):
    """Explicit scoped-VMEM budget: >= 32 MiB default, <= 56 MiB (v7x headroom)."""
    return int(min(max(int(estimate_bytes * 1.5), 32 * _MIB), 56 * _MIB))


def _inv_spec(shape, single_buffer):
    """BlockSpec for a grid-invariant operand (weights / scale / bias).

    single_buffer=True requests a single VMEM buffer (the block never changes,
    so the default second pipeline buffer is pure VMEM waste)."""
    imap = lambda i: (0, 0)
    if single_buffer:
        return pl.BlockSpec(shape, imap, pipeline_mode=pl.Buffered(1))
    return pl.BlockSpec(shape, imap)


def _pick_tm(M, preferred):
    """Fixed 8-aligned row tile; grid uses cdiv so the last block may be ragged."""
    return M if M <= preferred else preferred


# ---------------------------------------------------------------------------
# Pallas kernels
# ---------------------------------------------------------------------------

def _dual_pw_kernel(x_ref, w_ref, s_ref, b_ref, o1_ref, o2_ref, *, c_a):
    # Fused cv1 + cv2: x read once, ONE matmul over the host-concatenated
    # (Cin, C1+C2) weight (full MXU N fill on v6e/v7x), f32 BN+SiLU epilogue,
    # two lane-slice stores.
    acc = jnp.dot(x_ref[...], w_ref[...], preferred_element_type=jnp.float32)
    y = acc * s_ref[...] + b_ref[...]
    y = y * jax.nn.sigmoid(y)                         # SiLU
    o1_ref[...] = y[:, :c_a].astype(o1_ref.dtype)
    o2_ref[...] = y[:, c_a:].astype(o2_ref.dtype)


def _split_pw_kernel(x1_ref, x2_ref, wa_ref, wb_ref, s_ref, b_ref, o_ref):
    # Fused concat + cv3:  cv3(cat([x1, x2])) == x1 @ W_top + x2 @ W_bot.
    acc = jnp.dot(x1_ref[...], wa_ref[...], preferred_element_type=jnp.float32)
    acc = acc + jnp.dot(x2_ref[...], wb_ref[...], preferred_element_type=jnp.float32)
    y = acc * s_ref[...] + b_ref[...]
    o_ref[...] = (y * jax.nn.sigmoid(y)).astype(o_ref.dtype)


def _bottleneck_kernel(y1_ref, w1_ref, s1_ref, b1_ref, w9_ref, s2_ref, b2_ref,
                       o_ref, pb_ref, *, H, W, C, pad):
    """Fused Bottleneck: y1 + SiLU(BN(conv3x3(SiLU(BN(y1 @ w1)))))  per image."""
    HW = H * W
    y1 = y1_ref[...]                                  # (HW, C), compute dtype

    # ---- 1x1 conv + BN + SiLU (bottleneck cv1): stays entirely in VMEM ----
    a = jnp.dot(y1, w1_ref[...], preferred_element_type=jnp.float32)
    h = a * s1_ref[...] + b1_ref[...]
    h = h * jax.nn.sigmoid(h)

    # Write into the row-zero-padded VMEM buffer (vertical 'same' padding).
    # Pad rows are re-zeroed every step (cheap) so megacore grid splits are safe.
    pb_ref[pl.ds(0, pad), :] = jnp.zeros((pad, C), pb_ref.dtype)
    pb_ref[pl.ds(pad + HW, pad), :] = jnp.zeros((pad, C), pb_ref.dtype)
    pb_ref[pl.ds(pad, HW), :] = h.astype(pb_ref.dtype)

    # Column-boundary masks built in-kernel (no lane-sparse HBM streams).
    col = jax.lax.broadcasted_iota(jnp.int32, (HW, 1), 0) % W
    lmask = (col != 0).astype(pb_ref.dtype)
    rmask = (col != (W - 1)).astype(pb_ref.dtype)

    # ---- 3x3 'same' conv: 9 shifted taps accumulated directly in f32 ----
    acc = jnp.zeros((HW, C), jnp.float32)
    for k in range(9):
        dy, dx = divmod(k, 3)
        shift = (dy - 1) * W + (dx - 1)
        tap = pb_ref[pl.ds(pad + shift, HW), :]
        if dx == 0:
            tap = tap * lmask
        elif dx == 2:
            tap = tap * rmask
        acc = acc + jnp.dot(tap, w9_ref[pl.ds(k * C, C), :],
                            preferred_element_type=jnp.float32)

    # BN + SiLU (cv2) + residual shortcut.
    y = acc * s2_ref[...] + b2_ref[...]
    y = y * jax.nn.sigmoid(y)
    o_ref[...] = (y1.astype(jnp.float32) + y).astype(o_ref.dtype)


# ---------------------------------------------------------------------------
# pallas_call wrappers
# ---------------------------------------------------------------------------

def dual_pointwise_conv_bn_silu(x2d, w_cat, s_cat, b_cat, c_a, tm_pref=1024):
    """cv1 and cv2 in one pass over x (x read from HBM once, one matmul)."""
    M, Cin = x2d.shape
    Ctot = w_cat.shape[1]
    c_b = Ctot - c_a
    tm = _pick_tm(M, tm_pref)
    grid = (pl.cdiv(M, tm),)
    kernel = functools.partial(_dual_pw_kernel, c_a=c_a)
    est = (2 * _nbytes((tm, Cin), x2d.dtype) + 2 * _nbytes((Cin, Ctot), w_cat.dtype)
           + 2 * _nbytes((tm, c_a), x2d.dtype) + 2 * _nbytes((tm, c_b), x2d.dtype)
           + 4 * _nbytes((1, Ctot), jnp.float32))

    def run(single_buffer):
        return pl.pallas_call(
            kernel,
            out_shape=(jax.ShapeDtypeStruct((M, c_a), x2d.dtype),
                       jax.ShapeDtypeStruct((M, c_b), x2d.dtype)),
            grid_spec=pltpu.PrefetchScalarGridSpec(
                num_scalar_prefetch=0,
                grid=grid,
                in_specs=[
                    pl.BlockSpec((tm, Cin), lambda i: (i, 0)),
                    _inv_spec((Cin, Ctot), single_buffer),
                    _inv_spec((1, Ctot), single_buffer),
                    _inv_spec((1, Ctot), single_buffer),
                ],
                out_specs=(pl.BlockSpec((tm, c_a), lambda i: (i, 0)),
                           pl.BlockSpec((tm, c_b), lambda i: (i, 0))),
            ),
            compiler_params=pltpu.CompilerParams(
                dimension_semantics=("parallel",),
                vmem_limit_bytes=_vmem_limit(est)),
        )(x2d, w_cat, s_cat, b_cat)

    try:
        return run(True)
    except Exception:
        return run(False)


def split_pointwise_conv_bn_silu(x1, x2, wa, wb, s, b, tm_pref=1024):
    """cv3 fused with the channel concat: out = silu(bn(x1@wa + x2@wb))."""
    M, Ca = x1.shape
    Cb = x2.shape[1]
    Cout = wa.shape[1]
    tm = _pick_tm(M, tm_pref)
    grid = (pl.cdiv(M, tm),)
    est = (2 * _nbytes((tm, Ca), x1.dtype) + 2 * _nbytes((tm, Cb), x2.dtype)
           + 2 * _nbytes((Ca, Cout), wa.dtype) + 2 * _nbytes((Cb, Cout), wb.dtype)
           + 2 * _nbytes((tm, Cout), x1.dtype))

    def run(single_buffer):
        return pl.pallas_call(
            _split_pw_kernel,
            out_shape=jax.ShapeDtypeStruct((M, Cout), x1.dtype),
            grid_spec=pltpu.PrefetchScalarGridSpec(
                num_scalar_prefetch=0,
                grid=grid,
                in_specs=[
                    pl.BlockSpec((tm, Ca), lambda i: (i, 0)),
                    pl.BlockSpec((tm, Cb), lambda i: (i, 0)),
                    _inv_spec((Ca, Cout), single_buffer),
                    _inv_spec((Cb, Cout), single_buffer),
                    _inv_spec((1, Cout), single_buffer),
                    _inv_spec((1, Cout), single_buffer),
                ],
                out_specs=pl.BlockSpec((tm, Cout), lambda i: (i, 0)),
            ),
            compiler_params=pltpu.CompilerParams(
                dimension_semantics=("parallel",),
                vmem_limit_bytes=_vmem_limit(est)),
        )(x1, x2, wa, wb, s, b)

    try:
        return run(True)
    except Exception:
        return run(False)


def bottleneck_fused(y1, w1, s1, b1, w9, s2, b2, H, W):
    """One fused Bottleneck block. y1:(N,HW,C); w1:(C,C); w9:(9C,C); s,b:(1,C)."""
    N, HW, C = y1.shape
    pad = ((W + 1 + 7) // 8) * 8           # >= W+1, sublane aligned
    P = HW + 2 * pad
    kernel = functools.partial(_bottleneck_kernel, H=H, W=W, C=C, pad=pad)
    est = (4 * _nbytes((HW, C), y1.dtype)              # in + out, double buffered
           + 2 * _nbytes((C, C), w1.dtype)
           + 2 * _nbytes((9 * C, C), w9.dtype)
           + _nbytes((P, C), y1.dtype)                  # padded activation scratch
           + 4 * _nbytes((HW, C), jnp.float32))         # f32 accumulator / temps

    def run(single_buffer):
        return pl.pallas_call(
            kernel,
            out_shape=jax.ShapeDtypeStruct((N, HW, C), y1.dtype),
            grid_spec=pltpu.PrefetchScalarGridSpec(
                num_scalar_prefetch=0,
                grid=(N,),
                in_specs=[
                    pl.BlockSpec((None, HW, C), lambda n: (n, 0, 0)),
                    _inv_spec((C, C), single_buffer),
                    _inv_spec((1, C), single_buffer),
                    _inv_spec((1, C), single_buffer),
                    _inv_spec((9 * C, C), single_buffer),
                    _inv_spec((1, C), single_buffer),
                    _inv_spec((1, C), single_buffer),
                ],
                out_specs=pl.BlockSpec((None, HW, C), lambda n: (n, 0, 0)),
                scratch_shapes=[pltpu.VMEM((P, C), y1.dtype)],
            ),
            compiler_params=pltpu.CompilerParams(
                dimension_semantics=("parallel",),
                vmem_limit_bytes=_vmem_limit(est)),
        )(y1, w1, s1, b1, w9, s2, b2)

    try:
        return run(True)
    except Exception:
        return run(False)


# ---------------------------------------------------------------------------
# C3 forward (JAX glue — only layout plumbing, all arithmetic in kernels)
# ---------------------------------------------------------------------------

def c3_forward(x_nchw, params, compute_dtype=jnp.bfloat16):
    """C3 forward. Input/Output are NCHW to match the PyTorch module.

    compute_dtype: dtype of matmul inputs / stored activations.  bf16 is
    recommended on all TPU generations (the 1x1 stages are HBM-bound and all
    MXUs are native bf16); accumulation and BN+SiLU epilogues are always f32.
    """
    cd = compute_dtype
    x = jnp.transpose(x_nchw, (0, 2, 3, 1))             # -> NHWC (only transpose)
    N, H, W, c1 = x.shape
    HW = H * W
    M = N * HW
    x2d = x.reshape(M, c1).astype(cd)

    p = params
    c_ = p['cv1']['w'].shape[1]

    # Fused cv1 + cv2 with host-concatenated weights (x read once, one matmul).
    w12 = jnp.concatenate([p['cv1']['w'], p['cv2']['w']], axis=1).astype(cd)
    s12 = jnp.concatenate([p['cv1']['s'], p['cv2']['s']], axis=1)
    b12 = jnp.concatenate([p['cv1']['b'], p['cv2']['b']], axis=1)
    y1, y2 = dual_pointwise_conv_bn_silu(x2d, w12, s12, b12, c_)

    # Bottleneck chain: each block is one fused kernel (1x1 output never hits
    # HBM, no jnp.pad pass, column masks generated in-kernel).
    y1 = y1.reshape(N, HW, c_)
    for bp in p['m']:   # Bottleneck(c_, c_, shortcut=True, k=((1,1),(3,3)), e=1.0)
        y1 = bottleneck_fused(
            y1,
            bp['cv1']['w'].astype(cd), bp['cv1']['s'], bp['cv1']['b'],
            bp['cv2']['w'].reshape(9 * c_, c_).astype(cd),
            bp['cv2']['s'], bp['cv2']['b'], H, W)
    y1 = y1.reshape(M, c_)

    # Fused concat + cv3 (no (M, 2c_) concat tensor in HBM).
    w3 = p['cv3']['w'].astype(cd)
    out2d = split_pointwise_conv_bn_silu(y1, y2, w3[:c_], w3[c_:],
                                         p['cv3']['s'], p['cv3']['b'])
    c2 = out2d.shape[1]
    out = out2d.reshape(N, H, W, c2)
    return jnp.transpose(out, (0, 3, 1, 2))             # -> NCHW


# ---------------------------------------------------------------------------
# Deterministic parameter initialization (Conv weight + folded BatchNorm)
# ---------------------------------------------------------------------------

def init_params(key, c1, c2, n=1, e=0.5):
    c_ = int(c2 * e)
    keys = iter(jax.random.split(key, 128))
    eps = 1e-5

    def conv_bn(cin, cout, ksize):
        if ksize == 1:
            w = jax.random.normal(next(keys), (cin, cout), jnp.float32) * 0.1
        else:
            w = jax.random.normal(next(keys), (9, cin, cout), jnp.float32) * 0.1
        gamma = jax.random.uniform(next(keys), (cout,), jnp.float32, 0.5, 1.5)
        beta = jax.random.normal(next(keys), (cout,), jnp.float32) * 0.1
        mean = jax.random.normal(next(keys), (cout,), jnp.float32) * 0.1
        var = jax.random.uniform(next(keys), (cout,), jnp.float32, 0.5, 1.5)
        scale = gamma / jnp.sqrt(var + eps)
        bias = beta - mean * scale
        return {'w': w, 's': scale.reshape(1, cout), 'b': bias.reshape(1, cout)}

    return {
        'cv1': conv_bn(c1, c_, 1),
        'cv2': conv_bn(c1, c_, 1),
        'cv3': conv_bn(2 * c_, c2, 1),
        'm': [{'cv1': conv_bn(c_, c_, 1), 'cv2': conv_bn(c_, c_, 3)} for _ in range(n)],
    }


# ---------------------------------------------------------------------------
# Pure-JAX reference (lax conv, mirrors PyTorch NCHW semantics)
# ---------------------------------------------------------------------------

def _conv_bn_silu_ref(x, p, ksize):
    cin = p['w'].shape[-2]
    cout = p['w'].shape[-1]
    if ksize == 1:
        w_oihw = p['w'].T.reshape(cout, cin, 1, 1)
        pad = 0
    else:
        w_oihw = p['w'].reshape(3, 3, cin, cout).transpose(3, 2, 0, 1)
        pad = 1
    y = jax.lax.conv_general_dilated(
        x, w_oihw, window_strides=(1, 1), padding=[(pad, pad), (pad, pad)],
        dimension_numbers=('NCHW', 'OIHW', 'NCHW'))
    y = y * p['s'].reshape(1, cout, 1, 1) + p['b'].reshape(1, cout, 1, 1)
    return y * jax.nn.sigmoid(y)


def c3_reference(x, params):
    y1 = _conv_bn_silu_ref(x, params['cv1'], 1)
    y2 = _conv_bn_silu_ref(x, params['cv2'], 1)
    for bp in params['m']:
        b1 = _conv_bn_silu_ref(y1, bp['cv1'], 1)
        y1 = y1 + _conv_bn_silu_ref(b1, bp['cv2'], 3)
    z = jnp.concatenate([y1, y2], axis=1)
    return _conv_bn_silu_ref(z, params['cv3'], 1)


# ---------------------------------------------------------------------------

if __name__ == "__main__":
    key = jax.random.PRNGKey(0)
    kx, kp = jax.random.split(key)

    N, c1, H, W = 2, 16, 16, 16
    c2, n_bottleneck = 16, 1

    x = jax.random.normal(kx, (N, c1, H, W), jnp.float32)
    params = init_params(kp, c1, c2, n=n_bottleneck)

    ref = c3_reference(x, params)

    # f32 path (exact check).
    out = jax.block_until_ready(c3_forward(x, params, compute_dtype=jnp.float32))
    assert out.shape == (N, c2, H, W), out.shape
    np.testing.assert_allclose(np.asarray(out), np.asarray(ref), rtol=1e-3, atol=1e-3)

    # bf16 matmul path (recommended on v5e / v6e / v7x): f32 accumulation +
    # f32 epilogue, loose check (activations stored bf16 between kernels).
    out_bf = jax.block_until_ready(c3_forward(x, params, compute_dtype=jnp.bfloat16))
    np.testing.assert_allclose(np.asarray(out_bf.astype(jnp.float32)),
                               np.asarray(ref), rtol=1e-1, atol=1e-1)

    print("KERNEL_OK")
</pallas_src>

<mosaic_0001>
module attributes {stable_mosaic.version = 11 : i64} {
  func.func @_dual_pw_kernel(%arg0: i32, %arg1: memref<512x16xf32, #tpu.memory_space<vmem>>, %arg2: memref<16x16xf32, #tpu.memory_space<vmem>>, %arg3: memref<1x16xf32, #tpu.memory_space<vmem>>, %arg4: memref<1x16xf32, #tpu.memory_space<vmem>>, %arg5: memref<512x8xf32, #tpu.memory_space<vmem>>, %arg6: memref<512x8xf32, #tpu.memory_space<vmem>>) attributes {dimension_semantics = [#tpu.dimension_semantics<parallel>], iteration_bounds = array<i64: 1>, scalar_prefetch = 0 : i64, scratch_operands = 0 : i64, tpu.core_type = #tpu.core_type<tc>, window_params = [{transform_indices = @transform_0, window_bounds = array<i64: 512, 16>}, {pipeline_mode = #tpu.pipeline_mode<synchronous>, transform_indices = @transform_1, window_bounds = array<i64: 16, 16>}, {pipeline_mode = #tpu.pipeline_mode<synchronous>, transform_indices = @transform_2, window_bounds = array<i64: 1, 16>}, {pipeline_mode = #tpu.pipeline_mode<synchronous>, transform_indices = @transform_3, window_bounds = array<i64: 1, 16>}, {transform_indices = @transform_4, window_bounds = array<i64: 512, 8>}, {transform_indices = @transform_5, window_bounds = array<i64: 512, 8>}]} {
    %c0 = arith.constant 0 : index
    %c0_0 = arith.constant 0 : index
    %0 = vector.load %arg1[%c0, %c0_0] : memref<512x16xf32, #tpu.memory_space<vmem>>, vector<512x16xf32>
    %c0_1 = arith.constant 0 : index
    %c0_2 = arith.constant 0 : index
    %1 = vector.load %arg2[%c0_1, %c0_2] : memref<16x16xf32, #tpu.memory_space<vmem>>, vector<16x16xf32>
    %cst = arith.constant dense<0.000000e+00> : vector<512x16xf32>
    %2 = tpu.matmul %0, %1, %cst {dimension_numbers = #tpu.dot_dimension_numbers<[1], [0], [0], [1], [0, 0, 1, 1], [], []>} : vector<512x16xf32>, vector<16x16xf32>, vector<512x16xf32> -> vector<512x16xf32>
    %c0_3 = arith.constant 0 : index
    %c0_4 = arith.constant 0 : index
    %3 = vector.load %arg3[%c0_3, %c0_4] : memref<1x16xf32, #tpu.memory_space<vmem>>, vector<1x16xf32>
    %4 = vector.broadcast %3 : vector<1x16xf32> to vector<512x16xf32>
    %5 = arith.mulf %2, %4 : vector<512x16xf32>
    %c0_5 = arith.constant 0 : index
    %c0_6 = arith.constant 0 : index
    %6 = vector.load %arg4[%c0_5, %c0_6] : memref<1x16xf32, #tpu.memory_space<vmem>>, vector<1x16xf32>
    %7 = vector.broadcast %6 : vector<1x16xf32> to vector<512x16xf32>
    %8 = arith.addf %5, %7 : vector<512x16xf32>
    %9 = arith.negf %8 : vector<512x16xf32>
    %10 = math.exp %9 : vector<512x16xf32>
    %cst_7 = arith.constant 1.000000e+00 : f32
    %11 = vector.broadcast %cst_7 : f32 to vector<512x16xf32>
    %12 = arith.addf %11, %10 : vector<512x16xf32>
    %13 = arith.divf %11, %12 : vector<512x16xf32>
    %14 = arith.mulf %8, %13 : vector<512x16xf32>
    %15 = vector.extract_strided_slice %14 {offsets = [0, 0], sizes = [512, 8], strides = [1, 1]} : vector<512x16xf32> to vector<512x8xf32>
    %c0_8 = arith.constant 0 : index
    %c0_9 = arith.constant 0 : index
    %16 = vector.load %arg5[%c0_8, %c0_9] : memref<512x8xf32, #tpu.memory_space<vmem>>, vector<512x8xf32>
    tpu.vector_store %arg5[%c0_8, %c0_9], %15 {strides = array<i32>} : memref<512x8xf32, #tpu.memory_space<vmem>>, vector<512x8xf32>,
    %17 = vector.extract_strided_slice %14 {offsets = [0, 8], sizes = [512, 8], strides = [1, 1]} : vector<512x16xf32> to vector<512x8xf32>
    %c0_10 = arith.constant 0 : index
    %c0_11 = arith.constant 0 : index
    %18 = vector.load %arg6[%c0_10, %c0_11] : memref<512x8xf32, #tpu.memory_space<vmem>>, vector<512x8xf32>
    tpu.vector_store %arg6[%c0_10, %c0_11], %17 {strides = array<i32>} : memref<512x8xf32, #tpu.memory_space<vmem>>, vector<512x8xf32>,
    return
  }
  func.func @transform_0(%arg0: i32) -> (i32, i32) {
    %c0_i32 = arith.constant 0 : i32
    %c0_i32_0 = arith.constant 0 : i32
    return %arg0, %c0_i32 : i32, i32
  }
  func.func @transform_1(%arg0: i32) -> (i32, i32) {
    %c0_i32 = arith.constant 0 : i32
    %c0_i32_0 = arith.constant 0 : i32
    %c0_i32_1 = arith.constant 0 : i32
    return %c0_i32, %c0_i32_0 : i32, i32
  }
  func.func @transform_2(%arg0: i32) -> (i32, i32) {
    %c0_i32 = arith.constant 0 : i32
    %c0_i32_0 = arith.constant 0 : i32
    %c0_i32_1 = arith.constant 0 : i32
    return %c0_i32, %c0_i32_0 : i32, i32
  }
  func.func @transform_3(%arg0: i32) -> (i32, i32) {
    %c0_i32 = arith.constant 0 : i32
    %c0_i32_0 = arith.constant 0 : i32
    %c0_i32_1 = arith.constant 0 : i32
    return %c0_i32, %c0_i32_0 : i32, i32
  }
  func.func @transform_4(%arg0: i32) -> (i32, i32) {
    %c0_i32 = arith.constant 0 : i32
    %c0_i32_0 = arith.constant 0 : i32
    return %arg0, %c0_i32 : i32, i32
  }
  func.func @transform_5(%arg0: i32) -> (i32, i32) {
    %c0_i32 = arith.constant 0 : i32
    %c0_i32_0 = arith.constant 0 : i32
    return %arg0, %c0_i32 : i32, i32
  }
}

module attributes {stable_mosaic.version = 11 : i64} {
  func.func @_dual_pw_kernel(%arg0: i32, %arg1: memref<512x16xf32, #tpu.memory_space<vmem>>, %arg2: memref<16x16xf32, #tpu.memory_space<vmem>>, %arg3: memref<1x16xf32, #tpu.memory_space<vmem>>, %arg4: memref<1x16xf32, #tpu.memory_space<vmem>>, %arg5: memref<512x8xf32, #tpu.memory_space<vmem>>, %arg6: memref<512x8xf32, #tpu.memory_space<vmem>>) attributes {dimension_semantics = [#tpu.dimension_semantics<parallel>], iteration_bounds = array<i64: 1>, scalar_prefetch = 0 : i64, scratch_operands = 0 : i64, tpu.core_type = #tpu.core_type<tc>, window_params = [{transform_indices = @transform_0, window_bounds = array<i64: 512, 16>}, {pipeline_mode = #tpu.pipeline_mode<synchronous>, transform_indices = @transform_1, window_bounds = array<i64: 16, 16>}, {pipeline_mode = #tpu.pipeline_mode<synchronous>, transform_indices = @transform_2, window_bounds = array<i64: 1, 16>}, {pipeline_mode = #tpu.pipeline_mode<synchronous>, transform_indices = @transform_3, window_bounds = array<i64: 1, 16>}, {transform_indices = @transform_4, window_bounds = array<i64: 512, 8>}, {transform_indices = @transform_5, window_bounds = array<i64: 512, 8>}]} {
    %c0 = arith.constant 0 : index
    %c0_0 = arith.constant 0 : index
    %0 = vector.load %arg1[%c0, %c0_0] : memref<512x16xf32, #tpu.memory_space<vmem>>, vector<512x16xf32>
    %c0_1 = arith.constant 0 : index
    %c0_2 = arith.constant 0 : index
    %1 = vector.load %arg2[%c0_1, %c0_2] : memref<16x16xf32, #tpu.memory_space<vmem>>, vector<16x16xf32>
    %cst = arith.constant dense<0.000000e+00> : vector<512x16xf32>
    %2 = tpu.matmul %0, %1, %cst {dimension_numbers = #tpu.dot_dimension_numbers<[1], [0], [0], [1], [0, 0, 1, 1], [], []>} : vector<512x16xf32>, vector<16x16xf32>, vector<512x16xf32> -> vector<512x16xf32>
    %c0_3 = arith.constant 0 : index
    %c0_4 = arith.constant 0 : index
    %3 = vector.load %arg3[%c0_3, %c0_4] : memref<1x16xf32, #tpu.memory_space<vmem>>, vector<1x16xf32>
    %4 = vector.broadcast %3 : vector<1x16xf32> to vector<512x16xf32>
    %5 = arith.mulf %2, %4 : vector<512x16xf32>
    %c0_5 = arith.constant 0 : index
    %c0_6 = arith.constant 0 : index
    %6 = vector.load %arg4[%c0_5, %c0_6] : memref<1x16xf32, #tpu.memory_space<vmem>>, vector<1x16xf32>
    %7 = vector.broadcast %6 : vector<1x16xf32> to vector<512x16xf32>
    %8 = arith.addf %5, %7 : vector<512x16xf32>
    %9 = arith.negf %8 : vector<512x16xf32>
    %10 = math.exp %9 : vector<512x16xf32>
    %cst_7 = arith.constant 1.000000e+00 : f32
    %11 = vector.broadcast %cst_7 : f32 to vector<512x16xf32>
    %12 = arith.addf %11, %10 : vector<512x16xf32>
    %13 = arith.divf %11, %12 : vector<512x16xf32>
    %14 = arith.mulf %8, %13 : vector<512x16xf32>
    %15 = vector.extract_strided_slice %14 {offsets = [0, 0], sizes = [512, 8], strides = [1, 1]} : vector<512x16xf32> to vector<512x8xf32>
    %c0_8 = arith.constant 0 : index
    %c0_9 = arith.constant 0 : index
    %16 = vector.load %arg5[%c0_8, %c0_9] : memref<512x8xf32, #tpu.memory_space<vmem>>, vector<512x8xf32>
    tpu.vector_store %arg5[%c0_8, %c0_9], %15 {strides = array<i32>} : memref<512x8xf32, #tpu.memory_space<vmem>>, vector<512x8xf32>,
    %17 = vector.extract_strided_slice %14 {offsets = [0, 8], sizes = [512, 8], strides = [1, 1]} : vector<512x16xf32> to vector<512x8xf32>
    %c0_10 = arith.constant 0 : index
    %c0_11 = arith.constant 0 : index
    %18 = vector.load %arg6[%c0_10, %c0_11] : memref<512x8xf32, #tpu.memory_space<vmem>>, vector<512x8xf32>
    tpu.vector_store %arg6[%c0_10, %c0_11], %17 {strides = array<i32>} : memref<512x8xf32, #tpu.memory_space<vmem>>, vector<512x8xf32>,
    return
  }
  func.func @transform_0(%arg0: i32) -> (i32, i32) {
    %c0_i32 = arith.constant 0 : i32
    %c0_i32_0 = arith.constant 0 : i32
    return %arg0, %c0_i32 : i32, i32
  }
  func.func @transform_1(%arg0: i32) -> (i32, i32) {
    %c0_i32 = arith.constant 0 : i32
    %c0_i32_0 = arith.constant 0 : i32
    %c0_i32_1 = arith.constant 0 : i32
    return %c0_i32, %c0_i32_0 : i32, i32
  }
  func.func @transform_2(%arg0: i32) -> (i32, i32) {
    %c0_i32 = arith.constant 0 : i32
    %c0_i32_0 = arith.constant 0 : i32
    %c0_i32_1 = arith.constant 0 : i32
    return %c0_i32, %c0_i32_0 : i32, i32
  }
  func.func @transform_3(%arg0: i32) -> (i32, i32) {
    %c0_i32 = arith.constant 0 : i32
    %c0_i32_0 = arith.constant 0 : i32
    %c0_i32_1 = arith.constant 0 : i32
    return %c0_i32, %c0_i32_0 : i32, i32
  }
  func.func @transform_4(%arg0: i32) -> (i32, i32) {
    %c0_i32 = arith.constant 0 : i32
    %c0_i32_0 = arith.constant 0 : i32
    return %arg0, %c0_i32 : i32, i32
  }
  func.func @transform_5(%arg0: i32) -> (i32, i32) {
    %c0_i32 = arith.constant 0 : i32
    %c0_i32_0 = arith.constant 0 : i32
    return %arg0, %c0_i32 : i32, i32
  }
}

</mosaic_0001>

<bundles_post_ra>
// kernel: tpu_custom_call.1
= control target key start
LH: loop header
LB: loop body
LE: loop exit
PB: predicated region body
PF: predicated region fallthrough
CT: control target
= control target key end

     0   :  { %vm85_vm0 = vcmask 130048   ;;  %vm1903_vm4 = vcmask 64512   ;;  %s5812_s1 = inlined_call_operand.vmem [shape: f32[16,16], index: 1, kind: input, shape index: {}]   ;;  %s5813_s0 = inlined_call_operand.vmem [shape: f32[512,16], index: 0, kind: input, shape index: {}]   ;;  %s5814_s2 = inlined_call_operand.vmem [shape: f32[1,16], index: 2, kind: input, shape index: {}]   ;;  %s5815_s3 = inlined_call_operand.vmem [shape: f32[1,16], index: 3, kind: input, shape index: {}]   ;;  %s5816_s4 = inlined_call_operand.vmem [shape: f32[512,8], index: 4, kind: output, shape index: {0}]   ;;  %s5817_s5 = inlined_call_operand.vmem [shape: f32[512,8], index: 5, kind: output, shape index: {1}]  }
   0x1   :  { %v84_v0 = vld [vmem:[%s5812_s1 + $0x8] sm:$0xff]  ;;  %v83_v1 = vld [vmem:[%s5812_s1] sm:$0xff]  ;;  %v21_v10 = vld [vmem:[%s5813_s0 + $0x10] sm:$0xff] }
   0x2   :  { %292 = vmatpush.msra.mxu0 %v84_v0  ;;  %2424 = vmatpush.msra.mxu1 %v84_v0  ;;  %v19_v2 = vld [vmem:[%s5813_s0] sm:$0xff]  ;;  %v20_v6 = vld [vmem:[%s5813_s0 + $0x8] sm:$0xff]  ;;  %v37_v11 = vld [vmem:[%s5813_s0 + $0x90] sm:$0xff] }
   0x3   :  { %2425 = vmatpush.msra.mxu2 %v84_v0  ;;  %2426 = vmatpush.msra.mxu3 %v84_v0  ;;  %v35_v3 = vld [vmem:[%s5813_s0 + $0x80] sm:$0xff]  ;;  %v36_v7 = vld [vmem:[%s5813_s0 + $0x88] sm:$0xff]  ;;  %v53_v12 = vld [vmem:[%s5813_s0 + $0x110] sm:$0xff] }
   0x4   :  { %293 = vmatpush.msra.mxu0 %v83_v1  ;;  %2427 = vmatpush.msra.mxu1 %v83_v1  ;;  %v51_v4 = vld [vmem:[%s5813_s0 + $0x100] sm:$0xff]  ;;  %v52_v8 = vld [vmem:[%s5813_s0 + $0x108] sm:$0xff]  ;;  %v69_v13 = vld [vmem:[%s5813_s0 + $0x190] sm:$0xff] }
   0x5   :  { %v67_v5 = vld [vmem:[%s5813_s0 + $0x180] sm:$0xff]  ;;  %2428 = vmatpush.msra.mxu2 %v83_v1  ;;  %2429 = vmatpush.msra.mxu3 %v83_v1  ;;  %v68_v9 = vld [vmem:[%s5813_s0 + $0x188] sm:$0xff]  ;;  %v22_v14 = vld [vmem:[%s5813_s0 + $0x18] sm:$0xff] }
   0x6   :  { %2296 = vmatmul.msk.f32.vlgmr.msra.gmra.mxu0 %vm85_vm0, %v19_v2  ;;  %2312 = vmatmul.msk.f32.vlgmr.msra.gmra.mxu1 %vm85_vm0, %v35_v3  ;;  %v38_v15 = vld [vmem:[%s5813_s0 + $0x98] sm:$0xff]  ;;  %v23_v18 = vld [vmem:[%s5813_s0 + $0x20] sm:$0xff]  ;;  %v24_v22 = vld [vmem:[%s5813_s0 + $0x28] sm:$0xff] }
   0x7   :  { %2328 = vmatmul.msk.f32.vlgmr.msra.gmra.mxu2 %vm85_vm0, %v51_v4  ;;  %2344 = vmatmul.msk.f32.vlgmr.msra.gmra.mxu3 %vm85_vm0, %v67_v5  ;;  %v54_v16 = vld [vmem:[%s5813_s0 + $0x118] sm:$0xff]  ;;  %v39_v19 = vld [vmem:[%s5813_s0 + $0xa0] sm:$0xff]  ;;  %v40_v23 = vld [vmem:[%s5813_s0 + $0xa8] sm:$0xff] }
   0x8   :  { %v70_v17 = vld [vmem:[%s5813_s0 + $0x198] sm:$0xff]  ;;  %v55_v20 = vld [vmem:[%s5813_s0 + $0x120] sm:$0xff]  ;;  %v56_v24 = vld [vmem:[%s5813_s0 + $0x128] sm:$0xff] }
   0x9   :  { %v71_v21 = vld [vmem:[%s5813_s0 + $0x1a0] sm:$0xff]  ;;  %v72_v25 = vld [vmem:[%s5813_s0 + $0x1a8] sm:$0xff]  ;;  %v25_v26 = vld [vmem:[%s5813_s0 + $0x30] sm:$0xff] }
   0xa   :  { %v41_v27 = vld [vmem:[%s5813_s0 + $0xb0] sm:$0xff]  ;;  %v26_v30 = vld [vmem:[%s5813_s0 + $0x38] sm:$0xff]  ;;  %v27_v34 = vld [vmem:[%s5813_s0 + $0x40] sm:$0xff] }
   0xb   :  { %v57_v28 = vld [vmem:[%s5813_s0 + $0x130] sm:$0xff]  ;;  %v42_v31 = vld [vmem:[%s5813_s0 + $0xb8] sm:$0xff]  ;;  %v43_v35 = vld [vmem:[%s5813_s0 + $0xc0] sm:$0xff] }
   0xc   :  { %v73_v29 = vld [vmem:[%s5813_s0 + $0x1b0] sm:$0xff]  ;;  %v58_v32 = vld [vmem:[%s5813_s0 + $0x138] sm:$0xff]  ;;  %v59_v36 = vld [vmem:[%s5813_s0 + $0x140] sm:$0xff] }
   0xd   :  { %v74_v33 = vld [vmem:[%s5813_s0 + $0x1b8] sm:$0xff]  ;;  %v75_v37 = vld [vmem:[%s5813_s0 + $0x1c0] sm:$0xff]  ;;  %v28_v38 = vld [vmem:[%s5813_s0 + $0x48] sm:$0xff] }
   0xe   :  { %2297 = vmatmul.msk.f32.gmra.mxu0 %vm85_vm0, %v20_v6  ;;  %2313 = vmatmul.msk.f32.gmra.mxu1 %vm85_vm0, %v36_v7  ;;  %v44_v39 = vld [vmem:[%s5813_s0 + $0xc8] sm:$0xff]  ;;  %v29_v42 = vld [vmem:[%s5813_s0 + $0x50] sm:$0xff]  ;;  %v30_v46 = vld [vmem:[%s5813_s0 + $0x58] sm:$0xff] }
   0xf   :  { %2329 = vmatmul.msk.f32.gmra.mxu2 %vm85_vm0, %v52_v8  ;;  %2345 = vmatmul.msk.f32.gmra.mxu3 %vm85_vm0, %v68_v9  ;;  %v60_v40 = vld [vmem:[%s5813_s0 + $0x148] sm:$0xff]  ;;  %v45_v43 = vld [vmem:[%s5813_s0 + $0xd0] sm:$0xff]  ;;  %v46_v47 = vld [vmem:[%s5813_s0 + $0xd8] sm:$0xff] }
  0x10   :  { %v76_v41 = vld [vmem:[%s5813_s0 + $0x1c8] sm:$0xff]  ;;  %v61_v44 = vld [vmem:[%s5813_s0 + $0x150] sm:$0xff]  ;;  %v62_v48 = vld [vmem:[%s5813_s0 + $0x158] sm:$0xff] }
  0x11   :  { %v77_v45 = vld [vmem:[%s5813_s0 + $0x1d0] sm:$0xff]  ;;  %v78_v49 = vld [vmem:[%s5813_s0 + $0x1d8] sm:$0xff]  ;;  %v31_v50 = vld [vmem:[%s5813_s0 + $0x60] sm:$0xff] }
  0x12   :  { %v47_v51 = vld [vmem:[%s5813_s0 + $0xe0] sm:$0xff]  ;;  %v32_v54 = vld [vmem:[%s5813_s0 + $0x68] sm:$0xff]  ;;  %v33_v58 = vld [vmem:[%s5813_s0 + $0x70] sm:$0xff] }
  0x13   :  { %v63_v52 = vld [vmem:[%s5813_s0 + $0x160] sm:$0xff]  ;;  %v48_v55 = vld [vmem:[%s5813_s0 + $0xe8] sm:$0xff]  ;;  %v49_v59 = vld [vmem:[%s5813_s0 + $0xf0] sm:$0xff] }
  0x14   :  { %v79_v53 = vld [vmem:[%s5813_s0 + $0x1e0] sm:$0xff]  ;;  %v64_v56 = vld [vmem:[%s5813_s0 + $0x168] sm:$0xff]  ;;  %v65_v60 = vld [vmem:[%s5813_s0 + $0x170] sm:$0xff] }
  0x15   :  { %v80_v57 = vld [vmem:[%s5813_s0 + $0x1e8] sm:$0xff]  ;;  %v81_v61 = vld [vmem:[%s5813_s0 + $0x1f0] sm:$0xff]  ;;  %v34_v62 = vld [vmem:[%s5813_s0 + $0x78] sm:$0xff] }
  0x16   :  { %2298 = vmatmul.msk.f32.gmra.mxu0 %vm85_vm0, %v21_v10  ;;  %2314 = vmatmul.msk.f32.gmra.mxu1 %vm85_vm0, %v37_v11  ;;  %v50_v63 = vld [vmem:[%s5813_s0 + $0xf8] sm:$0xff]  ;;  %v2985_v1 = vld [vmem:[%s5814_s2] ss:$0 sm:$0xff] }
  0x17   :  { %2330 = vmatmul.msk.f32.gmra.mxu2 %vm85_vm0, %v53_v12  ;;  %2346 = vmatmul.msk.f32.gmra.mxu3 %vm85_vm0, %v69_v13  ;;  %v82_v0 = vld [vmem:[%s5813_s0 + $0x1f8] sm:$0xff]  ;;  %v2993_v3 = vld [vmem:[%s5815_s3] ss:$0 sm:$0xff] }
  0x18   :  { %v66_v2 = vld [vmem:[%s5813_s0 + $0x178] sm:$0xff]  ;;  %s2693_s0 = smov 120  }
  0x1e   :  { %2299 = vmatmul.msk.f32.gmra.mxu0 %vm85_vm0, %v22_v14  ;;  %2315 = vmatmul.msk.f32.gmra.mxu1 %vm85_vm0, %v38_v15 }
  0x1f   :  { %2331 = vmatmul.msk.f32.gmra.mxu2 %vm85_vm0, %v54_v16  ;;  %2347 = vmatmul.msk.f32.gmra.mxu3 %vm85_vm0, %v70_v17 }
  0x26   :  { %2300 = vmatmul.msk.f32.gmra.mxu0 %vm85_vm0, %v23_v18  ;;  %2316 = vmatmul.msk.f32.gmra.mxu1 %vm85_vm0, %v39_v19 }
  0x27   :  { %2332 = vmatmul.msk.f32.gmra.mxu2 %vm85_vm0, %v55_v20  ;;  %2348 = vmatmul.msk.f32.gmra.mxu3 %vm85_vm0, %v71_v21 }
  0x2e   :  { %2301 = vmatmul.msk.f32.gmra.mxu0 %vm85_vm0, %v24_v22  ;;  %2317 = vmatmul.msk.f32.gmra.mxu1 %vm85_vm0, %v40_v23 }
  0x2f   :  { %2333 = vmatmul.msk.f32.gmra.mxu2 %vm85_vm0, %v56_v24  ;;  %2349 = vmatmul.msk.f32.gmra.mxu3 %vm85_vm0, %v72_v25 }
  0x36   :  { %2302 = vmatmul.msk.f32.gmra.mxu0 %vm85_vm0, %v25_v26  ;;  %2318 = vmatmul.msk.f32.gmra.mxu1 %vm85_vm0, %v41_v27 }
  0x37   :  { %2334 = vmatmul.msk.f32.gmra.mxu2 %vm85_vm0, %v57_v28  ;;  %2350 = vmatmul.msk.f32.gmra.mxu3 %vm85_vm0, %v73_v29 }
  0x3e   :  { %2303 = vmatmul.msk.f32.gmra.mxu0 %vm85_vm0, %v26_v30  ;;  %2319 = vmatmul.msk.f32.gmra.mxu1 %vm85_vm0, %v42_v31 }
  0x3f   :  { %2335 = vmatmul.msk.f32.gmra.mxu2 %vm85_vm0, %v58_v32  ;;  %2351 = vmatmul.msk.f32.gmra.mxu3 %vm85_vm0, %v74_v33 }
  0x46   :  { %2304 = vmatmul.msk.f32.gmra.mxu0 %vm85_vm0, %v27_v34  ;;  %2320 = vmatmul.msk.f32.gmra.mxu1 %vm85_vm0, %v43_v35 }
  0x47   :  { %2336 = vmatmul.msk.f32.gmra.mxu2 %vm85_vm0, %v59_v36  ;;  %2352 = vmatmul.msk.f32.gmra.mxu3 %vm85_vm0, %v75_v37 }
  0x4e   :  { %2305 = vmatmul.msk.f32.gmra.mxu0 %vm85_vm0, %v28_v38  ;;  %2321 = vmatmul.msk.f32.gmra.mxu1 %vm85_vm0, %v44_v39 }
  0x4f   :  { %2337 = vmatmul.msk.f32.gmra.mxu2 %vm85_vm0, %v60_v40  ;;  %2353 = vmatmul.msk.f32.gmra.mxu3 %vm85_vm0, %v76_v41 }
  0x56   :  { %2306 = vmatmul.msk.f32.gmra.mxu0 %vm85_vm0, %v29_v42  ;;  %2322 = vmatmul.msk.f32.gmra.mxu1 %vm85_vm0, %v45_v43 }
  0x57   :  { %2338 = vmatmul.msk.f32.gmra.mxu2 %vm85_vm0, %v61_v44  ;;  %2354 = vmatmul.msk.f32.gmra.mxu3 %vm85_vm0, %v77_v45 }
  0x5e   :  { %2307 = vmatmul.msk.f32.gmra.mxu0 %vm85_vm0, %v30_v46  ;;  %2323 = vmatmul.msk.f32.gmra.mxu1 %vm85_vm0, %v46_v47 }
  0x5f   :  { %2339 = vmatmul.msk.f32.gmra.mxu2 %vm85_vm0, %v62_v48  ;;  %2355 = vmatmul.msk.f32.gmra.mxu3 %vm85_vm0, %v78_v49 }
  0x66   :  { %2308 = vmatmul.msk.f32.gmra.mxu0 %vm85_vm0, %v31_v50  ;;  %2324 = vmatmul.msk.f32.gmra.mxu1 %vm85_vm0, %v47_v51 }
  0x67   :  { %2340 = vmatmul.msk.f32.gmra.mxu2 %vm85_vm0, %v63_v52  ;;  %2356 = vmatmul.msk.f32.gmra.mxu3 %vm85_vm0, %v79_v53 }
  0x6e   :  { %2309 = vmatmul.msk.f32.gmra.mxu0 %vm85_vm0, %v32_v54  ;;  %2325 = vmatmul.msk.f32.gmra.mxu1 %vm85_vm0, %v48_v55 }
  0x6f   :  { %2341 = vmatmul.msk.f32.gmra.mxu2 %vm85_vm0, %v64_v56  ;;  %2357 = vmatmul.msk.f32.gmra.mxu3 %vm85_vm0, %v80_v57 }
  0x76   :  { %2310 = vmatmul.msk.f32.gmra.mxu0 %vm85_vm0, %v33_v58  ;;  %2326 = vmatmul.msk.f32.gmra.mxu1 %vm85_vm0, %v49_v59 }
  0x77   :  { %2342 = vmatmul.msk.f32.gmra.mxu2 %vm85_vm0, %v65_v60  ;;  %2358 = vmatmul.msk.f32.gmra.mxu3 %vm85_vm0, %v81_v61 }
  0x7e   :  { %2311 = vmatmul.msk.f32.gmra.mxu0 %vm85_vm0, %v34_v62  ;;  %2327 = vmatmul.msk.f32.gmra.mxu1 %vm85_vm0, %v50_v63 }
  0x7f   :  { %2359 = vmatmul.msk.f32.gmra.mxu3 %vm85_vm0, %v82_v0  ;;  %2343 = vmatmul.msk.f32.gmra.mxu2 %vm85_vm0, %v66_v2 }
  0x83   :  { %v295_v4 = vpop.f32.mrf.mxu0  ;;  %v343_v5 = vpop.f32.mrf.mxu1 }
  0x84   :  { %v491_v6 = vmul.f32 %v2985_v1, %v295_v4  ;;  %v507_v7 = vmul.f32 %v2985_v1, %v343_v5 }
  0x86   :  { %v2999_v8 = vadd.f32 %v2993_v3, %v491_v6  ;;  %v3002_v9 = vadd.f32 %v2993_v3, %v507_v7 }
  0x88   :  { %v2360_v10 = vmul.f32 -1.442695, %v2999_v8  ;;  %v2376_v11 = vmul.f32 -1.442695, %v3002_v9 }
  0x8a   :  { %2433 = vpow2.f32 %v2360_v10  ;;  %v391_v12 = vpop.f32.mrf.mxu2  ;;  %v439_v13 = vpop.f32.mrf.mxu3 }
  0x8b   :  { %2435 = vpow2.f32 %v2376_v11  ;;  %v523_v14 = vmul.f32 %v2985_v1, %v391_v12  ;;  %v539_v15 = vmul.f32 %v2985_v1, %v439_v13  ;;  %v298_v16 = vpop.f32.mrf.mxu0  ;;  %v346_v17 = vpop.f32.mrf.mxu1 }
  0x8c   :  { %v492_v18 = vmul.f32 %v2985_v1, %v298_v16  ;;  %v508_v19 = vmul.f32 %v2985_v1, %v346_v17 }
  0x8d   :  { %v3011_v20 = vadd.f32 %v2993_v3, %v523_v14  ;;  %v3014_v21 = vadd.f32 %v2993_v3, %v539_v15 }
  0x8e   :  { %v3017_v22 = vadd.f32 %v2993_v3, %v492_v18  ;;  %v3020_v23 = vadd.f32 %v2993_v3, %v508_v19 }
  0x8f   :  { %v2392_v24 = vmul.f32 -1.442695, %v3011_v20  ;;  %v2408_v25 = vmul.f32 -1.442695, %v3014_v21 }
  0x90   :  { %v2434_v26 = vpop.eup %2433  ;;  %v2361_v29 = vmul.f32 -1.442695, %v3017_v22  ;;  %v2377_v31 = vmul.f32 -1.442695, %v3020_v23 }
  0x91   :  { %v2436_v27 = vpop.eup %2435  ;;  %v3024_v28 = vadd.f32 1.0, %v2434_v26  ;;  %2437 = vpow2.f32 %v2392_v24 }
  0x92   :  { %v3027_v30 = vadd.f32 1.0, %v2436_v27  ;;  %2439 = vpow2.f32 %v2408_v25  ;;  %v394_v32 = vpop.f32.mrf.mxu2  ;;  %v442_v33 = vpop.f32.mrf.mxu3 }
  0x93   :  { %2441 = vrcp.f32 %v3024_v28  ;;  %v524_v34 = vmul.f32 %v2985_v1, %v394_v32  ;;  %v540_v35 = vmul.f32 %v2985_v1, %v442_v33  ;;  %v301_v36 = vpop.f32.mrf.mxu0  ;;  %v349_v37 = vpop.f32.mrf.mxu1  ;;  %v890_v54 = vand.u32 2147483648, %v3024_v28 }
  0x94   :  { %2443 = vrcp.f32 %v3027_v30  ;;  %v493_v38 = vmul.f32 %v2985_v1, %v301_v36  ;;  %v509_v39 = vmul.f32 %v2985_v1, %v349_v37  ;;  %v1130_v44 = vand.u32 2147483648, %v3027_v30 }
  0x95   :  { %2445 = vpow2.f32 %v2361_v29  ;;  %v3037_v40 = vadd.f32 %v2993_v3, %v524_v34  ;;  %v3040_v41 = vadd.f32 %v2993_v3, %v540_v35  ;;  %v1128_v50 = vand.u32 2147483647, %v3027_v30 }
  0x96   :  { %2447 = vpow2.f32 %v2377_v31  ;;  %v3043_v42 = vadd.f32 %v2993_v3, %v493_v38  ;;  %v3046_v43 = vadd.f32 %v2993_v3, %v509_v39  ;;  %v3064_v59 = vor.u32 1.1754944e-38, %v1130_v44 }
  0x97   :  { %v2438_v45 = vpop.eup %2437  ;;  %v2393_v46 = vmul.f32 -1.442695, %v3037_v40  ;;  %v2409_v49 = vmul.f32 -1.442695, %v3040_v41  ;;  %vm1124_vm1 = vweird.f32 %v3027_v30  ;;  %v888_v24 = vand.u32 2147483647, %v3024_v28 }
  0x98   :  { %v2440_v47 = vpop.eup %2439  ;;  %v3050_v48 = vadd.f32 1.0, %v2438_v45  ;;  %v2362_v53 = vmul.f32 -1.442695, %v3043_v42  ;;  %v2378_v56 = vmul.f32 -1.442695, %v3046_v43  ;;  %vm3104_vm2 = vcmp.eq.f32.partialorder %v1128_v50, 8.507059e+37 }
  0x99   :  { %v3054_v51 = vpop.eup %2441  ;;  %v3056_v52 = vadd.f32 1.0, %v2440_v47  ;;  %2449 = vpow2.f32 %v2393_v46  ;;  %v3108_v31 = vor.u32 1.1754944e-38, %v890_v54  ;;  %vm884_vm5 = vweird.f32 %v3024_v28 }
  0x9a   :  { %v3060_v55 = vpop.eup %2443  ;;  %2451 = vrcp.f32 %v3050_v48  ;;  %v397_v57 = vpop.f32.mrf.mxu2  ;;  %v3068_v60 = vmul.f32 %v3054_v51, %v3024_v28  ;;  %vm885_vm6 = vweird.f32 %v3054_v51  ;;  %vm3127_vm7 = vcmp.eq.f32.partialorder %v888_v24, 8.507059e+37 }
  0x9b   :  { %v445_v58 = vpop.f32.mrf.mxu3  ;;  %v2446_v61 = vpop.eup %2445  ;;  %2453 = vrcp.f32 %v3056_v52  ;;  %v525_v62 = vmul.f32 %v2985_v1, %v397_v57  ;;  %v1120_v4 = vmul.f32 %v3060_v55, %v3027_v30  ;;  %vm1125_vm3 = vweird.f32 %v3060_v55  ;;  %vm3186_vm11 = vmor %vm884_vm5, %vm885_vm6 }
  0x9c   :  { %v541_v63 = vmul.f32 %v2985_v1, %v445_v58  ;;  %v304_v0 = vpop.f32.mrf.mxu0  ;;  %v352_v2 = vpop.f32.mrf.mxu1  ;;  %v3075_v6 = vadd.f32 1.0, %v2446_v61  ;;  %2455 = vpow2.f32 %v2409_v49  ;;  %v881_v38 = vsub.f32 1.0, %v3068_v60  ;;  %vm1126_vm8 = vmor %vm1124_vm1, %vm1125_vm3 }
  0x9d   :  { %v2448_v5 = vpop.eup %2447  ;;  %v494_v7 = vmul.f32 %v2985_v1, %v304_v0  ;;  %v510_v10 = vmul.f32 %v2985_v1, %v352_v2  ;;  %2457 = vpow2.f32 %v2362_v53  ;;  %v3083_v12 = vadd.f32 %v2993_v3, %v525_v62 }
  0x9e   :  { %v3080_v11 = vadd.f32 1.0, %v2448_v5  ;;  %v3086_v13 = vadd.f32 %v2993_v3, %v541_v63  ;;  %2459 = vrcp.f32 %v3075_v6  ;;  %v1121_v16 = vsub.f32 1.0, %v1120_v4 }
  0x9f   :  { %v3090_v14 = vadd.f32 %v2993_v3, %v494_v7  ;;  %v3093_v15 = vadd.f32 %v2993_v3, %v510_v10  ;;  %v2450_v17 = vpop.eup %2449  ;;  %v2394_v18 = vmul.f32 -1.442695, %v3083_v12  ;;  %v882_v5 = vmul.f32 %v3054_v51, %v881_v38 }
  0xa0   :  { %2461 = vrcp.f32 %v3080_v11  ;;  %v2410_v19 = vmul.f32 -1.442695, %v3086_v13  ;;  %v3099_v25 = vpop.eup %2451  ;;  %v3101_v26 = vadd.f32 1.0, %v2450_v17  ;;  %v1122_v33 = vmul.f32 %v3060_v55, %v1121_v16 }
  0xa1   :  { %2463 = vpow2.f32 %v2378_v56  ;;  %v2363_v27 = vmul.f32 -1.442695, %v3090_v14  ;;  %v3110_v32 = vpop.eup %2453  ;;  %v2379_v35 = vmul.f32 -1.442695, %v3093_v15  ;;  %v3121_v39 = vmul.f32 %v3099_v25, %v3050_v48 }
  0xa2   :  { %2465 = vpow2.f32 %v2394_v18  ;;  %v2456_v34 = vpop.eup %2455  ;;  %v400_v36 = vpop.f32.mrf.mxu2  ;;  %v1123_v63 = vadd.f32 %v3060_v55, %v1122_v33  ;;  %vm1364_vm9 = vweird.f32 %v3050_v48  ;;  %vm1365_vm10 = vweird.f32 %v3099_v25 }
  0xa3   :  { %2467 = vrcp.f32 %v3101_v26  ;;  %v448_v37 = vpop.f32.mrf.mxu3  ;;  %v2458_v44 = vpop.eup %2457  ;;  %v3123_v45 = vadd.f32 1.0, %v2456_v34  ;;  %v526_v46 = vmul.f32 %v2985_v1, %v400_v36  ;;  %v1368_v17 = vand.u32 2147483647, %v3050_v48  ;;  %vm1366_vm13 = vmor %vm1364_vm9, %vm1365_vm10 }
  0xa4   :  { %2469 = vpow2.f32 %v2410_v19  ;;  %v542_v47 = vmul.f32 %v2985_v1, %v448_v37  ;;  %v307_v49 = vpop.f32.mrf.mxu0  ;;  %v355_v50 = vpop.f32.mrf.mxu1  ;;  %v3133_v56 = vadd.f32 1.0, %v2458_v44  ;;  %v1127_v33 = vsel %vm1126_vm8, %v3060_v55, %v1123_v63 }
  0xa5   :  { %v3131_v54 = vpop.eup %2459  ;;  %2471 = vpow2.f32 %v2363_v27  ;;  %v495_v57 = vmul.f32 %v2985_v1, %v307_v49  ;;  %v511_v58 = vmul.f32 %v2985_v1, %v355_v50  ;;  %v3141_v61 = vadd.f32 %v2993_v3, %v526_v46 }
  0xa6   :  { %v3137_v60 = vpop.eup %2461  ;;  %2473 = vrcp.f32 %v3123_v45  ;;  %v3144_v62 = vadd.f32 %v2993_v3, %v542_v47  ;;  %v883_v36 = vadd.f32 %v3054_v51, %v882_v5  ;;  %vm3199_vm12 = vcmp.eq.f32.partialorder %v1368_v17, 8.507059e+37 }
  0xa7   :  { %v2464_v0 = vpop.eup %2463  ;;  %2475 = vrcp.f32 %v3133_v56  ;;  %v3149_v2 = vadd.f32 %v2993_v3, %v495_v57  ;;  %v3152_v4 = vadd.f32 %v2993_v3, %v511_v58  ;;  %v2395_v16 = vmul.f32 -1.442695, %v3141_v61 }
  0xa8   :  { %v2466_v7 = vpop.eup %2465  ;;  %v3155_v10 = vadd.f32 1.0, %v2464_v0  ;;  %2477 = vpow2.f32 %v2379_v35  ;;  %v2411_v24 = vmul.f32 -1.442695, %v3144_v62  ;;  %v1132_v35 = vsel %vm3104_vm2, %v3064_v59, %v1127_v33 }
  0xa9   :  { %5878 = vst [vmem:[#allocation2_spill] sm:$0xff] %v3152_v4  ;;  %v3165_v18 = vpop.eup %2467  ;;  %v3167_v19 = vadd.f32 1.0, %v2466_v7  ;;  %v2364_v27 = vmul.f32 -1.442695, %v3149_v2  ;;  %v2380_v30 = vmul.f32 -1.442695, %v3152_v4  ;;  %v1855_v44 = vmul.f32 %v1132_v35, %v3002_v9 }
  0xaa   :  { %v2470_v34 = vpop.eup %2469  ;;  %2479 = vrcp.f32 %v3155_v10  ;;  %v403_v46 = vpop.f32.mrf.mxu2  ;;  %v1361_v59 = vsub.f32 1.0, %v3121_v39  ;;  %v887_v9 = vsel %vm3186_vm11, %v3054_v51, %v883_v36  ;;  %vm1604_vm14 = vweird.f32 %v3056_v52 }
  0xab   :  { %v2472_v37 = vpop.eup %2471  ;;  %2481 = vrcp.f32 %v3167_v19  ;;  %v3179_v38 = vadd.f32 1.0, %v2470_v34  ;;  %v451_v29 = vpop.f32.mrf.mxu3  ;;  %v527_v50 = vmul.f32 %v2985_v1, %v403_v46  ;;  %2064 = vrot.lane.b32.xlu1 %v1855_v44, %s2693_s0  ;;  %1920 = vst.msk [vmem:[%s5816_s4 + $0x80] sm:$0xff] %vm1903_vm4, %v1855_v44  ;;  %v892_v51 = vsel %vm3127_vm7, %v3108_v31, %v887_v9 }
  0xac   :  { %v3191_v47 = vpop.eup %2473  ;;  %v3193_v49 = vadd.f32 1.0, %v2472_v37  ;;  %2483 = vpow2.f32 %v2395_v16  ;;  %v310_v28 = vpop.f32.mrf.mxu0  ;;  %v543_v39 = vmul.f32 %v2985_v1, %v451_v29  ;;  %v1839_v7 = vmul.f32 %v892_v51, %v2999_v8 }
  0xad   :  { %v358_v57 = vpop.f32.mrf.mxu1  ;;  %v3203_v63 = vpop.eup %2475  ;;  %2485 = vrcp.f32 %v3179_v38  ;;  %v496_v0 = vmul.f32 %v2985_v1, %v310_v28  ;;  %v3219_v16 = vadd.f32 %v2993_v3, %v527_v50  ;;  %v1362_v35 = vmul.f32 %v3099_v25, %v1361_v59 }
  0xae   :  { %v2478_v5 = vpop.eup %2477  ;;  %2487 = vrcp.f32 %v3193_v49  ;;  %v512_v17 = vmul.f32 %v2985_v1, %v358_v57  ;;  %v3225_v53 = vadd.f32 %v2993_v3, %v543_v39  ;;  %2032 = vrot.lane.b32.xlu0 %v1839_v7, %s2693_s0  ;;  %1904 = vst.msk [vmem:[%s5816_s4] sm:$0xff] %vm1903_vm4, %v1839_v7  ;;  %v1370_v44 = vand.u32 2147483648, %v3050_v48 }
  0xaf   :  { %5883 = vst [vmem:[#allocation3_spill] sm:$0xff] %v3219_v16  ;;  %v3222_v33 = vadd.f32 1.0, %v2478_v5  ;;  %2489 = vpow2.f32 %v2411_v24  ;;  %v3228_v31 = vadd.f32 %v2993_v3, %v496_v0  ;;  %v2396_v8 = vmul.f32 -1.442695, %v3219_v16 }
  0xb0   :  { %5884 = vst [vmem:[#allocation4_spill] sm:$0xff] %v3225_v53  ;;  %v3230_v34 = vpop.eup %2479  ;;  %2491 = vpow2.f32 %v2364_v27  ;;  %v3239_v24 = vadd.f32 %v2993_v3, %v512_v17  ;;  %v2412_v27 = vmul.f32 -1.442695, %v3225_v53  ;;  %v1363_v29 = vadd.f32 %v3099_v25, %v1362_v35 }
  0xb1   :  { %5885 = vst [vmem:[#allocation5_spill] sm:$0xff] %v3228_v31  ;;  %v3242_v36 = vpop.eup %2481  ;;  %2493 = vrcp.f32 %v3222_v33  ;;  %v2365_v37 = vmul.f32 -1.442695, %v3228_v31  ;;  %v1600_v9 = vmul.f32 %v3110_v32, %v3056_v52  ;;  %v1371_v28 = vor.u32 1.1754944e-38, %v1370_v44 }
  0xb2   :  { %5886 = vst [vmem:[#allocation6_spill] sm:$0xff] %v3239_v24  ;;  %v2484_v55 = vpop.eup %2483  ;;  %2495 = vpow2.f32 %v2380_v30  ;;  %v2381_v46 = vmul.f32 -1.442695, %v3239_v24  ;;  %v1367_v57 = vsel %vm1366_vm13, %v3099_v25, %v1363_v29  ;;  %vm1605_vm15 = vweird.f32 %v3110_v32  ;;  %v406_v7 = vpop.f32.mrf.mxu2 }
  0xb3   :  { %v3252_v59 = vpop.eup %2485  ;;  %v3254_v50 = vadd.f32 1.0, %v2484_v55  ;;  %2497 = vpow2.f32 %v2396_v8  ;;  %v1601_v51 = vsub.f32 1.0, %v1600_v9  ;;  %v1372_v0 = vsel %vm3199_vm12, %v1371_v28, %v1367_v57  ;;  %v454_v17 = vpop.f32.mrf.mxu3  ;;  %vm1606_vm1 = vmor %vm1604_vm14, %vm1605_vm15 }
  0xb4   :  { %v3261_v30 = vpop.eup %2487  ;;  %2499 = vpow2.f32 %v2412_v27  ;;  %v1608_v48 = vand.u32 2147483647, %v3056_v52  ;;  %v1610_v5 = vand.u32 2147483648, %v3056_v52  ;;  %v1871_v25 = vmul.f32 %v1372_v0, %v3011_v20  ;;  %v313_v44 = vpop.f32.mrf.mxu0 }
  0xb5   :  { %v2490_v39 = vpop.eup %2489  ;;  %2501 = vrcp.f32 %v3254_v50  ;;  %v1602_v27 = vmul.f32 %v3110_v32, %v1601_v51  ;;  %v361_v55 = vpop.f32.mrf.mxu1  ;;  %v497_v0 = vmul.f32 %v2985_v1, %v313_v44  ;;  %vm1619_vm2 = vweird.f32 %v3123_v45 }
  0xb6   :  { %v2492_v8 = vpop.eup %2491  ;;  %v3270_v35 = vadd.f32 1.0, %v2490_v39  ;;  %2503 = vpow2.f32 %v2365_v37  ;;  %vm3278_vm0 = vcmp.eq.f32.partialorder %v1608_v48, 8.507059e+37  ;;  %v1611_v28 = vor.u32 1.1754944e-38, %v1610_v5  ;;  %2096 = vrot.lane.b32.xlu2 %v1871_v25, %s2693_s0  ;;  %1936 = vst.msk [vmem:[%s5816_s4 + $0x100] sm:$0xff] %vm1903_vm4, %v1871_v25 }
  0xb7   :  { %v3274_v29 = vpop.eup %2493  ;;  %v3276_v58 = vadd.f32 1.0, %v2492_v8  ;;  %2505 = vpow2.f32 %v2381_v46  ;;  %v1603_v20 = vadd.f32 %v3110_v32, %v1602_v27  ;;  %v528_v37 = vmul.f32 %v2985_v1, %v406_v7 }
  0xb8   :  { %v2496_v57 = vpop.eup %2495  ;;  %2507 = vrcp.f32 %v3270_v35  ;;  %v544_v46 = vmul.f32 %v2985_v1, %v454_v17  ;;  %v513_v48 = vmul.f32 %v2985_v1, %v361_v55  ;;  %v3317_v55 = vadd.f32 %v2993_v3, %v497_v0 }
  0xb9   :  { %v2498_v51 = vpop.eup %2497  ;;  %2509 = vrcp.f32 %v3276_v58  ;;  %v3292_v39 = vadd.f32 1.0, %v2496_v57  ;;  %v1607_v7 = vsel %vm1606_vm1, %v3110_v32, %v1603_v20  ;;  %v3304_v17 = vadd.f32 %v2993_v3, %v528_v37 }
  0xba   :  { %v2500_v5 = vpop.eup %2499  ;;  %v3300_v8 = vadd.f32 1.0, %v2498_v51  ;;  %v3307_v25 = vadd.f32 %v2993_v3, %v544_v46  ;;  %v1612_v44 = vsel %vm3278_vm0, %v1611_v28, %v1607_v7  ;;  %5892 = vst [vmem:[#allocation10_spill] sm:$0xff] %v3317_v55  ;;  %v2366_v9 = vmul.f32 -1.442695, %v3317_v55 }
  0xbb   :  { %5889 = vst [vmem:[#allocation7_spill] sm:$0xff] %v3304_v17  ;;  %v3309_v27 = vpop.eup %2501  ;;  %2511 = vrcp.f32 %v3292_v39  ;;  %v3312_v52 = vadd.f32 1.0, %v2500_v5  ;;  %v1887_v32 = vmul.f32 %v1612_v44, %v3014_v21  ;;  %v2397_v20 = vmul.f32 -1.442695, %v3304_v17 }
  0xbc   :  { %5890 = vst [vmem:[#allocation8_spill] sm:$0xff] %v3307_v25  ;;  %v2504_v57 = vpop.eup %2503  ;;  %2513 = vrcp.f32 %v3300_v8  ;;  %v2413_v37 = vmul.f32 -1.442695, %v3307_v25  ;;  %v3328_v28 = vadd.f32 %v2993_v3, %v513_v48  ;;  %v1615_v21 = vmul.f32 %v3191_v47, %v3123_v45  ;;  %v316_v55 = vpop.f32.mrf.mxu0 }
  0xbd   :  { %5891 = vst [vmem:[#allocation9_spill] sm:$0xff] %v3312_v52  ;;  %v2506_v46 = vpop.eup %2505  ;;  %2515 = vrcp.f32 %v3312_v52  ;;  %v3324_v51 = vadd.f32 1.0, %v2504_v57  ;;  %2128 = vrot.lane.b32.xlu0 %v1887_v32, %s2693_s0  ;;  %vm1620_vm3 = vweird.f32 %v3191_v47  ;;  %v1623_v44 = vand.u32 2147483647, %v3123_v45 }
  0xbe   :  { %5894 = vst [vmem:[#allocation12_spill] sm:$0xff] %v3328_v28  ;;  %v3330_v0 = vpop.eup %2507  ;;  %v3332_v5 = vadd.f32 1.0, %v2506_v46  ;;  %2517 = vpow2.f32 %v2397_v20  ;;  %v2382_v48 = vmul.f32 -1.442695, %v3328_v28  ;;  %v1616_v57 = vsub.f32 1.0, %v1615_v21  ;;  %vm3374_vm8 = vmor %vm1619_vm2, %vm1620_vm3 }
  0xbf   :  { %5893 = vst [vmem:[#allocation11_spill] sm:$0xff] %v3324_v51  ;;  %v3342_v7 = vpop.eup %2509  ;;  %2519 = vrcp.f32 %v3324_v51  ;;  %v1135_v20 = vmul.f32 %v3137_v60, %v3080_v11  ;;  %vm3354_vm5 = vcmp.eq.f32.partialorder %v1623_v44, 8.507059e+37  ;;  %vm1139_vm6 = vweird.f32 %v3080_v11 }
  0xc0   :  { %5895 = vst [vmem:[#allocation13_spill] sm:$0xff] %v3332_v5  ;;  %2521 = vrcp.f32 %v3332_v5  ;;  %vm1140_vm7 = vweird.f32 %v3137_v60  ;;  %v1617_v21 = vmul.f32 %v3191_v47, %v1616_v57  ;;  %v1145_v44 = vand.u32 2147483648, %v3080_v11  ;;  %v409_v57 = vpop.f32.mrf.mxu2 }
  0xc1   :  { %1952 = vst.msk [vmem:[%s5816_s4 + $0x180] sm:$0xff] %vm1903_vm4, %v1887_v32  ;;  %v1625_v32 = vand.u32 2147483648, %v3123_v45  ;;  %v3352_v46 = vpop.eup %2511  ;;  %2523 = vpow2.f32 %v2413_v37  ;;  %v1136_v17 = vsub.f32 1.0, %v1135_v20  ;;  %v1143_v37 = vand.u32 2147483647, %v3080_v11  ;;  %vm3389_vm11 = vmor %vm1139_vm6, %vm1140_vm7 }
  0xc2   :  { %v3360_v28 = vpop.eup %2513  ;;  %2525 = vpow2.f32 %v2366_v9  ;;  %v895_v31 = vmul.f32 %v3131_v54, %v3075_v6  ;;  %v1618_v5 = vadd.f32 %v3191_v47, %v1617_v21  ;;  %vm899_vm9 = vweird.f32 %v3075_v6 }
  0xc3   :  { %v1626_v25 = vor.u32 1.1754944e-38, %v1625_v32  ;;  %v3363_v24 = vpop.eup %2515  ;;  %2527 = vpow2.f32 %v2382_v48  ;;  %v1137_v48 = vmul.f32 %v3137_v60, %v1136_v17  ;;  %vm900_vm10 = vweird.f32 %v3131_v54 }
  0xc4   :  { %5898 = vst [vmem:[#allocation14_spill] sm:$0xff] %v3363_v24  ;;  %v2518_v53 = vpop.eup %2517  ;;  %vm3393_vm12 = vcmp.eq.f32.partialorder %v1143_v37, 8.507059e+37  ;;  %v1146_v17 = vor.u32 1.1754944e-38, %v1145_v44  ;;  %v896_v51 = vsub.f32 1.0, %v895_v31  ;;  %v903_v11 = vand.u32 2147483647, %v3075_v6  ;;  %vm901_vm14 = vmor %vm899_vm9, %vm900_vm10 }
  0xc5   :  { %v3381_v32 = vpop.eup %2519  ;;  %v3383_v20 = vadd.f32 1.0, %v2518_v53  ;;  %v1622_v53 = vsel %vm3374_vm8, %v3191_v47, %v1618_v5  ;;  %v905_v24 = vand.u32 2147483648, %v3075_v6  ;;  %v529_v44 = vmul.f32 %v2985_v1, %v409_v57 }
  0xc6   :  { %5901 = vst [vmem:[#allocation15_spill] sm:$0xff] %v3381_v32  ;;  %v3397_v16 = vpop.eup %2521  ;;  %v1138_v32 = vadd.f32 %v3137_v60, %v1137_v48  ;;  %v1627_v37 = vsel %vm3354_vm5, %v1626_v25, %v1622_v53  ;;  %v897_v31 = vmul.f32 %v3131_v54, %v896_v51  ;;  %vm3416_vm13 = vcmp.eq.f32.partialorder %v903_v11, 8.507059e+37  ;;  %v457_v48 = vpop.f32.mrf.mxu3 }
  0xc7   :  { %5906 = vst [vmem:[#allocation16_spill] sm:$0xff] %v3397_v16  ;;  %v2524_v52 = vpop.eup %2523  ;;  %2529 = vrcp.f32 %v3383_v20  ;;  %v1888_v47 = vmul.f32 %v1627_v37, %v3040_v41  ;;  %v906_v57 = vor.u32 1.1754944e-38, %v905_v24  ;;  %v364_v41 = vpop.f32.mrf.mxu1  ;;  %v498_v21 = vmul.f32 %v2985_v1, %v316_v55 }
  0xc8   :  { %v2526_v16 = vpop.eup %2525  ;;  %v3410_v4 = vadd.f32 1.0, %v2524_v52  ;;  %v1142_v5 = vsel %vm3389_vm11, %v3137_v60, %v1138_v32  ;;  %v898_v52 = vadd.f32 %v3131_v54, %v897_v31  ;;  %v545_v32 = vmul.f32 %v2985_v1, %v457_v48 }
  0xc9   :  { %v2528_v25 = vpop.eup %2527  ;;  %v3420_v53 = vadd.f32 1.0, %v2526_v16  ;;  %v1147_v51 = vsel %vm3393_vm12, %v1146_v17, %v1142_v5  ;;  %1953 = vst.msk [vmem:[%s5816_s4 + $0x188] sm:$0xff] %vm1903_vm4, %v1888_v47  ;;  %2130 = vrot.lane.b32.xlu1 %v1888_v47, %s2693_s0  ;;  %v3439_v16 = vadd.f32 %v2993_v3, %v529_v44  ;;  %v3462_v31 = vadd.f32 %v2993_v3, %v498_v21 }
  0xca   :  { %2531 = vrcp.f32 %v3410_v4  ;;  %v3426_v45 = vadd.f32 1.0, %v2528_v25  ;;  %v1856_v60 = vmul.f32 %v1147_v51, %v3020_v23  ;;  %v902_v24 = vsel %vm901_vm14, %v3131_v54, %v898_v52 }
  0xcb   :  { %2533 = vrcp.f32 %v3420_v53  ;;  %v907_v23 = vsel %vm3416_vm13, %v906_v57, %v902_v24  ;;  %v2398_v6 = vmul.f32 -1.442695, %v3439_v16  ;;  %v514_v54 = vmul.f32 %v2985_v1, %v364_v41  ;;  %5909 = vst [vmem:[#allocation17_spill] sm:$0xff] %v3462_v31 }
  0xcc   :  { %2535 = vrcp.f32 %v3426_v45  ;;  %2066 = vrot.lane.b32.xlu2 %v1856_v60, %s2693_s0  ;;  %1921 = vst.msk [vmem:[%s5816_s4 + $0x88] sm:$0xff] %vm1903_vm4, %v1856_v60  ;;  %v1840_v11 = vmul.f32 %v907_v23, %v3017_v22  ;;  %v3459_v37 = vadd.f32 %v2993_v3, %v545_v32  ;;  %v1630_v44 = vmul.f32 %v3252_v59, %v3179_v38 }
  0xcd   :  { %v3455_v17 = vpop.eup %2529  ;;  %2537 = vpow2.f32 %v2398_v6  ;;  %v3467_v47 = vadd.f32 %v2993_v3, %v514_v54  ;;  %vm1634_vm15 = vweird.f32 %v3179_v38  ;;  %vm1635_vm0 = vweird.f32 %v3252_v59 }
  0xce   :  { %2034 = vrot.lane.b32.xlu0 %v1840_v11, %s2693_s0  ;;  %1905 = vst.msk [vmem:[%s5816_s4 + $0x8] sm:$0xff] %vm1903_vm4, %v1840_v11  ;;  %v2414_v22 = vmul.f32 -1.442695, %v3459_v37  ;;  %v2367_v5 = vmul.f32 -1.442695, %v3462_v31  ;;  %v1631_v9 = vsub.f32 1.0, %v1630_v44  ;;  %v910_v48 = vmul.f32 %v3203_v63, %v3133_v56  ;;  %vm1636_vm5 = vmor %vm1634_vm15, %vm1635_vm0  ;;  %v319_v31 = vpop.f32.mrf.mxu0 }
  0xcf   :  { %5910 = vst [vmem:[#allocation18_spill] sm:$0xff] %v3467_v47  ;;  %v2383_v25 = vmul.f32 -1.442695, %v3467_v47  ;;  %v1638_v51 = vand.u32 2147483647, %v3179_v38  ;;  %v1640_v52 = vand.u32 2147483648, %v3179_v38  ;;  %vm914_vm1 = vweird.f32 %v3133_v56  ;;  %v367_v47 = vpop.f32.mrf.mxu1 }
  0xd0   :  { %v3480_v55 = vpop.eup %2531  ;;  %2539 = vpow2.f32 %v2414_v22  ;;  %v1632_v41 = vmul.f32 %v3252_v59, %v1631_v9  ;;  %v911_v60 = vsub.f32 1.0, %v910_v48  ;;  %vm915_vm2 = vweird.f32 %v3203_v63  ;;  %v412_v9 = vpop.f32.mrf.mxu2 }
  0xd1   :  { %v3486_v57 = vpop.eup %2533  ;;  %2541 = vpow2.f32 %v2367_v5  ;;  %vm3492_vm3 = vcmp.eq.f32.partialorder %v1638_v51, 8.507059e+37  ;;  %v1641_v21 = vor.u32 1.1754944e-38, %v1640_v52  ;;  %v918_v23 = vand.u32 2147483647, %v3133_v56  ;;  %vm916_vm9 = vmor %vm914_vm1, %vm915_vm2 }
  0xd2   :  { %v3490_v24 = vpop.eup %2535  ;;  %2543 = vpow2.f32 %v2383_v25  ;;  %v1633_v6 = vadd.f32 %v3252_v59, %v1632_v41  ;;  %v912_v54 = vmul.f32 %v3203_v63, %v911_v60  ;;  %v920_v11 = vand.u32 2147483648, %v3133_v56 }
  0xd3   :  { %v2538_v44 = vpop.eup %2537  ;;  %vm3504_vm6 = vcmp.eq.f32.partialorder %v918_v23, 8.507059e+37  ;;  %v1375_v5 = vmul.f32 %v3165_v18, %v3101_v26  ;;  %vm1379_vm7 = vweird.f32 %v3101_v26  ;;  %vm1380_vm8 = vweird.f32 %v3165_v18 }
  0xd4   :  { %v3512_v48 = vadd.f32 1.0, %v2538_v44  ;;  %v1637_v25 = vsel %vm1636_vm5, %v3252_v59, %v1633_v6  ;;  %v913_v51 = vadd.f32 %v3203_v63, %v912_v54  ;;  %v921_v38 = vor.u32 1.1754944e-38, %v920_v11  ;;  %vm1381_vm11 = vmor %vm1379_vm7, %vm1380_vm8 }
  0xd5   :  { %v1642_v52 = vsel %vm3492_vm3, %v1641_v21, %v1637_v25  ;;  %v1376_v41 = vsub.f32 1.0, %v1375_v5  ;;  %v1383_v60 = vand.u32 2147483647, %v3101_v26  ;;  %v1385_v23 = vand.u32 2147483648, %v3101_v26  ;;  %v460_v21 = vpop.f32.mrf.mxu3 }
  0xd6   :  { %v2540_v44 = vpop.eup %2539  ;;  %2545 = vrcp.f32 %v3512_v48  ;;  %v1889_v59 = vmul.f32 %v1642_v52, %v3086_v13  ;;  %v917_v6 = vsel %vm916_vm9, %v3203_v63, %v913_v51  ;;  %v530_v32 = vmul.f32 %v2985_v1, %v412_v9 }
  0xd7   :  { %v2542_v54 = vpop.eup %2541  ;;  %v3528_v11 = vadd.f32 1.0, %v2540_v44  ;;  %v922_v56 = vsel %vm3504_vm6, %v921_v38, %v917_v6  ;;  %v1377_v5 = vmul.f32 %v3165_v18, %v1376_v41  ;;  %vm3533_vm10 = vcmp.eq.f32.partialorder %v1383_v60, 8.507059e+37 }
  0xd8   :  { %v2544_v13 = vpop.eup %2543  ;;  %v3537_v52 = vadd.f32 1.0, %v2542_v54  ;;  %1954 = vst.msk [vmem:[%s5816_s4 + $0x190] sm:$0xff] %vm1903_vm4, %v1889_v59  ;;  %2132 = vrot.lane.b32.xlu2 %v1889_v59, %s2693_s0  ;;  %v1841_v63 = vmul.f32 %v922_v56, %v3043_v42  ;;  %v1386_v22 = vor.u32 1.1754944e-38, %v1385_v23  ;;  %v3546_v9 = vadd.f32 %v2993_v3, %v530_v32 }
  0xd9   :  { %2547 = vrcp.f32 %v3528_v11  ;;  %v3549_v51 = vadd.f32 1.0, %v2544_v13  ;;  %v1378_v38 = vadd.f32 %v3165_v18, %v1377_v5  ;;  %v546_v41 = vmul.f32 %v2985_v1, %v460_v21 }
  0xda   :  { %2549 = vrcp.f32 %v3537_v52  ;;  %2036 = vrot.lane.b32.xlu1 %v1841_v63, %s2693_s0  ;;  %1906 = vst.msk [vmem:[%s5816_s4 + $0x10] sm:$0xff] %vm1903_vm4, %v1841_v63  ;;  %v2399_v42 = vmul.f32 -1.442695, %v3546_v9  ;;  %v499_v60 = vmul.f32 %v2985_v1, %v319_v31  ;;  %v515_v23 = vmul.f32 %v2985_v1, %v367_v47 }
  0xdb   :  { %2551 = vrcp.f32 %v3549_v51  ;;  %v1382_v44 = vsel %vm1381_vm11, %v3165_v18, %v1378_v38  ;;  %v3569_v59 = vadd.f32 %v2993_v3, %v546_v41  ;;  %v1405_v6 = vmul.f32 %v3309_v27, %v3254_v50 }
  0xdc   :  { %v3573_v32 = vpop.eup %2545  ;;  %v1387_v26 = vsel %vm3533_vm10, %v1386_v22, %v1382_v44  ;;  %2553 = vpow2.f32 %v2399_v42  ;;  %v3578_v31 = vadd.f32 %v2993_v3, %v499_v60  ;;  %v3581_v47 = vadd.f32 %v2993_v3, %v515_v23 }
  0xdd   :  { %5917 = vst [vmem:[#allocation19_spill] sm:$0xff] %v3569_v59  ;;  %v1872_v18 = vmul.f32 %v1387_v26, %v3037_v40  ;;  %v2415_v21 = vmul.f32 -1.442695, %v3569_v59  ;;  %v1406_v54 = vsub.f32 1.0, %v1405_v6  ;;  %vm1409_vm12 = vweird.f32 %v3254_v50 }
  0xde   :  { %5918 = vst [vmem:[#allocation20_spill] sm:$0xff] %v3578_v31  ;;  %v2368_v56 = vmul.f32 -1.442695, %v3578_v31  ;;  %v2384_v5 = vmul.f32 -1.442695, %v3581_v47  ;;  %vm1410_vm13 = vweird.f32 %v3309_v27  ;;  %v1415_v40 = vand.u32 2147483648, %v3254_v50 }
  0xdf   :  { %5919 = vst [vmem:[#allocation21_spill] sm:$0xff] %v3581_v47  ;;  %v1413_v25 = vand.u32 2147483647, %v3254_v50  ;;  %v3590_v13 = vpop.eup %2547  ;;  %2098 = vrot.lane.b32.xlu0 %v1872_v18, %s2693_s0  ;;  %2555 = vpow2.f32 %v2415_v21  ;;  %v1407_v3 = vmul.f32 %v3309_v27, %v1406_v54  ;;  %v1390_v63 = vmul.f32 %v3242_v36, %v3167_v19  ;;  %vm1411_vm1 = vmor %vm1409_vm12, %vm1410_vm13 }
  0xe0   :  { %1937 = vst.msk [vmem:[%s5816_s4 + $0x108] sm:$0xff] %vm1903_vm4, %v1872_v18  ;;  %v3601_v22 = vpop.eup %2549  ;;  %2557 = vpow2.f32 %v2368_v56  ;;  %vm1394_vm15 = vweird.f32 %v3167_v19  ;;  %vm1395_vm0 = vweird.f32 %v3242_v36  ;;  %v1416_v60 = vor.u32 1.1754944e-38, %v1415_v40 }
  0xe1   :  { %vm3603_vm14 = vcmp.eq.f32.partialorder %v1413_v25, 8.507059e+37  ;;  %v3609_v41 = vpop.eup %2551  ;;  %2559 = vpow2.f32 %v2384_v5  ;;  %v1408_v42 = vadd.f32 %v3309_v27, %v1407_v3  ;;  %v1391_v23 = vsub.f32 1.0, %v1390_v63  ;;  %v415_v5 = vpop.f32.mrf.mxu2  ;;  %vm3642_vm6 = vmor %vm1394_vm15, %vm1395_vm0 }
  0xe2   :  { %v2554_v44 = vpop.eup %2553  ;;  %v1398_v6 = vand.u32 2147483647, %v3167_v19  ;;  %v1400_v26 = vand.u32 2147483648, %v3167_v19  ;;  %v1150_v18 = vmul.f32 %v3230_v34, %v3155_v10  ;;  %vm1154_vm2 = vweird.f32 %v3155_v10  ;;  %v463_v63 = vpop.f32.mrf.mxu3 }
  0xe3   :  { %v3621_v21 = vadd.f32 1.0, %v2554_v44  ;;  %v1412_v54 = vsel %vm1411_vm1, %v3309_v27, %v1408_v42  ;;  %v1392_v56 = vmul.f32 %v3242_v36, %v1391_v23  ;;  %vm1155_vm3 = vweird.f32 %v3230_v34 }
  0xe4   :  { %v1417_v50 = vsel %vm3603_vm14, %v1416_v60, %v1412_v54  ;;  %vm3628_vm5 = vcmp.eq.f32.partialorder %v1398_v6, 8.507059e+37  ;;  %v1401_v3 = vor.u32 1.1754944e-38, %v1400_v26  ;;  %v1151_v40 = vsub.f32 1.0, %v1150_v18  ;;  %vm3663_vm7 = vmor %vm1154_vm2, %vm1155_vm3 }
  0xe5   :  { %v2556_v47 = vpop.eup %2555  ;;  %2561 = vrcp.f32 %v3621_v21  ;;  %v1874_v27 = vmul.f32 %v1417_v50, %v3141_v61  ;;  %v1393_v42 = vadd.f32 %v3242_v36, %v1392_v56  ;;  %v1158_v23 = vand.u32 2147483647, %v3155_v10 }
  0xe6   :  { %v2558_v44 = vpop.eup %2557  ;;  %v3636_v31 = vadd.f32 1.0, %v2556_v47  ;;  %v1152_v60 = vmul.f32 %v3230_v34, %v1151_v40  ;;  %v1160_v6 = vand.u32 2147483648, %v3155_v10  ;;  %v531_v61 = vmul.f32 %v2985_v1, %v415_v5  ;;  %v322_v5 = vpop.f32.mrf.mxu0 }
  0xe7   :  { %v2560_v26 = vpop.eup %2559  ;;  %v3649_v18 = vadd.f32 1.0, %v2558_v44  ;;  %1939 = vst.msk [vmem:[%s5816_s4 + $0x118] sm:$0xff] %vm1903_vm4, %v1874_v27  ;;  %2102 = vrot.lane.b32.xlu2 %v1874_v27, %s2693_s0  ;;  %v1397_v19 = vsel %vm3642_vm6, %v3242_v36, %v1393_v42  ;;  %vm3667_vm8 = vcmp.eq.f32.partialorder %v1158_v23, 8.507059e+37  ;;  %v547_v56 = vmul.f32 %v2985_v1, %v463_v63  ;;  %v3683_v42 = vld [vmem:[%s5815_s3] ss:$0 sm:$0xff] }
  0xe8   :  { %2563 = vrcp.f32 %v3636_v31  ;;  %v3673_v50 = vadd.f32 1.0, %v2560_v26  ;;  %v1402_v36 = vsel %vm3628_vm5, %v1401_v3, %v1397_v19  ;;  %v1153_v10 = vadd.f32 %v3230_v34, %v1152_v60 }
  0xe9   :  { %2565 = vrcp.f32 %v3649_v18  ;;  %v1873_v40 = vmul.f32 %v1402_v36, %v3083_v12  ;;  %v1161_v27 = vor.u32 1.1754944e-38, %v1160_v6  ;;  %v3686_v1 = vadd.f32 %v3683_v42, %v531_v61  ;;  %v3698_v12 = vld [vmem:[%s5814_s2] ss:$0 sm:$0xff] }
  0xea   :  { %5930 = vst [vmem:[#allocation22_spill] sm:$0xff] %v3673_v50  ;;  %2567 = vrcp.f32 %v3673_v50  ;;  %v1157_v25 = vsel %vm3663_vm7, %v3230_v34, %v1153_v10  ;;  %v3693_v3 = vadd.f32 %v3683_v42, %v547_v56  ;;  %v500_v63 = vmul.f32 %v3698_v12, %v322_v5 }
  0xeb   :  { %5931 = vst [vmem:[#allocation23_spill] sm:$0xff] %v3686_v1  ;;  %v3701_v23 = vpop.eup %2561  ;;  %2100 = vrot.lane.b32.xlu1 %v1873_v40, %s2693_s0  ;;  %v1162_v34 = vsel %vm3667_vm8, %v1161_v27, %v1157_v25  ;;  %v2400_v44 = vmul.f32 -1.442695, %v3686_v1  ;;  %v925_v38 = vmul.f32 %v3261_v30, %v3193_v49  ;;  %vm929_vm9 = vweird.f32 %v3193_v49 }
  0xec   :  { %5932 = vst [vmem:[#allocation24_spill] sm:$0xff] %v3693_v3  ;;  %v1857_v60 = vmul.f32 %v1162_v34, %v3046_v43  ;;  %v2416_v6 = vmul.f32 -1.442695, %v3693_v3  ;;  %v3717_v61 = vadd.f32 %v3683_v42, %v500_v63  ;;  %vm930_vm10 = vweird.f32 %v3261_v30 }
  0xed   :  { %1938 = vst.msk [vmem:[%s5816_s4 + $0x110] sm:$0xff] %vm1903_vm4, %v1873_v40  ;;  %2569 = vpow2.f32 %v2400_v44  ;;  %v926_v26 = vsub.f32 1.0, %v925_v38  ;;  %v933_v19 = vand.u32 2147483647, %v3193_v49  ;;  %v935_v47 = vand.u32 2147483648, %v3193_v49  ;;  %vm3747_vm14 = vmor %vm929_vm9, %vm930_vm10  ;;  %v370_v38 = vpop.f32.mrf.mxu1 }
  0xee   :  { %5933 = vst [vmem:[#allocation25_spill] sm:$0xff] %v3717_v61  ;;  %v3722_v54 = vpop.eup %2563  ;;  %2068 = vrot.lane.b32.xlu0 %v1857_v60, %s2693_s0  ;;  %2571 = vpow2.f32 %v2416_v6  ;;  %v2369_v43 = vmul.f32 -1.442695, %v3717_v61  ;;  %v940_v56 = vmul.f32 %v3342_v7, %v3276_v58  ;;  %vm944_vm11 = vweird.f32 %v3276_v58  ;;  %v418_v61 = vpop.f32.mrf.mxu2 }
  0xef   :  { %1922 = vst.msk [vmem:[%s5816_s4 + $0x90] sm:$0xff] %vm1903_vm4, %v1857_v60  ;;  %v3733_v5 = vpop.eup %2565  ;;  %v927_v36 = vmul.f32 %v3261_v30, %v926_v26  ;;  %vm3736_vm12 = vcmp.eq.f32.partialorder %v933_v19, 8.507059e+37  ;;  %v936_v40 = vor.u32 1.1754944e-38, %v935_v47  ;;  %vm945_vm13 = vweird.f32 %v3342_v7 }
  0xf0   :  { %v3741_v27 = vpop.eup %2567  ;;  %2573 = vpow2.f32 %v2369_v43  ;;  %v941_v63 = vsub.f32 1.0, %v940_v56  ;;  %v948_v34 = vand.u32 2147483647, %v3276_v58  ;;  %v950_v44 = vand.u32 2147483648, %v3276_v58  ;;  %vm3771_vm2 = vmor %vm944_vm11, %vm945_vm13 }
  0xf1   :  { %5936 = vst [vmem:[#allocation26_spill] sm:$0xff] %v3741_v27  ;;  %v928_v60 = vadd.f32 %v3261_v30, %v927_v36  ;;  %v1645_v6 = vmul.f32 %v3330_v0, %v3270_v35  ;;  %vm1649_vm15 = vweird.f32 %v3270_v35  ;;  %vm1650_vm0 = vweird.f32 %v3330_v0  ;;  %v466_v27 = vpop.f32.mrf.mxu3 }
  0xf2   :  { %v942_v49 = vmul.f32 %v3342_v7, %v941_v63  ;;  %vm3759_vm1 = vcmp.eq.f32.partialorder %v948_v34, 8.507059e+37  ;;  %v951_v19 = vor.u32 1.1754944e-38, %v950_v44  ;;  %v1653_v47 = vand.u32 2147483647, %v3270_v35  ;;  %vm1651_vm5 = vmor %vm1649_vm15, %vm1650_vm0 }
  0xf3   :  { %v2570_v43 = vpop.eup %2569  ;;  %v932_v56 = vsel %vm3747_vm14, %v3261_v30, %v928_v60  ;;  %v1646_v63 = vsub.f32 1.0, %v1645_v6  ;;  %v1655_v34 = vand.u32 2147483648, %v3270_v35  ;;  %v516_v44 = vmul.f32 %v3698_v12, %v370_v38 }
  0xf4   :  { %v2572_v3 = vpop.eup %2571  ;;  %v3777_v1 = vadd.f32 1.0, %v2570_v43  ;;  %v937_v30 = vsel %vm3736_vm12, %v936_v40, %v932_v56  ;;  %v943_v25 = vadd.f32 %v3342_v7, %v942_v49  ;;  %vm3782_vm3 = vcmp.eq.f32.partialorder %v1653_v47, 8.507059e+37 }
  0xf5   :  { %v3786_v60 = vadd.f32 1.0, %v2572_v3  ;;  %v1842_v6 = vmul.f32 %v937_v30, %v3090_v14  ;;  %v1647_v59 = vmul.f32 %v3330_v0, %v1646_v63  ;;  %v1656_v38 = vor.u32 1.1754944e-38, %v1655_v34 }
  0xf6   :  { %v2574_v50 = vpop.eup %2573  ;;  %2575 = vrcp.f32 %v3777_v1  ;;  %v947_v10 = vsel %vm3771_vm2, %v3342_v7, %v943_v25  ;;  %v3795_v40 = vadd.f32 %v3683_v42, %v516_v44  ;;  %v532_v49 = vmul.f32 %v3698_v12, %v418_v61 }
  0xf7   :  { %2577 = vrcp.f32 %v3786_v60  ;;  %v3799_v3 = vadd.f32 1.0, %v2574_v50  ;;  %2038 = vrot.lane.b32.xlu1 %v1842_v6, %s2693_s0  ;;  %1907 = vst.msk [vmem:[%s5816_s4 + $0x18] sm:$0xff] %vm1903_vm4, %v1842_v6  ;;  %v952_v14 = vsel %vm3759_vm1, %v951_v19, %v947_v10  ;;  %v1648_v7 = vadd.f32 %v3330_v0, %v1647_v59 }
  0xf8   :  { %5945 = vst [vmem:[#allocation27_spill] sm:$0xff] %v3795_v40  ;;  %v1843_v47 = vmul.f32 %v952_v14, %v3149_v2  ;;  %v2385_v50 = vmul.f32 -1.442695, %v3795_v40  ;;  %v3816_v61 = vadd.f32 %v3683_v42, %v532_v49  ;;  %v548_v43 = vmul.f32 %v3698_v12, %v466_v27 }
  0xf9   :  { %2579 = vrcp.f32 %v3799_v3  ;;  %v1652_v26 = vsel %vm1651_vm5, %v3330_v0, %v1648_v7  ;;  %v1165_v59 = vmul.f32 %v3274_v29, %v3222_v33  ;;  %vm1169_vm6 = vweird.f32 %v3222_v33 }
  0xfa   :  { %5946 = vst [vmem:[#allocation28_spill] sm:$0xff] %v3816_v61  ;;  %2040 = vrot.lane.b32.xlu2 %v1843_v47, %s2693_s0  ;;  %v1657_v2 = vsel %vm3782_vm3, %v1656_v38, %v1652_v26  ;;  %2581 = vpow2.f32 %v2385_v50  ;;  %v2401_v35 = vmul.f32 -1.442695, %v3816_v61  ;;  %v3833_v0 = vadd.f32 %v3683_v42, %v548_v43  ;;  %v5980_v61 = vld [vmem:[#allocation4_spill] sm:$0xff] }
  0xfb   :  { %1908 = vst.msk [vmem:[%s5816_s4 + $0x20] sm:$0xff] %vm1903_vm4, %v1843_v47  ;;  %v1890_v27 = vmul.f32 %v1657_v2, %v3144_v62  ;;  %v1166_v19 = vsub.f32 1.0, %v1165_v59  ;;  %vm1170_vm7 = vweird.f32 %v3274_v29  ;;  %v1173_v56 = vand.u32 2147483647, %v3222_v33 }
  0xfc   :  { %5947 = vst [vmem:[#allocation29_spill] sm:$0xff] %v3833_v0  ;;  %v3838_v36 = vpop.eup %2575  ;;  %2583 = vpow2.f32 %v2401_v35  ;;  %v2417_v63 = vmul.f32 -1.442695, %v3833_v0  ;;  %v1175_v34 = vand.u32 2147483648, %v3222_v33  ;;  %v1180_v44 = vmul.f32 %v3352_v46, %v3292_v39  ;;  %vm3862_vm11 = vmor %vm1169_vm6, %vm1170_vm7 }
  0xfd   :  { %v3844_v30 = vpop.eup %2577  ;;  %1955 = vst.msk [vmem:[%s5816_s4 + $0x198] sm:$0xff] %vm1903_vm4, %v1890_v27  ;;  %2134 = vrot.lane.b32.xlu0 %v1890_v27, %s2693_s0  ;;  %v1167_v62 = vmul.f32 %v3274_v29, %v1166_v19  ;;  %vm3852_vm8 = vcmp.eq.f32.partialorder %v1173_v56, 8.507059e+37  ;;  %vm1184_vm9 = vweird.f32 %v3292_v39  ;;  %vm1185_vm10 = vweird.f32 %v3352_v46  ;;  %v325_v56 = vpop.f32.mrf.mxu0 }
  0xfe   :  { %2585 = vpow2.f32 %v2417_v63  ;;  %v1176_v6 = vor.u32 1.1754944e-38, %v1175_v34  ;;  %v1181_v38 = vsub.f32 1.0, %v1180_v44  ;;  %v1188_v10 = vand.u32 2147483647, %v3292_v39  ;;  %vm3890_vm15 = vmor %vm1184_vm9, %vm1185_vm10  ;;  %v373_v63 = vpop.f32.mrf.mxu1 }
  0xff   :  { %v3867_v49 = vpop.eup %2579  ;;  %v1168_v14 = vadd.f32 %v3274_v29, %v1167_v62  ;;  %v1190_v7 = vand.u32 2147483648, %v3292_v39  ;;  %v1420_v47 = vmul.f32 %v3360_v28, %v3300_v8  ;;  %vm1424_vm12 = vweird.f32 %v3300_v8 }
 0x100   :  { %v2582_v33 = vpop.eup %2581  ;;  %v1182_v50 = vmul.f32 %v3352_v46, %v1181_v38  ;;  %vm3875_vm13 = vcmp.eq.f32.partialorder %v1188_v10, 8.507059e+37  ;;  %vm1425_vm14 = vweird.f32 %v3360_v28  ;;  %v1428_v26 = vand.u32 2147483647, %v3300_v8 }
 0x101   :  { %v3881_v59 = vadd.f32 1.0, %v2582_v33  ;;  %v1172_v2 = vsel %vm3862_vm11, %v3274_v29, %v1168_v14  ;;  %v1191_v27 = vor.u32 1.1754944e-38, %v1190_v7  ;;  %v1421_v19 = vsub.f32 1.0, %v1420_v47  ;;  %v421_v14 = vpop.f32.mrf.mxu2  ;;  %vm1426_vm1 = vmor %vm1424_vm12, %vm1425_vm14 }
 0x102   :  { %v2584_v34 = vpop.eup %2583  ;;  %v1177_v44 = vsel %vm3852_vm8, %v1176_v6, %v1172_v2  ;;  %v1183_v62 = vadd.f32 %v3352_v46, %v1182_v50  ;;  %vm3897_vm0 = vcmp.eq.f32.partialorder %v1428_v26, 8.507059e+37  ;;  %v1430_v39 = vand.u32 2147483648, %v3300_v8  ;;  %v5958_v26 = vld [vmem:[#allocation2_spill] sm:$0xff] }
 0x103   :  { %2587 = vrcp.f32 %v3881_v59  ;;  %v3903_v58 = vadd.f32 1.0, %v2584_v34  ;;  %v1858_v38 = vmul.f32 %v1177_v44, %v3093_v15  ;;  %v1422_v10 = vmul.f32 %v3360_v28, %v1421_v19 }
 0x104   :  { %v2586_v7 = vpop.eup %2585  ;;  %v1187_v25 = vsel %vm3890_vm15, %v3352_v46, %v1183_v62  ;;  %v1431_v6 = vor.u32 1.1754944e-38, %v1430_v39  ;;  %v501_v47 = vmul.f32 %v3698_v12, %v325_v56  ;;  %v517_v33 = vmul.f32 %v3698_v12, %v373_v63  ;;  %v5962_v63 = vld [vmem:[#allocation14_spill] sm:$0xff] }
 0x105   :  { %2589 = vrcp.f32 %v3903_v58  ;;  %v3913_v50 = vadd.f32 1.0, %v2586_v7  ;;  %1923 = vst.msk [vmem:[%s5816_s4 + $0x98] sm:$0xff] %vm1903_vm4, %v1858_v38  ;;  %2070 = vrot.lane.b32.xlu1 %v1858_v38, %s2693_s0  ;;  %v1192_v15 = vsel %vm3875_vm13, %v1191_v27, %v1187_v25  ;;  %v1423_v46 = vadd.f32 %v3360_v28, %v1422_v10  ;;  %v5961_v27 = vld [vmem:[#allocation9_spill] sm:$0xff]  ;;  %v5964_v38 = vld [vmem:[#allocation3_spill] sm:$0xff] }
 0x106   :  { %v1859_v2 = vmul.f32 %v1192_v15, %v5958_v26  ;;  %v3929_v35 = vadd.f32 %v3683_v42, %v501_v47  ;;  %v3932_v19 = vadd.f32 %v3683_v42, %v517_v33  ;;  %v533_v56 = vmul.f32 %v3698_v12, %v421_v14  ;;  %v5966_v47 = vld [vmem:[#allocation15_spill] sm:$0xff] }
 0x107   :  { %2591 = vrcp.f32 %v3913_v50  ;;  %v1427_v43 = vsel %vm1426_vm1, %v3360_v28, %v1423_v46  ;;  %v1660_v34 = vmul.f32 %v5962_v63, %v5961_v27  ;;  %vm1664_vm2 = vweird.f32 %v5961_v27 }
 0x108   :  { %5959 = vst [vmem:[#allocation2_spill] sm:$0xff] %v3929_v35  ;;  %2072 = vrot.lane.b32.xlu2 %v1859_v2, %s2693_s0  ;;  %v1432_v8 = vsel %vm3897_vm0, %v1431_v6, %v1427_v43  ;;  %v2370_v44 = vmul.f32 -1.442695, %v3929_v35  ;;  %v2386_v62 = vmul.f32 -1.442695, %v3932_v19  ;;  %v3950_v28 = vadd.f32 %v3683_v42, %v533_v56  ;;  %v5965_v6 = vld [vmem:[#allocation11_spill] sm:$0xff]  ;;  %v376_v35 = vpop.f32.mrf.mxu1 }
 0x109   :  { %5960 = vst [vmem:[#allocation30_spill] sm:$0xff] %v3932_v19  ;;  %v3952_v39 = vpop.eup %2587  ;;  %v1875_v10 = vmul.f32 %v1432_v8, %v5964_v38  ;;  %v1661_v14 = vsub.f32 1.0, %v1660_v34  ;;  %vm1665_vm3 = vweird.f32 %v5962_v63  ;;  %v1668_v7 = vand.u32 2147483647, %v5961_v27  ;;  %v5972_v38 = vld [vmem:[#allocation13_spill] sm:$0xff] }
 0x10a   :  { %1924 = vst.msk [vmem:[%s5816_s4 + $0xa0] sm:$0xff] %vm1903_vm4, %v1859_v2  ;;  %2593 = vpow2.f32 %v2370_v44  ;;  %v2402_v29 = vmul.f32 -1.442695, %v3950_v28  ;;  %v1670_v25 = vand.u32 2147483648, %v5961_v27  ;;  %v955_v33 = vmul.f32 %v5966_v47, %v5965_v6  ;;  %vm3976_vm7 = vmor %vm1664_vm2, %vm1665_vm3 }
 0x10b   :  { %5963 = vst [vmem:[#allocation9_spill] sm:$0xff] %v3950_v28  ;;  %v3961_v15 = vpop.eup %2589  ;;  %2104 = vrot.lane.b32.xlu0 %v1875_v10, %s2693_s0  ;;  %2595 = vpow2.f32 %v2386_v62  ;;  %v1662_v46 = vmul.f32 %v5962_v63, %v1661_v14  ;;  %vm3969_vm5 = vcmp.eq.f32.partialorder %v1668_v7, 8.507059e+37  ;;  %vm959_vm6 = vweird.f32 %v5965_v6 }
 0x10c   :  { %1940 = vst.msk [vmem:[%s5816_s4 + $0x120] sm:$0xff] %vm1903_vm4, %v1875_v10  ;;  %2597 = vpow2.f32 %v2402_v29  ;;  %v1671_v56 = vor.u32 1.1754944e-38, %v1670_v25  ;;  %v956_v43 = vsub.f32 1.0, %v955_v33  ;;  %vm960_vm8 = vweird.f32 %v5966_v47  ;;  %v5973_v10 = vld [vmem:[#allocation16_spill] sm:$0xff]  ;;  %v328_v29 = vpop.f32.mrf.mxu0 }
 0x10d   :  { %v3981_v34 = vpop.eup %2591  ;;  %v1663_v8 = vadd.f32 %v5962_v63, %v1662_v46  ;;  %v963_v44 = vand.u32 2147483647, %v5965_v6  ;;  %v965_v62 = vand.u32 2147483648, %v5965_v6  ;;  %v1195_v14 = vmul.f32 %v5973_v10, %v5972_v38  ;;  %vm3997_vm11 = vmor %vm959_vm6, %vm960_vm8 }
 0x10e   :  { %5971 = vst [vmem:[#allocation14_spill] sm:$0xff] %v3981_v34  ;;  %v957_v27 = vmul.f32 %v5966_v47, %v956_v43  ;;  %vm1199_vm9 = vweird.f32 %v5972_v38  ;;  %vm1200_vm10 = vweird.f32 %v5973_v10  ;;  %v1203_v7 = vand.u32 2147483647, %v5972_v38 }
 0x10f   :  { %v1667_v25 = vsel %vm3976_vm7, %v5962_v63, %v1663_v8  ;;  %vm4001_vm12 = vcmp.eq.f32.partialorder %v963_v44, 8.507059e+37  ;;  %v966_v43 = vor.u32 1.1754944e-38, %v965_v62  ;;  %v1196_v28 = vsub.f32 1.0, %v1195_v14  ;;  %vm4027_vm14 = vmor %vm1199_vm9, %vm1200_vm10 }
 0x110   :  { %v2594_v19 = vpop.eup %2593  ;;  %v1672_v0 = vsel %vm3969_vm5, %v1671_v56, %v1667_v25  ;;  %v958_v2 = vadd.f32 %v5966_v47, %v957_v27  ;;  %vm4008_vm13 = vcmp.eq.f32.partialorder %v1203_v7, 8.507059e+37  ;;  %v1205_v6 = vand.u32 2147483648, %v5972_v38 }
 0x111   :  { %v2596_v8 = vpop.eup %2595  ;;  %v4013_v44 = vadd.f32 1.0, %v2594_v19  ;;  %v1891_v40 = vmul.f32 %v1672_v0, %v5980_v61  ;;  %v1197_v62 = vmul.f32 %v5973_v10, %v1196_v28  ;;  %v502_v14 = vmul.f32 %v3698_v12, %v328_v29  ;;  %v469_v28 = vpop.f32.mrf.mxu3 }
 0x112   :  { %v2598_v34 = vpop.eup %2597  ;;  %v4018_v26 = vadd.f32 1.0, %v2596_v8  ;;  %v962_v56 = vsel %vm3997_vm11, %v5966_v47, %v958_v2  ;;  %v1206_v61 = vor.u32 1.1754944e-38, %v1205_v6  ;;  %v518_v0 = vmul.f32 %v3698_v12, %v376_v35  ;;  %v5983_v35 = vld [vmem:[#allocation5_spill] sm:$0xff] }
 0x113   :  { %2599 = vrcp.f32 %v4013_v44  ;;  %v4033_v27 = vadd.f32 1.0, %v2598_v34  ;;  %1956 = vst.msk [vmem:[%s5816_s4 + $0x1a0] sm:$0xff] %vm1903_vm4, %v1891_v40  ;;  %2136 = vrot.lane.b32.xlu1 %v1891_v40, %s2693_s0  ;;  %v967_v47 = vsel %vm4001_vm12, %v966_v43, %v962_v56  ;;  %v1198_v38 = vadd.f32 %v5973_v10, %v1197_v62 }
 0x114   :  { %2601 = vrcp.f32 %v4018_v26  ;;  %v1844_v7 = vmul.f32 %v967_v47, %v5983_v35  ;;  %v4046_v29 = vadd.f32 %v3683_v42, %v502_v14  ;;  %v4049_v34 = vadd.f32 %v3683_v42, %v518_v0  ;;  %v424_v47 = vpop.f32.mrf.mxu2 }
 0x115   :  { %2603 = vrcp.f32 %v4033_v27  ;;  %v1202_v40 = vsel %vm4027_vm14, %v5973_v10, %v1198_v38  ;;  %v549_v25 = vmul.f32 %v3698_v12, %v469_v28  ;;  %v1435_v33 = vmul.f32 %v3455_v17, %v3383_v20  ;;  %v5986_v10 = vld [vmem:[#allocation6_spill] sm:$0xff] }
 0x116   :  { %5984 = vst [vmem:[#allocation3_spill] sm:$0xff] %v4046_v29  ;;  %2042 = vrot.lane.b32.xlu2 %v1844_v7, %s2693_s0  ;;  %v1207_v46 = vsel %vm4008_vm13, %v1206_v61, %v1202_v40  ;;  %v2371_v43 = vmul.f32 -1.442695, %v4046_v29  ;;  %v2387_v2 = vmul.f32 -1.442695, %v4049_v34  ;;  %vm1439_vm15 = vweird.f32 %v3383_v20 }
 0x117   :  { %5985 = vst [vmem:[#allocation11_spill] sm:$0xff] %v4049_v34  ;;  %v1860_v6 = vmul.f32 %v1207_v46, %v5986_v10  ;;  %v4070_v8 = vadd.f32 %v3683_v42, %v549_v25  ;;  %v1436_v62 = vsub.f32 1.0, %v1435_v33  ;;  %vm1440_vm0 = vweird.f32 %v3455_v17 }
 0x118   :  { %1909 = vst.msk [vmem:[%s5816_s4 + $0x28] sm:$0xff] %vm1903_vm4, %v1844_v7  ;;  %2605 = vpow2.f32 %v2371_v43  ;;  %v1443_v14 = vand.u32 2147483647, %v3383_v20  ;;  %v1445_v63 = vand.u32 2147483648, %v3383_v20  ;;  %v1675_v56 = vmul.f32 %v3480_v55, %v3410_v4  ;;  %vm4091_vm2 = vmor %vm1439_vm15, %vm1440_vm0 }
 0x119   :  { %5987 = vst [vmem:[#allocation15_spill] sm:$0xff] %v4070_v8  ;;  %v4077_v19 = vpop.eup %2599  ;;  %2074 = vrot.lane.b32.xlu0 %v1860_v6, %s2693_s0  ;;  %2607 = vpow2.f32 %v2387_v2  ;;  %v2418_v61 = vmul.f32 -1.442695, %v4070_v8  ;;  %v1437_v0 = vmul.f32 %v3455_v17, %v1436_v62  ;;  %vm1679_vm1 = vweird.f32 %v3410_v4  ;;  %v331_v2 = vpop.f32.mrf.mxu0 }
 0x11a   :  { %1925 = vst.msk [vmem:[%s5816_s4 + $0xa8] sm:$0xff] %vm1903_vm4, %v1860_v6  ;;  %v4087_v28 = vpop.eup %2601  ;;  %vm4095_vm3 = vcmp.eq.f32.partialorder %v1443_v14, 8.507059e+37  ;;  %v1446_v35 = vor.u32 1.1754944e-38, %v1445_v63  ;;  %v1676_v7 = vsub.f32 1.0, %v1675_v56  ;;  %vm1680_vm5 = vweird.f32 %v3480_v55 }
 0x11b   :  { %v4100_v40 = vpop.eup %2603  ;;  %2609 = vpow2.f32 %v2418_v61  ;;  %v1438_v25 = vadd.f32 %v3455_v17, %v1437_v0  ;;  %v1683_v33 = vand.u32 2147483647, %v3410_v4  ;;  %v1685_v20 = vand.u32 2147483648, %v3410_v4  ;;  %vm4115_vm8 = vmor %vm1679_vm1, %vm1680_vm5 }
 0x11c   :  { %v1677_v46 = vmul.f32 %v3480_v55, %v1676_v7  ;;  %v970_v43 = vmul.f32 %v3486_v57, %v3420_v53  ;;  %vm974_vm6 = vweird.f32 %v3420_v53  ;;  %vm975_vm7 = vweird.f32 %v3486_v57 }
 0x11d   :  { %v1442_v10 = vsel %vm4091_vm2, %v3455_v17, %v1438_v25  ;;  %vm4119_vm9 = vcmp.eq.f32.partialorder %v1683_v33, 8.507059e+37  ;;  %v1686_v14 = vor.u32 1.1754944e-38, %v1685_v20  ;;  %v978_v63 = vand.u32 2147483647, %v3420_v53  ;;  %v5996_v33 = vld [vmem:[#allocation7_spill] sm:$0xff]  ;;  %vm4154_vm11 = vmor %vm974_vm6, %vm975_vm7 }
 0x11e   :  { %v2606_v56 = vpop.eup %2605  ;;  %v1447_v61 = vsel %vm4095_vm3, %v1446_v35, %v1442_v10  ;;  %v1678_v0 = vadd.f32 %v3480_v55, %v1677_v46  ;;  %v971_v17 = vsub.f32 1.0, %v970_v43  ;;  %v980_v4 = vand.u32 2147483648, %v3420_v53  ;;  %v472_v43 = vpop.f32.mrf.mxu3 }
 0x11f   :  { %v2608_v7 = vpop.eup %2607  ;;  %v4128_v25 = vadd.f32 1.0, %v2606_v56  ;;  %v1876_v34 = vmul.f32 %v1447_v61, %v5996_v33  ;;  %vm4131_vm10 = vcmp.eq.f32.partialorder %v978_v63, 8.507059e+37  ;;  %v503_v20 = vmul.f32 %v3698_v12, %v331_v2 }
 0x120   :  { %v4136_v8 = vadd.f32 1.0, %v2608_v7  ;;  %v1682_v38 = vsel %vm4115_vm8, %v3480_v55, %v1678_v0  ;;  %v972_v35 = vmul.f32 %v3486_v57, %v971_v17  ;;  %v981_v46 = vor.u32 1.1754944e-38, %v980_v4 }
 0x121   :  { %v2610_v10 = vpop.eup %2609  ;;  %2611 = vrcp.f32 %v4128_v25  ;;  %1941 = vst.msk [vmem:[%s5816_s4 + $0x128] sm:$0xff] %vm1903_vm4, %v1876_v34  ;;  %2106 = vrot.lane.b32.xlu1 %v1876_v34, %s2693_s0  ;;  %v1687_v2 = vsel %vm4119_vm9, %v1686_v14, %v1682_v38  ;;  %v4159_v6 = vadd.f32 %v3683_v42, %v503_v20  ;;  %v534_v63 = vmul.f32 %v3698_v12, %v424_v47  ;;  %v6002_v34 = vld [vmem:[#allocation8_spill] sm:$0xff]  ;;  %v6005_v20 = vld [vmem:[#allocation10_spill] sm:$0xff] }
 0x122   :  { %2613 = vrcp.f32 %v4136_v8  ;;  %v4163_v56 = vadd.f32 1.0, %v2610_v10  ;;  %v1892_v62 = vmul.f32 %v1687_v2, %v6002_v34  ;;  %v973_v14 = vadd.f32 %v3486_v57, %v972_v35 }
 0x123   :  { %6001 = vst [vmem:[#allocation13_spill] sm:$0xff] %v4159_v6  ;;  %v2372_v61 = vmul.f32 -1.442695, %v4159_v6  ;;  %v4169_v53 = vadd.f32 %v3683_v42, %v534_v63  ;;  %v550_v0 = vmul.f32 %v3698_v12, %v472_v43  ;;  %v1210_v17 = vmul.f32 %v3490_v24, %v3426_v45 }
 0x124   :  { %2615 = vrcp.f32 %v4163_v56  ;;  %1957 = vst.msk [vmem:[%s5816_s4 + $0x1a8] sm:$0xff] %vm1903_vm4, %v1892_v62  ;;  %2138 = vrot.lane.b32.xlu2 %v1892_v62, %s2693_s0  ;;  %v977_v4 = vsel %vm4154_vm11, %v3486_v57, %v973_v14  ;;  %vm1214_vm12 = vweird.f32 %v3426_v45  ;;  %vm1215_vm13 = vweird.f32 %v3490_v24 }
 0x125   :  { %6003 = vst [vmem:[#allocation16_spill] sm:$0xff] %v4169_v53  ;;  %v982_v47 = vsel %vm4131_vm10, %v981_v46, %v977_v4  ;;  %2617 = vpow2.f32 %v2372_v61  ;;  %v2403_v7 = vmul.f32 -1.442695, %v4169_v53  ;;  %v4189_v33 = vadd.f32 %v3683_v42, %v550_v0  ;;  %vm4217_vm1 = vmor %vm1214_vm12, %vm1215_vm13 }
 0x126   :  { %v1845_v38 = vmul.f32 %v982_v47, %v6005_v20  ;;  %v1211_v35 = vsub.f32 1.0, %v1210_v17  ;;  %v1218_v43 = vand.u32 2147483647, %v3426_v45  ;;  %v1220_v57 = vand.u32 2147483648, %v3426_v45  ;;  %v379_v45 = vpop.f32.mrf.mxu1  ;;  %v475_v53 = vpop.f32.mrf.mxu3 }
 0x127   :  { %6004 = vst [vmem:[#allocation4_spill] sm:$0xff] %v4189_v33  ;;  %v4194_v10 = vpop.eup %2611  ;;  %2619 = vpow2.f32 %v2403_v7  ;;  %v2419_v2 = vmul.f32 -1.442695, %v4189_v33  ;;  %v1450_v29 = vmul.f32 %v3573_v32, %v3512_v48  ;;  %vm1454_vm14 = vweird.f32 %v3512_v48 }
 0x128   :  { %v4200_v46 = vpop.eup %2613  ;;  %2044 = vrot.lane.b32.xlu0 %v1845_v38, %s2693_s0  ;;  %1910 = vst.msk [vmem:[%s5816_s4 + $0x30] sm:$0xff] %vm1903_vm4, %v1845_v38  ;;  %v1212_v55 = vmul.f32 %v3490_v24, %v1211_v35  ;;  %vm4208_vm15 = vcmp.eq.f32.partialorder %v1218_v43, 8.507059e+37  ;;  %v1221_v34 = vor.u32 1.1754944e-38, %v1220_v57  ;;  %vm1455_vm0 = vweird.f32 %v3573_v32 }
 0x129   :  { %6006 = vst [vmem:[#allocation5_spill] sm:$0xff] %v4200_v46  ;;  %2621 = vpow2.f32 %v2419_v2  ;;  %v1451_v14 = vsub.f32 1.0, %v1450_v29  ;;  %v1458_v61 = vand.u32 2147483647, %v3512_v48  ;;  %v1460_v0 = vand.u32 2147483648, %v3512_v48  ;;  %vm4245_vm6 = vmor %vm1454_vm14, %vm1455_vm0 }
 0x12a   :  { %v4223_v17 = vpop.eup %2615  ;;  %v1213_v4 = vadd.f32 %v3490_v24, %v1212_v55  ;;  %v1690_v47 = vmul.f32 %v3590_v13, %v3528_v11  ;;  %vm1694_vm2 = vweird.f32 %v3528_v11  ;;  %vm1695_vm3 = vweird.f32 %v3590_v13 }
 0x12b   :  { %v2618_v7 = vpop.eup %2617  ;;  %v1452_v20 = vmul.f32 %v3573_v32, %v1451_v14  ;;  %vm4231_vm5 = vcmp.eq.f32.partialorder %v1458_v61, 8.507059e+37  ;;  %v1461_v35 = vor.u32 1.1754944e-38, %v1460_v0  ;;  %v1698_v43 = vand.u32 2147483647, %v3528_v11  ;;  %v427_v61 = vpop.f32.mrf.mxu2  ;;  %vm4270_vm8 = vmor %vm1694_vm2, %vm1695_vm3 }
 0x12c   :  { %v4236_v57 = vadd.f32 1.0, %v2618_v7  ;;  %v1217_v2 = vsel %vm4217_vm1, %v3490_v24, %v1213_v4  ;;  %v1691_v55 = vsub.f32 1.0, %v1690_v47  ;;  %v1700_v14 = vand.u32 2147483648, %v3528_v11  ;;  %v6017_v4 = vld [vmem:[#allocation12_spill] sm:$0xff] }
 0x12d   :  { %v2620_v0 = vpop.eup %2619  ;;  %v1222_v7 = vsel %vm4208_vm15, %v1221_v34, %v1217_v2  ;;  %v1453_v6 = vadd.f32 %v3573_v32, %v1452_v20  ;;  %vm4253_vm7 = vcmp.eq.f32.partialorder %v1698_v43, 8.507059e+37  ;;  %v519_v48 = vmul.f32 %v3698_v12, %v379_v45 }
 0x12e   :  { %2623 = vrcp.f32 %v4236_v57  ;;  %v4259_v62 = vadd.f32 1.0, %v2620_v0  ;;  %v1861_v47 = vmul.f32 %v1222_v7, %v6017_v4  ;;  %v1692_v33 = vmul.f32 %v3590_v13, %v1691_v55 }
 0x12f   :  { %v2622_v46 = vpop.eup %2621  ;;  %v1457_v63 = vsel %vm4245_vm6, %v3573_v32, %v1453_v6  ;;  %v1701_v45 = vor.u32 1.1754944e-38, %v1700_v14  ;;  %v4275_v20 = vadd.f32 %v3683_v42, %v519_v48  ;;  %v535_v43 = vmul.f32 %v3698_v12, %v427_v61 }
 0x130   :  { %2625 = vrcp.f32 %v4259_v62  ;;  %v4279_v2 = vadd.f32 1.0, %v2622_v46  ;;  %1926 = vst.msk [vmem:[%s5816_s4 + $0xb0] sm:$0xff] %vm1903_vm4, %v1861_v47  ;;  %2076 = vrot.lane.b32.xlu1 %v1861_v47, %s2693_s0  ;;  %v1462_v11 = vsel %vm4231_vm5, %v1461_v35, %v1457_v63  ;;  %v1693_v32 = vadd.f32 %v3590_v13, %v1692_v33 }
 0x131   :  { %v1877_v6 = vmul.f32 %v1462_v11, %v3439_v16  ;;  %v2388_v29 = vmul.f32 -1.442695, %v4275_v20  ;;  %v4292_v55 = vadd.f32 %v3683_v42, %v535_v43  ;;  %v551_v46 = vmul.f32 %v3698_v12, %v475_v53 }
 0x132   :  { %2627 = vrcp.f32 %v4279_v2  ;;  %v1697_v14 = vsel %vm4270_vm8, %v3590_v13, %v1693_v32  ;;  %v1225_v38 = vmul.f32 %v3609_v41, %v3549_v51  ;;  %vm1229_vm9 = vweird.f32 %v3549_v51 }
 0x133   :  { %1942 = vst.msk [vmem:[%s5816_s4 + $0x130] sm:$0xff] %vm1903_vm4, %v1877_v6  ;;  %2108 = vrot.lane.b32.xlu2 %v1877_v6, %s2693_s0  ;;  %v1702_v16 = vsel %vm4253_vm7, %v1701_v45, %v1697_v14  ;;  %2629 = vpow2.f32 %v2388_v29  ;;  %v2404_v53 = vmul.f32 -1.442695, %v4292_v55  ;;  %v4311_v13 = vadd.f32 %v3683_v42, %v551_v46 }
 0x134   :  { %v4313_v33 = vpop.eup %2623  ;;  %v1893_v35 = vmul.f32 %v1702_v16, %v3459_v37  ;;  %v1226_v61 = vsub.f32 1.0, %v1225_v38  ;;  %vm1230_vm10 = vweird.f32 %v3609_v41  ;;  %v1233_v0 = vand.u32 2147483647, %v3549_v51 }
 0x135   :  { %6020 = vst [vmem:[#allocation6_spill] sm:$0xff] %v4311_v13  ;;  %2631 = vpow2.f32 %v2404_v53  ;;  %v2420_v7 = vmul.f32 -1.442695, %v4311_v13  ;;  %v1235_v24 = vand.u32 2147483648, %v3549_v51  ;;  %v985_v48 = vmul.f32 %v3601_v22, %v3537_v52  ;;  %vm4338_vm14 = vmor %vm1229_vm9, %vm1230_vm10 }
 0x136   :  { %v4322_v4 = vpop.eup %2625  ;;  %1958 = vst.msk [vmem:[%s5816_s4 + $0x1b0] sm:$0xff] %vm1903_vm4, %v1893_v35  ;;  %2140 = vrot.lane.b32.xlu0 %v1893_v35, %s2693_s0  ;;  %v1227_v37 = vmul.f32 %v3609_v41, %v1226_v61  ;;  %vm4330_vm11 = vcmp.eq.f32.partialorder %v1233_v0, 8.507059e+37  ;;  %vm989_vm12 = vweird.f32 %v3537_v52  ;;  %vm990_vm13 = vweird.f32 %v3601_v22  ;;  %v6034_v35 = vld [vmem:[#allocation17_spill] sm:$0xff] }
 0x137   :  { %2633 = vpow2.f32 %v2420_v7  ;;  %v1236_v34 = vor.u32 1.1754944e-38, %v1235_v24  ;;  %v986_v45 = vsub.f32 1.0, %v985_v48  ;;  %v993_v43 = vand.u32 2147483647, %v3537_v52  ;;  %vm4366_vm2 = vmor %vm989_vm12, %vm990_vm13  ;;  %v334_v7 = vpop.f32.mrf.mxu0  ;;  %v382_v24 = vpop.f32.mrf.mxu1 }
 0x138   :  { %v4343_v11 = vpop.eup %2627  ;;  %v1228_v32 = vadd.f32 %v3609_v41, %v1227_v37  ;;  %v995_v6 = vand.u32 2147483648, %v3537_v52  ;;  %v1465_v29 = vmul.f32 %v3701_v23, %v3621_v21  ;;  %vm1469_vm15 = vweird.f32 %v3621_v21 }
 0x139   :  { %v2630_v51 = vpop.eup %2629  ;;  %v987_v46 = vmul.f32 %v3601_v22, %v986_v45  ;;  %vm4351_vm0 = vcmp.eq.f32.partialorder %v993_v43, 8.507059e+37  ;;  %vm1470_vm1 = vweird.f32 %v3701_v23  ;;  %v1473_v38 = vand.u32 2147483647, %v3621_v21  ;;  %v6031_v43 = vld [vmem:[#allocation18_spill] sm:$0xff] }
 0x13a   :  { %v4357_v16 = vadd.f32 1.0, %v2630_v51  ;;  %v1232_v53 = vsel %vm4338_vm14, %v3609_v41, %v1228_v32  ;;  %v996_v61 = vor.u32 1.1754944e-38, %v995_v6  ;;  %v1466_v0 = vsub.f32 1.0, %v1465_v29  ;;  %v430_v29 = vpop.f32.mrf.mxu2  ;;  %vm4390_vm5 = vmor %vm1469_vm15, %vm1470_vm1 }
 0x13b   :  { %v2632_v48 = vpop.eup %2631  ;;  %v1237_v37 = vsel %vm4330_vm11, %v1236_v34, %v1232_v53  ;;  %v988_v45 = vadd.f32 %v3601_v22, %v987_v46  ;;  %vm4373_vm3 = vcmp.eq.f32.partialorder %v1473_v38, 8.507059e+37  ;;  %v1475_v52 = vand.u32 2147483648, %v3621_v21 }
 0x13c   :  { %2635 = vrcp.f32 %v4357_v16  ;;  %v4379_v63 = vadd.f32 1.0, %v2632_v48  ;;  %v1862_v32 = vmul.f32 %v1237_v37, %v6031_v43  ;;  %v1467_v6 = vmul.f32 %v3701_v23, %v1466_v0 }
 0x13d   :  { %v2634_v51 = vpop.eup %2633  ;;  %v992_v47 = vsel %vm4366_vm2, %v3601_v22, %v988_v45  ;;  %v1476_v46 = vor.u32 1.1754944e-38, %v1475_v52  ;;  %v504_v38 = vmul.f32 %v3698_v12, %v334_v7  ;;  %v520_v53 = vmul.f32 %v3698_v12, %v382_v24  ;;  %v2097_v45 = vpop.permute.xlu2 %2096 }
 0x13e   :  { %2637 = vrcp.f32 %v4379_v63  ;;  %v4397_v0 = vadd.f32 1.0, %v2634_v51  ;;  %1927 = vst.msk [vmem:[%s5816_s4 + $0xb8] sm:$0xff] %vm1903_vm4, %v1862_v32  ;;  %2078 = vrot.lane.b32.xlu2 %v1862_v32, %s2693_s0  ;;  %v997_v22 = vsel %vm4351_vm0, %v996_v61, %v992_v47  ;;  %v1468_v21 = vadd.f32 %v3701_v23, %v1467_v6 }
 0x13f   :  { %v1846_v7 = vmul.f32 %v997_v22, %v6034_v35  ;;  %v4409_v24 = vadd.f32 %v3683_v42, %v504_v38  ;;  %v4412_v48 = vadd.f32 %v3683_v42, %v520_v53  ;;  %v536_v37 = vmul.f32 %v3698_v12, %v430_v29  ;;  %2256 = vst.msk [vmem:[%s5817_s5 + $0x100] sm:$0xff] %vm1903_vm4, %v2097_v45 }
 0x140   :  { %2639 = vrcp.f32 %v4397_v0  ;;  %v1472_v14 = vsel %vm4390_vm5, %v3701_v23, %v1468_v21  ;;  %v1705_v61 = vmul.f32 %v3722_v54, %v3636_v31  ;;  %vm1709_vm6 = vweird.f32 %v3636_v31 }
 0x141   :  { %6035 = vst [vmem:[#allocation7_spill] sm:$0xff] %v4409_v24  ;;  %2046 = vrot.lane.b32.xlu1 %v1846_v7, %s2693_s0  ;;  %v1477_v23 = vsel %vm4373_vm3, %v1476_v46, %v1472_v14  ;;  %v2373_v52 = vmul.f32 -1.442695, %v4409_v24  ;;  %v2389_v43 = vmul.f32 -1.442695, %v4412_v48  ;;  %v4436_v32 = vadd.f32 %v3683_v42, %v536_v37  ;;  %v6042_v14 = vld [vmem:[#allocation22_spill] sm:$0xff] }
 0x142   :  { %6036 = vst [vmem:[#allocation8_spill] sm:$0xff] %v4412_v48  ;;  %v4438_v6 = vpop.eup %2635  ;;  %v1878_v29 = vmul.f32 %v1477_v23, %v3546_v9  ;;  %v1706_v51 = vsub.f32 1.0, %v1705_v61  ;;  %vm1710_vm7 = vweird.f32 %v3722_v54  ;;  %v1713_v47 = vand.u32 2147483647, %v3636_v31  ;;  %v6043_v61 = vld [vmem:[#allocation26_spill] sm:$0xff] }
 0x143   :  { %1911 = vst.msk [vmem:[%s5816_s4 + $0x38] sm:$0xff] %vm1903_vm4, %v1846_v7  ;;  %2641 = vpow2.f32 %v2373_v52  ;;  %v2405_v41 = vmul.f32 -1.442695, %v4436_v32  ;;  %v1715_v34 = vand.u32 2147483648, %v3636_v31  ;;  %v1000_v46 = vmul.f32 %v3733_v5, %v3649_v18  ;;  %vm4462_vm10 = vmor %vm1709_vm6, %vm1710_vm7 }
 0x144   :  { %6037 = vst [vmem:[#allocation10_spill] sm:$0xff] %v4436_v32  ;;  %v4447_v38 = vpop.eup %2637  ;;  %2110 = vrot.lane.b32.xlu0 %v1878_v29, %s2693_s0  ;;  %2643 = vpow2.f32 %v2389_v43  ;;  %v1707_v9 = vmul.f32 %v3722_v54, %v1706_v51  ;;  %vm4455_vm8 = vcmp.eq.f32.partialorder %v1713_v47, 8.507059e+37  ;;  %vm1004_vm9 = vweird.f32 %v3649_v18  ;;  %v337_v43 = vpop.f32.mrf.mxu0  ;;  %v6050_v32 = vld [vmem:[#allocation19_spill] sm:$0xff] }
 0x145   :  { %1943 = vst.msk [vmem:[%s5816_s4 + $0x138] sm:$0xff] %vm1903_vm4, %v1878_v29  ;;  %2645 = vpow2.f32 %v2405_v41  ;;  %v1716_v22 = vor.u32 1.1754944e-38, %v1715_v34  ;;  %v1001_v21 = vsub.f32 1.0, %v1000_v46  ;;  %vm1005_vm11 = vweird.f32 %v3733_v5  ;;  %v385_v46 = vpop.f32.mrf.mxu1 }
 0x146   :  { %v4467_v35 = vpop.eup %2639  ;;  %v1708_v7 = vadd.f32 %v3722_v54, %v1707_v9  ;;  %v1008_v37 = vand.u32 2147483647, %v3649_v18  ;;  %v1010_v45 = vand.u32 2147483648, %v3649_v18  ;;  %v1240_v23 = vmul.f32 %v6043_v61, %v6042_v14  ;;  %vm4483_vm14 = vmor %vm1004_vm9, %vm1005_vm11 }
 0x147   :  { %v1002_v31 = vmul.f32 %v3733_v5, %v1001_v21  ;;  %vm1244_vm12 = vweird.f32 %v6042_v14  ;;  %vm1245_vm13 = vweird.f32 %v6043_v61  ;;  %v1248_v52 = vand.u32 2147483647, %v6042_v14 }
 0x148   :  { %v1712_v29 = vsel %vm4462_vm10, %v3722_v54, %v1708_v7  ;;  %vm4487_vm15 = vcmp.eq.f32.partialorder %v1008_v37, 8.507059e+37  ;;  %v1011_v41 = vor.u32 1.1754944e-38, %v1010_v45  ;;  %v1241_v34 = vsub.f32 1.0, %v1240_v23  ;;  %vm4513_vm1 = vmor %vm1244_vm12, %vm1245_vm13 }
 0x149   :  { %v2642_v9 = vpop.eup %2641  ;;  %v1717_v21 = vsel %vm4455_vm8, %v1716_v22, %v1712_v29  ;;  %v1003_v53 = vadd.f32 %v3733_v5, %v1002_v31  ;;  %vm4494_vm0 = vcmp.eq.f32.partialorder %v1248_v52, 8.507059e+37  ;;  %v1250_v18 = vand.u32 2147483648, %v6042_v14  ;;  %v478_v29 = vpop.f32.mrf.mxu3 }
 0x14a   :  { %v2644_v7 = vpop.eup %2643  ;;  %v4499_v37 = vadd.f32 1.0, %v2642_v9  ;;  %v1894_v24 = vmul.f32 %v1717_v21, %v6050_v32  ;;  %v1242_v45 = vmul.f32 %v6043_v61, %v1241_v34  ;;  %v505_v23 = vmul.f32 %v3698_v12, %v337_v43  ;;  %v4520_v12 = vld [vmem:[%s5814_s2] ss:$0 sm:$0xff]  ;;  %v433_v43 = vpop.f32.mrf.mxu2  ;;  %v6053_v34 = vld [vmem:[#allocation20_spill] sm:$0xff] }
 0x14b   :  { %v2646_v48 = vpop.eup %2645  ;;  %v4504_v42 = vadd.f32 1.0, %v2644_v7  ;;  %v1007_v22 = vsel %vm4483_vm14, %v3733_v5, %v1003_v53  ;;  %v1251_v32 = vor.u32 1.1754944e-38, %v1250_v18  ;;  %v521_v52 = vmul.f32 %v4520_v12, %v385_v46  ;;  %v2067_v53 = vpop.permute.xlu2 %2066 }
 0x14c   :  { %2647 = vrcp.f32 %v4499_v37  ;;  %v4524_v5 = vadd.f32 1.0, %v2646_v48  ;;  %1959 = vst.msk [vmem:[%s5816_s4 + $0x1b8] sm:$0xff] %vm1903_vm4, %v1894_v24  ;;  %2142 = vrot.lane.b32.xlu1 %v1894_v24, %s2693_s0  ;;  %v1012_v14 = vsel %vm4487_vm15, %v1011_v41, %v1007_v22  ;;  %v1243_v51 = vadd.f32 %v6043_v61, %v1242_v45  ;;  %v4539_v48 = vld [vmem:[%s5815_s3] ss:$0 sm:$0xff] }
 0x14d   :  { %2649 = vrcp.f32 %v4504_v42  ;;  %v1847_v46 = vmul.f32 %v1012_v14, %v6053_v34  ;;  %v4542_v9 = vadd.f32 %v4539_v48, %v505_v23  ;;  %v4545_v21 = vadd.f32 %v4539_v48, %v521_v52  ;;  %v6056_v23 = vld [vmem:[#allocation21_spill] sm:$0xff]  ;;  %2241 = vst.msk [vmem:[%s5817_s5 + $0x88] sm:$0xff] %vm1903_vm4, %v2067_v53 }
 0x14e   :  { %2651 = vrcp.f32 %v4524_v5  ;;  %v1247_v24 = vsel %vm4513_vm1, %v6043_v61, %v1243_v51  ;;  %v537_v47 = vmul.f32 %v4520_v12, %v433_v43  ;;  %v552_v41 = vmul.f32 %v4520_v12, %v478_v29 }
 0x14f   :  { %6054 = vst [vmem:[#allocation12_spill] sm:$0xff] %v4542_v9  ;;  %2048 = vrot.lane.b32.xlu2 %v1847_v46, %s2693_s0  ;;  %v1252_v18 = vsel %vm4494_vm0, %v1251_v32, %v1247_v24  ;;  %v2374_v7 = vmul.f32 -1.442695, %v4542_v9  ;;  %v2390_v45 = vmul.f32 -1.442695, %v4545_v21  ;;  %v1480_v61 = vmul.f32 %v3838_v36, %v3777_v1 }
 0x150   :  { %6055 = vst [vmem:[#allocation18_spill] sm:$0xff] %v4545_v21  ;;  %v1863_v22 = vmul.f32 %v1252_v18, %v6056_v23  ;;  %v4566_v31 = vadd.f32 %v4539_v48, %v537_v47  ;;  %v4569_v52 = vadd.f32 %v4539_v48, %v552_v41  ;;  %vm1484_vm2 = vweird.f32 %v3777_v1 }
 0x151   :  { %1912 = vst.msk [vmem:[%s5816_s4 + $0x40] sm:$0xff] %vm1903_vm4, %v1847_v46  ;;  %2653 = vpow2.f32 %v2374_v7  ;;  %v1481_v54 = vsub.f32 1.0, %v1480_v61  ;;  %vm1485_vm3 = vweird.f32 %v3838_v36  ;;  %v1488_v32 = vand.u32 2147483647, %v3777_v1 }
 0x152   :  { %6057 = vst [vmem:[#allocation17_spill] sm:$0xff] %v4566_v31  ;;  %v4578_v43 = vpop.eup %2647  ;;  %2080 = vrot.lane.b32.xlu0 %v1863_v22, %s2693_s0  ;;  %2655 = vpow2.f32 %v2390_v45  ;;  %v2406_v29 = vmul.f32 -1.442695, %v4566_v31  ;;  %v2421_v14 = vmul.f32 -1.442695, %v4569_v52  ;;  %v1490_v51 = vand.u32 2147483648, %v3777_v1  ;;  %vm4604_vm7 = vmor %vm1484_vm2, %vm1485_vm3  ;;  %v481_v31 = vpop.f32.mrf.mxu3 }
 0x153   :  { %6058 = vst [vmem:[#allocation22_spill] sm:$0xff] %v4569_v52  ;;  %v4588_v34 = vpop.eup %2649  ;;  %v1482_v46 = vmul.f32 %v3838_v36, %v1481_v54  ;;  %vm4591_vm5 = vcmp.eq.f32.partialorder %v1488_v32, 8.507059e+37  ;;  %v1720_v47 = vmul.f32 %v3844_v30, %v3786_v60  ;;  %vm1724_vm6 = vweird.f32 %v3786_v60  ;;  %v2133_v13 = vpop.permute.xlu2 %2132 }
 0x154   :  { %1928 = vst.msk [vmem:[%s5816_s4 + $0xc0] sm:$0xff] %vm1903_vm4, %v1863_v22  ;;  %v4598_v41 = vpop.eup %2651  ;;  %2657 = vpow2.f32 %v2406_v29  ;;  %v1491_v18 = vor.u32 1.1754944e-38, %v1490_v51  ;;  %vm1725_vm8 = vweird.f32 %v3844_v30  ;;  %v1728_v7 = vand.u32 2147483647, %v3786_v60 }
 0x155   :  { %2659 = vpow2.f32 %v2421_v14  ;;  %v1483_v45 = vadd.f32 %v3838_v36, %v1482_v46  ;;  %v1721_v61 = vsub.f32 1.0, %v1720_v47  ;;  %v1730_v23 = vand.u32 2147483648, %v3786_v60  ;;  %v340_v46 = vpop.f32.mrf.mxu0  ;;  %vm4633_vm12 = vmor %vm1724_vm6, %vm1725_vm8  ;;  %2274 = vst.msk [vmem:[%s5817_s5 + $0x190] sm:$0xff] %vm1903_vm4, %v2133_v13 }
 0x156   :  { %vm4612_vm9 = vcmp.eq.f32.partialorder %v1728_v7, 8.507059e+37  ;;  %v1015_v1 = vmul.f32 %v3867_v49, %v3799_v3  ;;  %vm1019_vm10 = vweird.f32 %v3799_v3  ;;  %vm1020_vm11 = vweird.f32 %v3867_v49 }
 0x157   :  { %v2654_v54 = vpop.eup %2653  ;;  %v1487_v32 = vsel %vm4604_vm7, %v3838_v36, %v1483_v45  ;;  %v1722_v29 = vmul.f32 %v3844_v30, %v1721_v61  ;;  %v1731_v14 = vor.u32 1.1754944e-38, %v1730_v23  ;;  %v1023_v51 = vand.u32 2147483647, %v3799_v3  ;;  %v388_v45 = vpop.f32.mrf.mxu1  ;;  %v6067_v23 = vld [vmem:[#allocation23_spill] sm:$0xff]  ;;  %vm4664_vm14 = vmor %vm1019_vm10, %vm1020_vm11 }
 0x158   :  { %v2656_v47 = vpop.eup %2655  ;;  %v4625_v7 = vadd.f32 1.0, %v2654_v54  ;;  %v1492_v52 = vsel %vm4591_vm5, %v1491_v18, %v1487_v32  ;;  %v1016_v36 = vsub.f32 1.0, %v1015_v1  ;;  %v1025_v53 = vand.u32 2147483648, %v3799_v3  ;;  %v6074_v3 = vld [vmem:[#allocation24_spill] sm:$0xff] }
 0x159   :  { %v4638_v61 = vadd.f32 1.0, %v2656_v47  ;;  %v1879_v54 = vmul.f32 %v1492_v52, %v6067_v23  ;;  %v1723_v9 = vadd.f32 %v3844_v30, %v1722_v29  ;;  %vm4642_vm13 = vcmp.eq.f32.partialorder %v1023_v51, 8.507059e+37 }
 0x15a   :  { %v2658_v18 = vpop.eup %2657  ;;  %2661 = vrcp.f32 %v4625_v7  ;;  %v1017_v60 = vmul.f32 %v3867_v49, %v1016_v36  ;;  %v1026_v32 = vor.u32 1.1754944e-38, %v1025_v53  ;;  %v506_v1 = vmul.f32 %v4520_v12, %v340_v46 }
 0x15b   :  { %v2660_v47 = vpop.eup %2659  ;;  %2663 = vrcp.f32 %v4638_v61  ;;  %v4650_v52 = vadd.f32 1.0, %v2658_v18  ;;  %1944 = vst.msk [vmem:[%s5816_s4 + $0x140] sm:$0xff] %vm1903_vm4, %v1879_v54  ;;  %2112 = vrot.lane.b32.xlu1 %v1879_v54, %s2693_s0  ;;  %v1727_v29 = vsel %vm4633_vm12, %v3844_v30, %v1723_v9  ;;  %v522_v46 = vmul.f32 %v4520_v12, %v388_v45  ;;  %v2033_v45 = vpop.permute.xlu0 %2032 }
 0x15c   :  { %v4669_v36 = vadd.f32 1.0, %v2660_v47  ;;  %v1732_v53 = vsel %vm4612_vm9, %v1731_v14, %v1727_v29  ;;  %v1018_v23 = vadd.f32 %v3867_v49, %v1017_v60  ;;  %v4675_v21 = vadd.f32 %v4539_v48, %v506_v1  ;;  %v2065_v14 = vpop.permute.xlu1 %2064  ;;  %v6076_v47 = vld [vmem:[#allocation25_spill] sm:$0xff]  ;;  %2224 = vst.msk [vmem:[%s5817_s5] sm:$0xff] %vm1903_vm4, %v2033_v45 }
 0x15d   :  { %2665 = vrcp.f32 %v4650_v52  ;;  %v1895_v30 = vmul.f32 %v1732_v53, %v6074_v3  ;;  %v4684_v9 = vadd.f32 %v4539_v48, %v522_v46  ;;  %v553_v22 = vmul.f32 %v4520_v12, %v481_v31  ;;  %2240 = vst.msk [vmem:[%s5817_s5 + $0x80] sm:$0xff] %vm1903_vm4, %v2065_v14 }
 0x15e   :  { %6072 = vst [vmem:[#allocation26_spill] sm:$0xff] %v4669_v36  ;;  %2667 = vrcp.f32 %v4669_v36  ;;  %v1022_v54 = vsel %vm4664_vm14, %v3867_v49, %v1018_v23  ;;  %v2375_v18 = vmul.f32 -1.442695, %v4675_v21  ;;  %v1255_v13 = vmul.f32 %v3952_v39, %v3881_v59 }
 0x15f   :  { %6073 = vst [vmem:[#allocation19_spill] sm:$0xff] %v4675_v21  ;;  %2144 = vrot.lane.b32.xlu2 %v1895_v30, %s2693_s0  ;;  %v1027_v49 = vsel %vm4642_vm13, %v1026_v32, %v1022_v54  ;;  %v2391_v31 = vmul.f32 -1.442695, %v4684_v9  ;;  %v4707_v60 = vadd.f32 %v4539_v48, %v553_v22  ;;  %vm1259_vm15 = vweird.f32 %v3881_v59 }
 0x160   :  { %1960 = vst.msk [vmem:[%s5816_s4 + $0x1c0] sm:$0xff] %vm1903_vm4, %v1895_v30  ;;  %v4710_v1 = vpop.eup %2661  ;;  %v1848_v29 = vmul.f32 %v1027_v49, %v6076_v47  ;;  %2669 = vpow2.f32 %v2375_v18  ;;  %v1256_v51 = vsub.f32 1.0, %v1255_v13  ;;  %vm1260_vm0 = vweird.f32 %v3952_v39  ;;  %v2103_v18 = vpop.permute.xlu2 %2102 }
 0x161   :  { %6075 = vst [vmem:[#allocation20_spill] sm:$0xff] %v4707_v60  ;;  %v4718_v24 = vpop.eup %2663  ;;  %2671 = vpow2.f32 %v2391_v31  ;;  %v2422_v32 = vmul.f32 -1.442695, %v4707_v60  ;;  %v1263_v46 = vand.u32 2147483647, %v3881_v59  ;;  %v1265_v53 = vand.u32 2147483648, %v3881_v59  ;;  %vm4739_vm3 = vmor %vm1259_vm15, %vm1260_vm0 }
 0x162   :  { %2050 = vrot.lane.b32.xlu0 %v1848_v29, %s2693_s0  ;;  %1913 = vst.msk [vmem:[%s5816_s4 + $0x48] sm:$0xff] %vm1903_vm4, %v1848_v29  ;;  %v1257_v23 = vmul.f32 %v3952_v39, %v1256_v51  ;;  %v1495_v3 = vmul.f32 %v3961_v15, %v3903_v58  ;;  %vm1499_vm1 = vweird.f32 %v3903_v58  ;;  %vm1500_vm2 = vweird.f32 %v3961_v15  ;;  %v6082_v59 = vld [vmem:[#allocation14_spill] sm:$0xff] }
 0x163   :  { %v4733_v30 = vpop.eup %2665  ;;  %2673 = vpow2.f32 %v2422_v32  ;;  %vm4743_vm5 = vcmp.eq.f32.partialorder %v1263_v46, 8.507059e+37  ;;  %v1266_v45 = vor.u32 1.1754944e-38, %v1265_v53  ;;  %v1503_v54 = vand.u32 2147483647, %v3903_v58  ;;  %2259 = vst.msk [vmem:[%s5817_s5 + $0x118] sm:$0xff] %vm1903_vm4, %v2103_v18  ;;  %v484_v18 = vpop.f32.mrf.mxu3  ;;  %vm4777_vm9 = vmor %vm1499_vm1, %vm1500_vm2 }
 0x164   :  { %v4748_v13 = vpop.eup %2667  ;;  %v1258_v49 = vadd.f32 %v3952_v39, %v1257_v23  ;;  %v1496_v31 = vsub.f32 1.0, %v1495_v3  ;;  %v1505_v47 = vand.u32 2147483648, %v3903_v58  ;;  %v1735_v29 = vmul.f32 %v6082_v59, %v3913_v50 }
 0x165   :  { %6081 = vst [vmem:[#allocation21_spill] sm:$0xff] %v4748_v13  ;;  %vm4758_vm6 = vcmp.eq.f32.partialorder %v1503_v54, 8.507059e+37  ;;  %vm1739_vm7 = vweird.f32 %v3913_v50  ;;  %vm1740_vm8 = vweird.f32 %v6082_v59  ;;  %v1743_v32 = vand.u32 2147483647, %v3913_v50 }
 0x166   :  { %v2670_v46 = vpop.eup %2669  ;;  %v1262_v53 = vsel %vm4739_vm3, %v3952_v39, %v1258_v49  ;;  %v1497_v23 = vmul.f32 %v3961_v15, %v1496_v31  ;;  %v1506_v3 = vor.u32 1.1754944e-38, %v1505_v47  ;;  %v1736_v60 = vsub.f32 1.0, %v1735_v29  ;;  %v6089_v31 = vld [vmem:[#allocation27_spill] sm:$0xff]  ;;  %vm4796_vm11 = vmor %vm1739_vm7, %vm1740_vm8 }
 0x167   :  { %v2672_v54 = vpop.eup %2671  ;;  %v4769_v21 = vadd.f32 1.0, %v2670_v46  ;;  %v1267_v13 = vsel %vm4743_vm5, %v1266_v45, %v1262_v53  ;;  %vm4781_vm10 = vcmp.eq.f32.partialorder %v1743_v32, 8.507059e+37  ;;  %v1745_v22 = vand.u32 2147483648, %v3913_v50 }
 0x168   :  { %v4786_v49 = vadd.f32 1.0, %v2672_v54  ;;  %v1864_v47 = vmul.f32 %v1267_v13, %v6089_v31  ;;  %v1498_v14 = vadd.f32 %v3961_v15, %v1497_v23  ;;  %v1737_v45 = vmul.f32 %v6082_v59, %v1736_v60 }
 0x169   :  { %v2674_v29 = vpop.eup %2673  ;;  %2675 = vrcp.f32 %v4769_v21  ;;  %v1746_v32 = vor.u32 1.1754944e-38, %v1745_v22  ;;  %v554_v46 = vmul.f32 %v4520_v12, %v484_v18  ;;  %v1270_v13 = vmul.f32 %v4087_v28, %v4018_v26  ;;  %v6092_v22 = vld [vmem:[#allocation28_spill] sm:$0xff] }
 0x16a   :  { %2677 = vrcp.f32 %v4786_v49  ;;  %v4804_v60 = vadd.f32 1.0, %v2674_v29  ;;  %1929 = vst.msk [vmem:[%s5816_s4 + $0xc8] sm:$0xff] %vm1903_vm4, %v1864_v47  ;;  %2082 = vrot.lane.b32.xlu1 %v1864_v47, %s2693_s0  ;;  %v1502_v50 = vsel %vm4777_vm9, %v3961_v15, %v1498_v14  ;;  %v1738_v53 = vadd.f32 %v6082_v59, %v1737_v45  ;;  %v2129_v14 = vpop.permute.xlu0 %2128 }
 0x16b   :  { %v1507_v23 = vsel %vm4758_vm6, %v1506_v3, %v1502_v50  ;;  %v4818_v18 = vadd.f32 %v4539_v48, %v554_v46  ;;  %v1271_v54 = vsub.f32 1.0, %v1270_v13  ;;  %vm1274_vm12 = vweird.f32 %v4018_v26  ;;  %2272 = vst.msk [vmem:[%s5817_s5 + $0x180] sm:$0xff] %vm1903_vm4, %v2129_v14  ;;  %v2041_v50 = vpop.permute.xlu2 %2040 }
 0x16c   :  { %2679 = vrcp.f32 %v4804_v60  ;;  %v1880_v31 = vmul.f32 %v1507_v23, %v6092_v22  ;;  %v1742_v36 = vsel %vm4796_vm11, %v6082_v59, %v1738_v53  ;;  %vm1275_vm13 = vweird.f32 %v4087_v28  ;;  %v6093_v59 = vld [vmem:[#allocation29_spill] sm:$0xff]  ;;  %2228 = vst.msk [vmem:[%s5817_s5 + $0x20] sm:$0xff] %vm1903_vm4, %v2041_v50 }
 0x16d   :  { %v1747_v15 = vsel %vm4781_vm10, %v1746_v32, %v1742_v36  ;;  %v2423_v51 = vmul.f32 -1.442695, %v4818_v18  ;;  %v1272_v3 = vmul.f32 %v4087_v28, %v1271_v54  ;;  %v1278_v47 = vand.u32 2147483647, %v4018_v26  ;;  %vm4838_vm14 = vmor %vm1274_vm12, %vm1275_vm13 }
 0x16e   :  { %1945 = vst.msk [vmem:[%s5816_s4 + $0x148] sm:$0xff] %vm1903_vm4, %v1880_v31  ;;  %2114 = vrot.lane.b32.xlu2 %v1880_v31, %s2693_s0  ;;  %v1896_v45 = vmul.f32 %v1747_v15, %v6093_v59  ;;  %v1280_v39 = vand.u32 2147483648, %v4018_v26  ;;  %v1030_v58 = vmul.f32 %v4077_v19, %v4013_v44  ;;  %vm1034_vm15 = vweird.f32 %v4013_v44  ;;  %v2131_v26 = vpop.permute.xlu1 %2130  ;;  %v6100_v59 = vld [vmem:[#allocation30_spill] sm:$0xff] }
 0x16f   :  { %v4846_v32 = vpop.eup %2675  ;;  %2681 = vpow2.f32 %v2423_v51  ;;  %v1273_v46 = vadd.f32 %v4087_v28, %v1272_v3  ;;  %vm4849_vm0 = vcmp.eq.f32.partialorder %v1278_v47, 8.507059e+37  ;;  %vm1035_vm1 = vweird.f32 %v4077_v19  ;;  %2273 = vst.msk [vmem:[%s5817_s5 + $0x188] sm:$0xff] %vm1903_vm4, %v2131_v26 }
 0x170   :  { %v4858_v53 = vpop.eup %2677  ;;  %1961 = vst.msk [vmem:[%s5816_s4 + $0x1c8] sm:$0xff] %vm1903_vm4, %v1896_v45  ;;  %2146 = vrot.lane.b32.xlu0 %v1896_v45, %s2693_s0  ;;  %v1281_v23 = vor.u32 1.1754944e-38, %v1280_v39  ;;  %v1031_v54 = vsub.f32 1.0, %v1030_v58  ;;  %v1038_v22 = vand.u32 2147483647, %v4013_v44  ;;  %v1040_v31 = vand.u32 2147483648, %v4013_v44  ;;  %vm4896_vm6 = vmor %vm1034_vm15, %vm1035_vm1 }
 0x171   :  { %v1277_v36 = vsel %vm4838_vm14, %v4087_v28, %v1273_v46  ;;  %v1510_v15 = vmul.f32 %v4100_v40, %v4033_v27  ;;  %vm1514_vm2 = vweird.f32 %v4033_v27  ;;  %vm1515_vm3 = vweird.f32 %v4100_v40 }
 0x172   :  { %v4878_v51 = vpop.eup %2679  ;;  %v1282_v3 = vsel %vm4849_vm0, %v1281_v23, %v1277_v36  ;;  %v1032_v47 = vmul.f32 %v4077_v19, %v1031_v54  ;;  %vm4883_vm5 = vcmp.eq.f32.partialorder %v1038_v22, 8.507059e+37  ;;  %v1041_v14 = vor.u32 1.1754944e-38, %v1040_v31  ;;  %v2035_v31 = vpop.permute.xlu0 %2034  ;;  %vm4927_vm10 = vmor %vm1514_vm2, %vm1515_vm3 }
 0x173   :  { %v1865_v45 = vmul.f32 %v1282_v3, %v6100_v59  ;;  %v1511_v39 = vsub.f32 1.0, %v1510_v15  ;;  %v1518_v58 = vand.u32 2147483647, %v4033_v27  ;;  %v1520_v46 = vand.u32 2147483648, %v4033_v27  ;;  %2225 = vst.msk [vmem:[%s5817_s5 + $0x8] sm:$0xff] %vm1903_vm4, %v2035_v31 }
 0x174   :  { %v1033_v13 = vadd.f32 %v4077_v19, %v1032_v47  ;;  %v1750_v26 = vmul.f32 %v4223_v17, %v4163_v56  ;;  %vm1754_vm7 = vweird.f32 %v4163_v56  ;;  %vm1755_vm8 = vweird.f32 %v4223_v17 }
 0x175   :  { %v2682_v50 = vpop.eup %2681  ;;  %1930 = vst.msk [vmem:[%s5816_s4 + $0xd0] sm:$0xff] %vm1903_vm4, %v1865_v45  ;;  %v1512_v44 = vmul.f32 %v4100_v40, %v1511_v39  ;;  %vm4912_vm9 = vcmp.eq.f32.partialorder %v1518_v58, 8.507059e+37  ;;  %v1521_v54 = vor.u32 1.1754944e-38, %v1520_v46  ;;  %v1758_v22 = vand.u32 2147483647, %v4163_v56  ;;  %v6109_v39 = vld [vmem:[#allocation2_spill] sm:$0xff]  ;;  %vm4955_vm12 = vmor %vm1754_vm7, %vm1755_vm8 }
 0x176   :  { %v4917_v36 = vadd.f32 1.0, %v2682_v50  ;;  %2084 = vrot.lane.b32.xlu2 %v1865_v45, %s2693_s0  ;;  %v1037_v15 = vsel %vm4896_vm6, %v4077_v19, %v1033_v13  ;;  %v1751_v47 = vsub.f32 1.0, %v1750_v26  ;;  %v1760_v59 = vand.u32 2147483648, %v4163_v56  ;;  %v2037_v26 = vpop.permute.xlu1 %2036  ;;  %v2073_v50 = vpop.permute.xlu2 %2072 }
 0x177   :  { %v1042_v45 = vsel %vm4883_vm5, %v1041_v14, %v1037_v15  ;;  %v1513_v19 = vadd.f32 %v4100_v40, %v1512_v44  ;;  %vm4939_vm11 = vcmp.eq.f32.partialorder %v1758_v22, 8.507059e+37  ;;  %v1045_v27 = vmul.f32 %v4194_v10, %v4128_v25  ;;  %2226 = vst.msk [vmem:[%s5817_s5 + $0x10] sm:$0xff] %vm1903_vm4, %v2037_v26  ;;  %v6112_v15 = vld [vmem:[#allocation9_spill] sm:$0xff] }
 0x178   :  { %2683 = vrcp.f32 %v4917_v36  ;;  %v1849_v58 = vmul.f32 %v1042_v45, %v6109_v39  ;;  %v1752_v46 = vmul.f32 %v4223_v17, %v1751_v47  ;;  %v1761_v13 = vor.u32 1.1754944e-38, %v1760_v59  ;;  %v6113_v59 = vld [vmem:[#allocation5_spill] sm:$0xff]  ;;  %2244 = vst.msk [vmem:[%s5817_s5 + $0xa0] sm:$0xff] %vm1903_vm4, %v2073_v50 }
 0x179   :  { %v1517_v28 = vsel %vm4927_vm10, %v4100_v40, %v1513_v19  ;;  %v1046_v44 = vsub.f32 1.0, %v1045_v27  ;;  %vm1049_vm13 = vweird.f32 %v4128_v25  ;;  %vm1050_vm14 = vweird.f32 %v4194_v10  ;;  %v436_v19 = vpop.f32.mrf.mxu2 }
 0x17a   :  { %2052 = vrot.lane.b32.xlu1 %v1849_v58, %s2693_s0  ;;  %1914 = vst.msk [vmem:[%s5816_s4 + $0x50] sm:$0xff] %vm1903_vm4, %v1849_v58  ;;  %v1522_v40 = vsel %vm4912_vm9, %v1521_v54, %v1517_v28  ;;  %v1753_v56 = vadd.f32 %v4223_v17, %v1752_v46  ;;  %v1053_v22 = vand.u32 2147483647, %v4128_v25  ;;  %v1055_v31 = vand.u32 2147483648, %v4128_v25  ;;  %vm4991_vm0 = vmor %vm1049_vm13, %vm1050_vm14  ;;  %v2099_v26 = vpop.permute.xlu0 %2098  ;;  %v6118_v28 = vld [vmem:[#allocation15_spill] sm:$0xff] }
 0x17b   :  { %v1881_v3 = vmul.f32 %v1522_v40, %v6112_v15  ;;  %v1047_v47 = vmul.f32 %v4194_v10, %v1046_v44  ;;  %v1285_v45 = vmul.f32 %v6113_v59, %v4136_v8  ;;  %vm1289_vm15 = vweird.f32 %v4136_v8  ;;  %2257 = vst.msk [vmem:[%s5817_s5 + $0x108] sm:$0xff] %vm1903_vm4, %v2099_v26 }
 0x17c   :  { %v1757_v23 = vsel %vm4955_vm12, %v4223_v17, %v1753_v56  ;;  %vm4995_vm1 = vcmp.eq.f32.partialorder %v1053_v22, 8.507059e+37  ;;  %v1056_v39 = vor.u32 1.1754944e-38, %v1055_v31  ;;  %vm1290_vm2 = vweird.f32 %v6113_v59 }
 0x17d   :  { %1946 = vst.msk [vmem:[%s5816_s4 + $0x150] sm:$0xff] %vm1903_vm4, %v1881_v3  ;;  %2116 = vrot.lane.b32.xlu0 %v1881_v3, %s2693_s0  ;;  %v1762_v25 = vsel %vm4939_vm11, %v1761_v13, %v1757_v23  ;;  %v1048_v17 = vadd.f32 %v4194_v10, %v1047_v47  ;;  %v1286_v58 = vsub.f32 1.0, %v1285_v45  ;;  %v1293_v46 = vand.u32 2147483647, %v4136_v8  ;;  %vm5039_vm6 = vmor %vm1289_vm15, %vm1290_vm2  ;;  %v6123_v47 = vld [vmem:[#allocation3_spill] sm:$0xff] }
 0x17e   :  { %v5009_v50 = vpop.eup %2683  ;;  %v1897_v14 = vmul.f32 %v1762_v25, %v6118_v28  ;;  %v1295_v44 = vand.u32 2147483648, %v4136_v8  ;;  %v538_v40 = vmul.f32 %v4520_v12, %v436_v19  ;;  %v1525_v56 = vmul.f32 %v4322_v4, %v4259_v62  ;;  %v2043_v25 = vpop.permute.xlu2 %2042 }
 0x17f   :  { %v1052_v29 = vsel %vm4991_vm0, %v4194_v10, %v1048_v17  ;;  %v1287_v13 = vmul.f32 %v6113_v59, %v1286_v58  ;;  %vm5024_vm3 = vcmp.eq.f32.partialorder %v1293_v46, 8.507059e+37  ;;  %vm1529_vm5 = vweird.f32 %v4259_v62  ;;  %2229 = vst.msk [vmem:[%s5817_s5 + $0x28] sm:$0xff] %vm1903_vm4, %v2043_v25 }
 0x180   :  { %1962 = vst.msk [vmem:[%s5816_s4 + $0x1d0] sm:$0xff] %vm1903_vm4, %v1897_v14  ;;  %v1057_v12 = vsel %vm4995_vm1, %v1056_v39, %v1052_v29  ;;  %v1296_v31 = vor.u32 1.1754944e-38, %v1295_v44  ;;  %v5044_v15 = vadd.f32 %v4539_v48, %v538_v40  ;;  %v1526_v3 = vsub.f32 1.0, %v1525_v56  ;;  %v2101_v39 = vpop.permute.xlu1 %2100 }
 0x181   :  { %v1850_v45 = vmul.f32 %v1057_v12, %v6123_v47  ;;  %v1288_v19 = vadd.f32 %v6113_v59, %v1287_v13  ;;  %vm1530_vm7 = vweird.f32 %v4322_v4  ;;  %v1533_v23 = vand.u32 2147483647, %v4259_v62  ;;  %2258 = vst.msk [vmem:[%s5817_s5 + $0x110] sm:$0xff] %vm1903_vm4, %v2101_v39 }
 0x182   :  { %2148 = vrot.lane.b32.xlu1 %v1897_v14, %s2693_s0  ;;  %v2407_v8 = vmul.f32 -1.442695, %v5044_v15  ;;  %v1527_v54 = vmul.f32 %v4322_v4, %v1526_v3  ;;  %v1535_v27 = vand.u32 2147483648, %v4259_v62  ;;  %v1765_v48 = vmul.f32 %v4343_v11, %v4279_v2  ;;  %vm5066_vm8 = vmor %vm1529_vm5, %vm1530_vm7  ;;  %v6128_v62 = vld [vmem:[#allocation11_spill] sm:$0xff]  ;;  %v2069_v29 = vpop.permute.xlu0 %2068  ;;  %v6131_v3 = vld [vmem:[#allocation16_spill] sm:$0xff] }
 0x183   :  { %2054 = vrot.lane.b32.xlu2 %v1850_v45, %s2693_s0  ;;  %1915 = vst.msk [vmem:[%s5816_s4 + $0x58] sm:$0xff] %vm1903_vm4, %v1850_v45  ;;  %v1292_v17 = vsel %vm5039_vm6, %v6113_v59, %v1288_v19  ;;  %vm5070_vm9 = vcmp.eq.f32.partialorder %v1533_v23, 8.507059e+37  ;;  %vm1769_vm10 = vweird.f32 %v4279_v2  ;;  %vm1770_vm11 = vweird.f32 %v4343_v11  ;;  %v6143_v45 = vld [vmem:[#allocation13_spill] sm:$0xff] }
 0x184   :  { %v1297_v26 = vsel %vm5024_vm3, %v1296_v31, %v1292_v17  ;;  %2685 = vpow2.f32 %v2407_v8  ;;  %v1528_v59 = vadd.f32 %v4322_v4, %v1527_v54  ;;  %v1536_v28 = vor.u32 1.1754944e-38, %v1535_v27  ;;  %2242 = vst.msk [vmem:[%s5817_s5 + $0x90] sm:$0xff] %vm1903_vm4, %v2069_v29  ;;  %vm5118_vm15 = vmor %vm1769_vm10, %vm1770_vm11 }
 0x185   :  { %v1866_v14 = vmul.f32 %v1297_v26, %v6128_v62  ;;  %v1766_v44 = vsub.f32 1.0, %v1765_v48  ;;  %v1773_v40 = vand.u32 2147483647, %v4279_v2  ;;  %v1775_v56 = vand.u32 2147483648, %v4279_v2 }
 0x186   :  { %v1532_v13 = vsel %vm5066_vm8, %v4322_v4, %v1528_v59  ;;  %v1060_v22 = vmul.f32 %v4313_v33, %v4236_v57  ;;  %vm1064_vm12 = vweird.f32 %v4236_v57  ;;  %vm1065_vm13 = vweird.f32 %v4313_v33 }
 0x187   :  { %1931 = vst.msk [vmem:[%s5816_s4 + $0xd8] sm:$0xff] %vm1903_vm4, %v1866_v14  ;;  %2086 = vrot.lane.b32.xlu0 %v1866_v14, %s2693_s0  ;;  %v1537_v4 = vsel %vm5070_vm9, %v1536_v28, %v1532_v13  ;;  %v1767_v12 = vmul.f32 %v4343_v11, %v1766_v44  ;;  %vm5109_vm14 = vcmp.eq.f32.partialorder %v1773_v40, 8.507059e+37  ;;  %v1776_v31 = vor.u32 1.1754944e-38, %v1775_v56  ;;  %vm5149_vm3 = vmor %vm1064_vm12, %vm1065_vm13  ;;  %v2139_v40 = vpop.permute.xlu2 %2138  ;;  %v6140_v56 = vld [vmem:[#allocation4_spill] sm:$0xff] }
 0x188   :  { %v1882_v47 = vmul.f32 %v1537_v4, %v6131_v3  ;;  %v1061_v19 = vsub.f32 1.0, %v1060_v22  ;;  %v1068_v23 = vand.u32 2147483647, %v4236_v57  ;;  %v1070_v8 = vand.u32 2147483648, %v4236_v57  ;;  %v2039_v57 = vpop.permute.xlu1 %2038  ;;  %2277 = vst.msk [vmem:[%s5817_s5 + $0x1a8] sm:$0xff] %vm1903_vm4, %v2139_v40 }
 0x189   :  { %v1768_v54 = vadd.f32 %v4343_v11, %v1767_v12  ;;  %v1300_v27 = vmul.f32 %v4438_v6, %v4357_v16  ;;  %vm1304_vm0 = vweird.f32 %v4357_v16  ;;  %vm1305_vm1 = vweird.f32 %v4438_v6  ;;  %2227 = vst.msk [vmem:[%s5817_s5 + $0x18] sm:$0xff] %vm1903_vm4, %v2039_v57 }
 0x18a   :  { %v2686_v48 = vpop.eup %2685  ;;  %1947 = vst.msk [vmem:[%s5816_s4 + $0x158] sm:$0xff] %vm1903_vm4, %v1882_v47  ;;  %2118 = vrot.lane.b32.xlu1 %v1882_v47, %s2693_s0  ;;  %v1062_v2 = vmul.f32 %v4313_v33, %v1061_v19  ;;  %vm5135_vm2 = vcmp.eq.f32.partialorder %v1068_v23, 8.507059e+37  ;;  %v1071_v25 = vor.u32 1.1754944e-38, %v1070_v8  ;;  %v1308_v17 = vand.u32 2147483647, %v4357_v16  ;;  %vm5177_vm6 = vmor %vm1304_vm0, %vm1305_vm1  ;;  %v2135_v47 = vpop.permute.xlu0 %2134 }
 0x18b   :  { %v5140_v58 = vadd.f32 1.0, %v2686_v48  ;;  %v1772_v46 = vsel %vm5118_vm15, %v4343_v11, %v1768_v54  ;;  %v1301_v59 = vsub.f32 1.0, %v1300_v27  ;;  %v1310_v28 = vand.u32 2147483648, %v4357_v16  ;;  %2275 = vst.msk [vmem:[%s5817_s5 + $0x198] sm:$0xff] %vm1903_vm4, %v2135_v47 }
 0x18c   :  { %v1777_v62 = vsel %vm5109_vm14, %v1776_v31, %v1772_v46  ;;  %v1063_v14 = vadd.f32 %v4313_v33, %v1062_v2  ;;  %vm5157_vm5 = vcmp.eq.f32.partialorder %v1308_v17, 8.507059e+37  ;;  %v1540_v11 = vmul.f32 %v4447_v38, %v4379_v63 }
 0x18d   :  { %2687 = vrcp.f32 %v5140_v58  ;;  %v1898_v29 = vmul.f32 %v1777_v62, %v6140_v56  ;;  %v1302_v13 = vmul.f32 %v4438_v6, %v1301_v59  ;;  %v1311_v22 = vor.u32 1.1754944e-38, %v1310_v28 }
 0x18e   :  { %v1067_v4 = vsel %vm5149_vm3, %v4313_v33, %v1063_v14  ;;  %v1541_v10 = vsub.f32 1.0, %v1540_v11  ;;  %vm1544_vm7 = vweird.f32 %v4379_v63  ;;  %vm1545_vm8 = vweird.f32 %v4447_v38 }
 0x18f   :  { %1963 = vst.msk [vmem:[%s5816_s4 + $0x1d8] sm:$0xff] %vm1903_vm4, %v1898_v29  ;;  %2150 = vrot.lane.b32.xlu2 %v1898_v29, %s2693_s0  ;;  %v1072_v33 = vsel %vm5135_vm2, %v1071_v25, %v1067_v4  ;;  %v1303_v16 = vadd.f32 %v4438_v6, %v1302_v13  ;;  %v1548_v31 = vand.u32 2147483647, %v4379_v63  ;;  %v1550_v3 = vand.u32 2147483648, %v4379_v63  ;;  %vm5213_vm10 = vmor %vm1544_vm7, %vm1545_vm8  ;;  %v2109_v4 = vpop.permute.xlu2 %2108 }
 0x190   :  { %v1851_v19 = vmul.f32 %v1072_v33, %v6143_v45  ;;  %v1542_v23 = vmul.f32 %v4447_v38, %v1541_v10  ;;  %v1780_v8 = vmul.f32 %v4467_v35, %v4397_v0  ;;  %vm1784_vm9 = vweird.f32 %v4397_v0  ;;  %2262 = vst.msk [vmem:[%s5817_s5 + $0x130] sm:$0xff] %vm1903_vm4, %v2109_v4 }
 0x191   :  { %v1307_v54 = vsel %vm5177_vm6, %v4438_v6, %v1303_v16  ;;  %vm5217_vm11 = vcmp.eq.f32.partialorder %v1548_v31, 8.507059e+37  ;;  %v1551_v2 = vor.u32 1.1754944e-38, %v1550_v3  ;;  %vm1785_vm12 = vweird.f32 %v4467_v35 }
 0x192   :  { %2056 = vrot.lane.b32.xlu0 %v1851_v19, %s2693_s0  ;;  %1916 = vst.msk [vmem:[%s5816_s4 + $0x60] sm:$0xff] %vm1903_vm4, %v1851_v19  ;;  %v1312_v63 = vsel %vm5157_vm5, %v1311_v22, %v1307_v54  ;;  %v1543_v6 = vadd.f32 %v4447_v38, %v1542_v23  ;;  %v1781_v39 = vsub.f32 1.0, %v1780_v8  ;;  %v1788_v25 = vand.u32 2147483647, %v4397_v0  ;;  %vm5258_vm0 = vmor %vm1784_vm9, %vm1785_vm12  ;;  %v2071_v22 = vpop.permute.xlu1 %2070  ;;  %v6156_v19 = vld [vmem:[#allocation6_spill] sm:$0xff] }
 0x193   :  { %v5231_v17 = vpop.eup %2687  ;;  %v1867_v46 = vmul.f32 %v1312_v63, %v4275_v20  ;;  %v1790_v26 = vand.u32 2147483648, %v4397_v0  ;;  %v1315_v59 = vmul.f32 %v4588_v34, %v4504_v42  ;;  %vm1319_vm13 = vweird.f32 %v4504_v42  ;;  %2243 = vst.msk [vmem:[%s5817_s5 + $0x98] sm:$0xff] %vm1903_vm4, %v2071_v22 }
 0x194   :  { %v1547_v28 = vsel %vm5213_vm10, %v4447_v38, %v1543_v6  ;;  %v1782_v62 = vmul.f32 %v4467_v35, %v1781_v39  ;;  %vm5242_vm14 = vcmp.eq.f32.partialorder %v1788_v25, 8.507059e+37  ;;  %vm1320_vm15 = vweird.f32 %v4588_v34  ;;  %v6161_v25 = vld [vmem:[#allocation8_spill] sm:$0xff] }
 0x195   :  { %1932 = vst.msk [vmem:[%s5816_s4 + $0xe0] sm:$0xff] %vm1903_vm4, %v1867_v46  ;;  %2088 = vrot.lane.b32.xlu1 %v1867_v46, %s2693_s0  ;;  %v1552_v20 = vsel %vm5217_vm11, %v1551_v2, %v1547_v28  ;;  %v1791_v44 = vor.u32 1.1754944e-38, %v1790_v26  ;;  %v1316_v11 = vsub.f32 1.0, %v1315_v59  ;;  %v1323_v57 = vand.u32 2147483647, %v4504_v42  ;;  %vm5291_vm5 = vmor %vm1319_vm13, %vm1320_vm15 }
 0x196   :  { %v1883_v40 = vmul.f32 %v1552_v20, %v4292_v55  ;;  %v1783_v56 = vadd.f32 %v4467_v35, %v1782_v62  ;;  %v1325_v29 = vand.u32 2147483648, %v4504_v42  ;;  %v1075_v13 = vmul.f32 %v4578_v43, %v4499_v37  ;;  %v2105_v42 = vpop.permute.xlu0 %2104 }
 0x197   :  { %v1317_v0 = vmul.f32 %v4588_v34, %v1316_v11  ;;  %vm5269_vm1 = vcmp.eq.f32.partialorder %v1323_v57, 8.507059e+37  ;;  %vm1079_vm2 = vweird.f32 %v4499_v37  ;;  %vm1080_vm3 = vweird.f32 %v4578_v43  ;;  %2260 = vst.msk [vmem:[%s5817_s5 + $0x120] sm:$0xff] %vm1903_vm4, %v2105_v42  ;;  %v6191_v42 = vld [vmem:[#allocation26_spill] sm:$0xff] }
 0x198   :  { %1948 = vst.msk [vmem:[%s5816_s4 + $0x160] sm:$0xff] %vm1903_vm4, %v1883_v40  ;;  %2120 = vrot.lane.b32.xlu2 %v1883_v40, %s2693_s0  ;;  %v1787_v55 = vsel %vm5258_vm0, %v4467_v35, %v1783_v56  ;;  %v1326_v33 = vor.u32 1.1754944e-38, %v1325_v29  ;;  %v1076_v16 = vsub.f32 1.0, %v1075_v13  ;;  %v1083_v31 = vand.u32 2147483647, %v4499_v37  ;;  %vm5324_vm8 = vmor %vm1079_vm2, %vm1080_vm3  ;;  %v2079_v57 = vpop.permute.xlu2 %2078  ;;  %v6166_v40 = vld [vmem:[#allocation7_spill] sm:$0xff] }
 0x199   :  { %v1792_v3 = vsel %vm5242_vm14, %v1791_v44, %v1787_v55  ;;  %v1318_v47 = vadd.f32 %v4588_v34, %v1317_v0  ;;  %v1085_v45 = vand.u32 2147483648, %v4499_v37  ;;  %v1555_v35 = vmul.f32 %v4598_v41, %v4524_v5  ;;  %2247 = vst.msk [vmem:[%s5817_s5 + $0xb8] sm:$0xff] %vm1903_vm4, %v2079_v57 }
 0x19a   :  { %v1899_v23 = vmul.f32 %v1792_v3, %v6156_v19  ;;  %v1077_v8 = vmul.f32 %v4578_v43, %v1076_v16  ;;  %vm5308_vm6 = vcmp.eq.f32.partialorder %v1083_v31, 8.507059e+37  ;;  %vm1559_vm7 = vweird.f32 %v4524_v5  ;;  %v2137_v11 = vpop.permute.xlu1 %2136  ;;  %v6171_v16 = vld [vmem:[#allocation10_spill] sm:$0xff] }
 0x19b   :  { %v1322_v27 = vsel %vm5291_vm5, %v4588_v34, %v1318_v47  ;;  %v1086_v2 = vor.u32 1.1754944e-38, %v1085_v45  ;;  %v1556_v63 = vsub.f32 1.0, %v1555_v35  ;;  %vm1560_vm9 = vweird.f32 %v4598_v41  ;;  %2276 = vst.msk [vmem:[%s5817_s5 + $0x1a0] sm:$0xff] %vm1903_vm4, %v2137_v11 }
 0x19c   :  { %1964 = vst.msk [vmem:[%s5816_s4 + $0x1e0] sm:$0xff] %vm1903_vm4, %v1899_v23  ;;  %2152 = vrot.lane.b32.xlu0 %v1899_v23, %s2693_s0  ;;  %v1327_v34 = vsel %vm5269_vm1, %v1326_v33, %v1322_v27  ;;  %v1078_v37 = vadd.f32 %v4578_v43, %v1077_v8  ;;  %v1563_v6 = vand.u32 2147483647, %v4524_v5  ;;  %v1565_v39 = vand.u32 2147483648, %v4524_v5  ;;  %vm5349_vm11 = vmor %vm1559_vm7, %vm1560_vm9 }
 0x19d   :  { %v1868_v46 = vmul.f32 %v1327_v34, %v6161_v25  ;;  %v1557_v26 = vmul.f32 %v4598_v41, %v1556_v63  ;;  %v1570_v59 = vmul.f32 %v4733_v30, %v4650_v52  ;;  %vm1574_vm10 = vweird.f32 %v4650_v52  ;;  %v6176_v34 = vld [vmem:[#allocation17_spill] sm:$0xff] }
 0x19e   :  { %v1082_v28 = vsel %vm5324_vm8, %v4578_v43, %v1078_v37  ;;  %vm5353_vm12 = vcmp.eq.f32.partialorder %v1563_v6, 8.507059e+37  ;;  %v1566_v20 = vor.u32 1.1754944e-38, %v1565_v39  ;;  %vm1575_vm13 = vweird.f32 %v4733_v30  ;;  %v2075_v35 = vpop.permute.xlu0 %2074 }
 0x19f   :  { %1933 = vst.msk [vmem:[%s5816_s4 + $0xe8] sm:$0xff] %vm1903_vm4, %v1868_v46  ;;  %v1087_v43 = vsel %vm5308_vm6, %v1086_v2, %v1082_v28  ;;  %v1558_v5 = vadd.f32 %v4598_v41, %v1557_v26  ;;  %v1571_v38 = vsub.f32 1.0, %v1570_v59  ;;  %v1578_v44 = vand.u32 2147483647, %v4650_v52  ;;  %vm5400_vm1 = vmor %vm1574_vm10, %vm1575_vm13 }
 0x1a0   :  { %2090 = vrot.lane.b32.xlu2 %v1868_v46, %s2693_s0  ;;  %v1852_v56 = vmul.f32 %v1087_v43, %v6166_v40  ;;  %v1580_v29 = vand.u32 2147483648, %v4650_v52  ;;  %v1090_v13 = vmul.f32 %v4710_v1, %v4625_v7  ;;  %vm1094_vm14 = vweird.f32 %v4625_v7  ;;  %2245 = vst.msk [vmem:[%s5817_s5 + $0xa8] sm:$0xff] %vm1903_vm4, %v2075_v35 }
 0x1a1   :  { %v1562_v22 = vsel %vm5349_vm11, %v4598_v41, %v1558_v5  ;;  %v1572_v4 = vmul.f32 %v4733_v30, %v1571_v38  ;;  %vm5380_vm15 = vcmp.eq.f32.partialorder %v1578_v44, 8.507059e+37  ;;  %vm1095_vm0 = vweird.f32 %v4710_v1 }
 0x1a2   :  { %2058 = vrot.lane.b32.xlu1 %v1852_v56, %s2693_s0  ;;  %1917 = vst.msk [vmem:[%s5816_s4 + $0x68] sm:$0xff] %vm1903_vm4, %v1852_v56  ;;  %v1567_v41 = vsel %vm5353_vm12, %v1566_v20, %v1562_v22  ;;  %v1581_v55 = vor.u32 1.1754944e-38, %v1580_v29  ;;  %v1091_v10 = vsub.f32 1.0, %v1090_v13  ;;  %v1098_v33 = vand.u32 2147483647, %v4625_v7  ;;  %vm5433_vm6 = vmor %vm1094_vm14, %vm1095_vm0  ;;  %v2107_v39 = vpop.permute.xlu1 %2106  ;;  %v6181_v20 = vld [vmem:[#allocation12_spill] sm:$0xff] }
 0x1a3   :  { %v1884_v31 = vmul.f32 %v1567_v41, %v6171_v16  ;;  %v1573_v3 = vadd.f32 %v4733_v30, %v1572_v4  ;;  %v1100_v47 = vand.u32 2147483648, %v4625_v7  ;;  %v1330_v45 = vmul.f32 %v4718_v24, %v4638_v61  ;;  %2261 = vst.msk [vmem:[%s5817_s5 + $0x128] sm:$0xff] %vm1903_vm4, %v2107_v39  ;;  %v6186_v22 = vld [vmem:[#allocation18_spill] sm:$0xff] }
 0x1a4   :  { %v1092_v52 = vmul.f32 %v4710_v1, %v1091_v10  ;;  %vm5411_vm2 = vcmp.eq.f32.partialorder %v1098_v33, 8.507059e+37  ;;  %vm1334_vm3 = vweird.f32 %v4638_v61  ;;  %vm1335_vm5 = vweird.f32 %v4718_v24 }
 0x1a5   :  { %1949 = vst.msk [vmem:[%s5816_s4 + $0x168] sm:$0xff] %vm1903_vm4, %v1884_v31  ;;  %2122 = vrot.lane.b32.xlu0 %v1884_v31, %s2693_s0  ;;  %v1577_v19 = vsel %vm5400_vm1, %v4733_v30, %v1573_v3  ;;  %v1101_v8 = vor.u32 1.1754944e-38, %v1100_v47  ;;  %v1331_v54 = vsub.f32 1.0, %v1330_v45  ;;  %v1338_v27 = vand.u32 2147483647, %v4638_v61  ;;  %vm5458_vm9 = vmor %vm1334_vm3, %vm1335_vm5 }
 0x1a6   :  { %v1582_v48 = vsel %vm5380_vm15, %v1581_v55, %v1577_v19  ;;  %v1093_v2 = vadd.f32 %v4710_v1, %v1092_v52  ;;  %v1340_v63 = vand.u32 2147483648, %v4638_v61  ;;  %v1345_v30 = vmul.f32 %v4858_v53, %v4786_v49  ;;  %v2045_v56 = vpop.permute.xlu0 %2044  ;;  %v6192_v19 = vld [vmem:[#allocation21_spill] sm:$0xff] }
 0x1a7   :  { %v1885_v7 = vmul.f32 %v1582_v48, %v6176_v34  ;;  %v1332_v37 = vmul.f32 %v4718_v24, %v1331_v54  ;;  %vm5446_vm7 = vcmp.eq.f32.partialorder %v1338_v27, 8.507059e+37  ;;  %vm1349_vm8 = vweird.f32 %v4786_v49  ;;  %2230 = vst.msk [vmem:[%s5817_s5 + $0x30] sm:$0xff] %vm1903_vm4, %v2045_v56 }
 0x1a8   :  { %v1097_v25 = vsel %vm5433_vm6, %v4710_v1, %v1093_v2  ;;  %v1341_v26 = vor.u32 1.1754944e-38, %v1340_v63  ;;  %v1346_v59 = vsub.f32 1.0, %v1345_v30  ;;  %vm1350_vm10 = vweird.f32 %v4858_v53 }
 0x1a9   :  { %1950 = vst.msk [vmem:[%s5816_s4 + $0x170] sm:$0xff] %vm1903_vm4, %v1885_v7  ;;  %v1102_v61 = vsel %vm5411_vm2, %v1101_v8, %v1097_v25  ;;  %v1333_v1 = vadd.f32 %v4718_v24, %v1332_v37  ;;  %v1353_v28 = vand.u32 2147483647, %v4786_v49  ;;  %v1355_v62 = vand.u32 2147483648, %v4786_v49  ;;  %v2049_v14 = vpop.permute.xlu2 %2048  ;;  %vm5493_vm12 = vmor %vm1349_vm8, %vm1350_vm10 }
 0x1aa   :  { %2124 = vrot.lane.b32.xlu1 %v1885_v7, %s2693_s0  ;;  %v1853_v43 = vmul.f32 %v1102_v61, %v6181_v20  ;;  %v1347_v5 = vmul.f32 %v4858_v53, %v1346_v59  ;;  %v1585_v38 = vmul.f32 %v5231_v17, %v5140_v58  ;;  %vm1589_vm11 = vweird.f32 %v5140_v58  ;;  %2232 = vst.msk [vmem:[%s5817_s5 + $0x40] sm:$0xff] %vm1903_vm4, %v2049_v14  ;;  %v2077_v47 = vpop.permute.xlu1 %2076 }
 0x1ab   :  { %v1337_v44 = vsel %vm5458_vm9, %v4718_v24, %v1333_v1  ;;  %vm5497_vm13 = vcmp.eq.f32.partialorder %v1353_v28, 8.507059e+37  ;;  %v1356_v40 = vor.u32 1.1754944e-38, %v1355_v62  ;;  %vm1590_vm14 = vweird.f32 %v5231_v17  ;;  %2246 = vst.msk [vmem:[%s5817_s5 + $0xb0] sm:$0xff] %vm1903_vm4, %v2077_v47  ;;  %v6201_v1 = vld [vmem:[#allocation19_spill] sm:$0xff] }
 0x1ac   :  { %2060 = vrot.lane.b32.xlu2 %v1853_v43, %s2693_s0  ;;  %1918 = vst.msk [vmem:[%s5816_s4 + $0x70] sm:$0xff] %vm1903_vm4, %v1853_v43  ;;  %v1342_v24 = vsel %vm5446_vm7, %v1341_v26, %v1337_v44  ;;  %v1348_v49 = vadd.f32 %v4858_v53, %v1347_v5  ;;  %v1586_v29 = vsub.f32 1.0, %v1585_v38  ;;  %v1593_v13 = vand.u32 2147483647, %v5140_v58  ;;  %vm5540_vm2 = vmor %vm1589_vm11, %vm1590_vm14 }
 0x1ad   :  { %v1869_v4 = vmul.f32 %v1342_v24, %v6186_v22  ;;  %v1595_v0 = vand.u32 2147483648, %v5140_v58  ;;  %v1105_v41 = vmul.f32 %v4846_v32, %v4769_v21  ;;  %vm1109_vm15 = vweird.f32 %v4769_v21  ;;  %v6206_v24 = vld [vmem:[#allocation22_spill] sm:$0xff] }
 0x1ae   :  { %v1352_v12 = vsel %vm5493_vm12, %v4858_v53, %v1348_v49  ;;  %v1587_v55 = vmul.f32 %v5231_v17, %v1586_v29  ;;  %vm5524_vm0 = vcmp.eq.f32.partialorder %v1593_v13, 8.507059e+37  ;;  %vm1110_vm1 = vweird.f32 %v4846_v32  ;;  %v2141_v7 = vpop.permute.xlu0 %2140 }
 0x1af   :  { %1934 = vst.msk [vmem:[%s5816_s4 + $0xf0] sm:$0xff] %vm1903_vm4, %v1869_v4  ;;  %2092 = vrot.lane.b32.xlu0 %v1869_v4, %s2693_s0  ;;  %v1357_v33 = vsel %vm5497_vm13, %v1356_v40, %v1352_v12  ;;  %v1596_v16 = vor.u32 1.1754944e-38, %v1595_v0  ;;  %v1106_v31 = vsub.f32 1.0, %v1105_v41  ;;  %v1113_v3 = vand.u32 2147483647, %v4769_v21  ;;  %vm5573_vm7 = vmor %vm1109_vm15, %vm1110_vm1 }
 0x1b0   :  { %v1870_v45 = vmul.f32 %v1357_v33, %v4684_v9  ;;  %v1588_v35 = vadd.f32 %v5231_v17, %v1587_v55  ;;  %v1115_v52 = vand.u32 2147483648, %v4769_v21  ;;  %v1795_v23 = vmul.f32 %v6192_v19, %v6191_v42  ;;  %2278 = vst.msk [vmem:[%s5817_s5 + $0x1b0] sm:$0xff] %vm1903_vm4, %v2141_v7 }
 0x1b1   :  { %v1107_v58 = vmul.f32 %v4846_v32, %v1106_v31  ;;  %vm5555_vm3 = vcmp.eq.f32.partialorder %v1113_v3, 8.507059e+37  ;;  %vm1799_vm5 = vweird.f32 %v6191_v42  ;;  %vm1800_vm6 = vweird.f32 %v6192_v19 }
 0x1b2   :  { %1935 = vst.msk [vmem:[%s5816_s4 + $0xf8] sm:$0xff] %vm1903_vm4, %v1870_v45  ;;  %2094 = vrot.lane.b32.xlu1 %v1870_v45, %s2693_s0  ;;  %v1592_v9 = vsel %vm5540_vm2, %v5231_v17, %v1588_v35  ;;  %v1116_v27 = vor.u32 1.1754944e-38, %v1115_v52  ;;  %v1796_v48 = vsub.f32 1.0, %v1795_v23  ;;  %v1803_v2 = vand.u32 2147483647, %v6191_v42  ;;  %vm5602_vm10 = vmor %vm1799_vm5, %vm1800_vm6 }
 0x1b3   :  { %v1597_v63 = vsel %vm5524_vm0, %v1596_v16, %v1592_v9  ;;  %v1108_v30 = vadd.f32 %v4846_v32, %v1107_v58  ;;  %v1805_v34 = vand.u32 2147483648, %v6191_v42  ;;  %v1810_v17 = vmul.f32 %v4878_v51, %v4804_v60  ;;  %v2047_v20 = vpop.permute.xlu1 %2046 }
 0x1b4   :  { %v1886_v21 = vmul.f32 %v1597_v63, %v5044_v15  ;;  %v1797_v37 = vmul.f32 %v6192_v19, %v1796_v48  ;;  %vm5586_vm8 = vcmp.eq.f32.partialorder %v1803_v2, 8.507059e+37  ;;  %vm1814_vm9 = vweird.f32 %v4804_v60  ;;  %2231 = vst.msk [vmem:[%s5817_s5 + $0x38] sm:$0xff] %vm1903_vm4, %v2047_v20 }
 0x1b5   :  { %v1112_v39 = vsel %vm5573_vm7, %v4846_v32, %v1108_v30  ;;  %v1806_v25 = vor.u32 1.1754944e-38, %v1805_v34  ;;  %v1811_v46 = vsub.f32 1.0, %v1810_v17  ;;  %vm1815_vm11 = vweird.f32 %v4878_v51 }
 0x1b6   :  { %1951 = vst.msk [vmem:[%s5816_s4 + $0x178] sm:$0xff] %vm1903_vm4, %v1886_v21  ;;  %2126 = vrot.lane.b32.xlu2 %v1886_v21, %s2693_s0  ;;  %v1117_v32 = vsel %vm5555_vm3, %v1116_v27, %v1112_v39  ;;  %v1798_v26 = vadd.f32 %v6192_v19, %v1797_v37  ;;  %v1818_v59 = vand.u32 2147483647, %v4804_v60  ;;  %v1820_v61 = vand.u32 2147483648, %v4804_v60  ;;  %vm5627_vm13 = vmor %vm1814_vm9, %vm1815_vm11  ;;  %v2111_v4 = vpop.permute.xlu0 %2110 }
 0x1b7   :  { %v1854_v28 = vmul.f32 %v1117_v32, %v6201_v1  ;;  %v1812_v62 = vmul.f32 %v4878_v51, %v1811_v46  ;;  %v1825_v14 = vmul.f32 %v5009_v50, %v4917_v36  ;;  %vm1829_vm12 = vweird.f32 %v4917_v36  ;;  %2263 = vst.msk [vmem:[%s5817_s5 + $0x138] sm:$0xff] %vm1903_vm4, %v2111_v4 }
 0x1b8   :  { %v1802_v43 = vsel %vm5602_vm10, %v6192_v19, %v1798_v26  ;;  %vm5631_vm14 = vcmp.eq.f32.partialorder %v1818_v59, 8.507059e+37  ;;  %v1821_v44 = vor.u32 1.1754944e-38, %v1820_v61  ;;  %vm1830_vm15 = vweird.f32 %v5009_v50 }
 0x1b9   :  { %2062 = vrot.lane.b32.xlu0 %v1854_v28, %s2693_s0  ;;  %1919 = vst.msk [vmem:[%s5816_s4 + $0x78] sm:$0xff] %vm1903_vm4, %v1854_v28  ;;  %v1807_v60 = vsel %vm5586_vm8, %v1806_v25, %v1802_v43  ;;  %v1813_v11 = vadd.f32 %v4878_v51, %v1812_v62  ;;  %v1826_v57 = vsub.f32 1.0, %v1825_v14  ;;  %v1833_v40 = vand.u32 2147483647, %v4917_v36  ;;  %v2145_v56 = vpop.permute.xlu2 %2144  ;;  %vm1831_vm0 = vmor %vm1829_vm12, %vm1830_vm15 }
 0x1ba   :  { %v1900_v49 = vmul.f32 %v1807_v60, %v6206_v24  ;;  %v1835_v29 = vand.u32 2147483648, %v4917_v36  ;;  %2280 = vst.msk [vmem:[%s5817_s5 + $0x1c0] sm:$0xff] %vm1903_vm4, %v2145_v56 }
 0x1bb   :  { %v1817_v13 = vsel %vm5627_vm13, %v4878_v51, %v1813_v11  ;;  %v1827_v22 = vmul.f32 %v5009_v50, %v1826_v57  ;;  %v6207_v51 = vld [vmem:[#allocation20_spill] sm:$0xff]  ;;  %vm1834_vm1 = vcmp.eq.f32.partialorder %v1833_v40, 8.507059e+37 }
 0x1bc   :  { %1965 = vst.msk [vmem:[%s5816_s4 + $0x1e8] sm:$0xff] %vm1903_vm4, %v1900_v49  ;;  %2154 = vrot.lane.b32.xlu1 %v1900_v49, %s2693_s0  ;;  %v1822_v0 = vsel %vm5631_vm14, %v1821_v44, %v1817_v13  ;;  %v1836_v41 = vor.u32 1.1754944e-38, %v1835_v29 }
 0x1bd   :  { %v1901_v12 = vmul.f32 %v1822_v0, %v6207_v51  ;;  %v1828_v55 = vadd.f32 %v5009_v50, %v1827_v22 }
 0x1be   :  { %v2143_v10 = vpop.permute.xlu1 %2142 }
 0x1bf   :  { %1966 = vst.msk [vmem:[%s5816_s4 + $0x1f0] sm:$0xff] %vm1903_vm4, %v1901_v12  ;;  %2156 = vrot.lane.b32.xlu2 %v1901_v12, %s2693_s0  ;;  %v1832_v36 = vsel %vm1831_vm0, %v5009_v50, %v1828_v55 }
 0x1c0   :  { %v1837_v33 = vsel %vm1834_vm1, %v1836_v41, %v1832_v36  ;;  %2279 = vst.msk [vmem:[%s5817_s5 + $0x1b8] sm:$0xff] %vm1903_vm4, %v2143_v10 }
 0x1c1   :  { %v1902_v53 = vmul.f32 %v1837_v33, %v4818_v18 }
 0x1c3   :  { %1967 = vst.msk [vmem:[%s5816_s4 + $0x1f8] sm:$0xff] %vm1903_vm4, %v1902_v53  ;;  %2158 = vrot.lane.b32.xlu0 %v1902_v53, %s2693_s0 }
 0x1c4   :  { %v2081_v16 = vpop.permute.xlu0 %2080 }
 0x1c5   :  { %2248 = vst.msk [vmem:[%s5817_s5 + $0xc0] sm:$0xff] %vm1903_vm4, %v2081_v16 }
 0x1c8   :  { %v2115_v50 = vpop.permute.xlu2 %2114 }
 0x1c9   :  { %2265 = vst.msk [vmem:[%s5817_s5 + $0x148] sm:$0xff] %vm1903_vm4, %v2115_v50 }
 0x1cd   :  { %v2113_v18 = vpop.permute.xlu1 %2112 }
 0x1ce   :  { %2264 = vst.msk [vmem:[%s5817_s5 + $0x140] sm:$0xff] %vm1903_vm4, %v2113_v18 }
 0x1d0   :  { %v2085_v31 = vpop.permute.xlu2 %2084 }
 0x1d1   :  { %2250 = vst.msk [vmem:[%s5817_s5 + $0xd0] sm:$0xff] %vm1903_vm4, %v2085_v31 }
 0x1d4   :  { %v2051_v3 = vpop.permute.xlu0 %2050 }
 0x1d5   :  { %2233 = vst.msk [vmem:[%s5817_s5 + $0x48] sm:$0xff] %vm1903_vm4, %v2051_v3 }
 0x1dc   :  { %v2083_v47 = vpop.permute.xlu1 %2082 }
 0x1dd   :  { %v2055_v45 = vpop.permute.xlu2 %2054  ;;  %2249 = vst.msk [vmem:[%s5817_s5 + $0xc8] sm:$0xff] %vm1903_vm4, %v2083_v47 }
 0x1de   :  { %2235 = vst.msk [vmem:[%s5817_s5 + $0x58] sm:$0xff] %vm1903_vm4, %v2055_v45 }
 0x1e2   :  { %v2147_v35 = vpop.permute.xlu0 %2146 }
 0x1e3   :  { %2281 = vst.msk [vmem:[%s5817_s5 + $0x1c8] sm:$0xff] %vm1903_vm4, %v2147_v35 }
 0x1e9   :  { %v2151_v52 = vpop.permute.xlu2 %2150 }
 0x1ea   :  { %2283 = vst.msk [vmem:[%s5817_s5 + $0x1d8] sm:$0xff] %vm1903_vm4, %v2151_v52 }
 0x1ec   :  { %v2053_v42 = vpop.permute.xlu1 %2052 }
 0x1ed   :  { %2234 = vst.msk [vmem:[%s5817_s5 + $0x50] sm:$0xff] %vm1903_vm4, %v2053_v42 }
 0x1ef   :  { %v2117_v19 = vpop.permute.xlu0 %2116 }
 0x1f0   :  { %2266 = vst.msk [vmem:[%s5817_s5 + $0x150] sm:$0xff] %vm1903_vm4, %v2117_v19 }
 0x1f2   :  { %v2121_v23 = vpop.permute.xlu2 %2120 }
 0x1f3   :  { %2268 = vst.msk [vmem:[%s5817_s5 + $0x160] sm:$0xff] %vm1903_vm4, %v2121_v23 }
 0x1f4   :  { %v2149_v58 = vpop.permute.xlu1 %2148 }
 0x1f5   :  { %2282 = vst.msk [vmem:[%s5817_s5 + $0x1d0] sm:$0xff] %vm1903_vm4, %v2149_v58 }
 0x1f9   :  { %v2087_v8 = vpop.permute.xlu0 %2086 }
 0x1fa   :  { %v2091_v9 = vpop.permute.xlu2 %2090  ;;  %2251 = vst.msk [vmem:[%s5817_s5 + $0xd8] sm:$0xff] %vm1903_vm4, %v2087_v8 }
 0x1fb   :  { %2253 = vst.msk [vmem:[%s5817_s5 + $0xe8] sm:$0xff] %vm1903_vm4, %v2091_v9 }
 0x1fc   :  { %v2119_v54 = vpop.permute.xlu1 %2118 }
 0x1fd   :  { %2267 = vst.msk [vmem:[%s5817_s5 + $0x158] sm:$0xff] %vm1903_vm4, %v2119_v54 }
 0x204   :  { %v2057_v27 = vpop.permute.xlu0 %2056 }
 0x205   :  { %2236 = vst.msk [vmem:[%s5817_s5 + $0x60] sm:$0xff] %vm1903_vm4, %v2057_v27 }
 0x206   :  { %v2061_v48 = vpop.permute.xlu2 %2060 }
 0x207   :  { %2238 = vst.msk [vmem:[%s5817_s5 + $0x70] sm:$0xff] %vm1903_vm4, %v2061_v48  ;;  %v2089_v2 = vpop.permute.xlu1 %2088 }
 0x208   :  { %2252 = vst.msk [vmem:[%s5817_s5 + $0xe0] sm:$0xff] %vm1903_vm4, %v2089_v2 }
 0x20e   :  { %v2153_v63 = vpop.permute.xlu0 %2152 }
 0x20f   :  { %2284 = vst.msk [vmem:[%s5817_s5 + $0x1e0] sm:$0xff] %vm1903_vm4, %v2153_v63 }
 0x210   :  { %v2127_v30 = vpop.permute.xlu2 %2126 }
 0x211   :  { %2271 = vst.msk [vmem:[%s5817_s5 + $0x178] sm:$0xff] %vm1903_vm4, %v2127_v30 }
 0x214   :  { %v2059_v34 = vpop.permute.xlu1 %2058 }
 0x215   :  { %2237 = vst.msk [vmem:[%s5817_s5 + $0x68] sm:$0xff] %vm1903_vm4, %v2059_v34 }
 0x217   :  { %v2123_v17 = vpop.permute.xlu0 %2122 }
 0x218   :  { %2269 = vst.msk [vmem:[%s5817_s5 + $0x168] sm:$0xff] %vm1903_vm4, %v2123_v17 }
 0x219   :  { %v2157_v7 = vpop.permute.xlu2 %2156 }
 0x21a   :  { %2286 = vst.msk [vmem:[%s5817_s5 + $0x1f0] sm:$0xff] %vm1903_vm4, %v2157_v7 }
 0x21c   :  { %v2125_v21 = vpop.permute.xlu1 %2124 }
 0x21d   :  { %2270 = vst.msk [vmem:[%s5817_s5 + $0x170] sm:$0xff] %vm1903_vm4, %v2125_v21 }
 0x221   :  { %v2093_v37 = vpop.permute.xlu0 %2092 }
 0x222   :  { %2254 = vst.msk [vmem:[%s5817_s5 + $0xf0] sm:$0xff] %vm1903_vm4, %v2093_v37 }
 0x224   :  { %v2095_v6 = vpop.permute.xlu1 %2094 }
 0x225   :  { %2255 = vst.msk [vmem:[%s5817_s5 + $0xf8] sm:$0xff] %vm1903_vm4, %v2095_v6 }
 0x22b   :  { %v2063_v39 = vpop.permute.xlu0 %2062 }
 0x22c   :  { %2239 = vst.msk [vmem:[%s5817_s5 + $0x78] sm:$0xff] %vm1903_vm4, %v2063_v39 }
 0x22e   :  { %v2155_v15 = vpop.permute.xlu1 %2154 }
 0x22f   :  { %2285 = vst.msk [vmem:[%s5817_s5 + $0x1e8] sm:$0xff] %vm1903_vm4, %v2155_v15 }
 0x235   :  { %v2159_v25 = vpop.permute.xlu0 %2158 }
 0x236   :  { %2287 = vst.msk [vmem:[%s5817_s5 + $0x1f8] sm:$0xff] %vm1903_vm4, %v2159_v25 }

// kernel: tpu_custom_call.1
= control target key start
LH: loop header
LB: loop body
LE: loop exit
PB: predicated region body
PF: predicated region fallthrough
CT: control target
= control target key end

     0   :  { %vm85_vm0 = vcmask 130048   ;;  %vm1903_vm4 = vcmask 64512   ;;  %s5812_s1 = inlined_call_operand.vmem [shape: f32[16,16], index: 1, kind: input, shape index: {}]   ;;  %s5813_s0 = inlined_call_operand.vmem [shape: f32[512,16], index: 0, kind: input, shape index: {}]   ;;  %s5814_s2 = inlined_call_operand.vmem [shape: f32[1,16], index: 2, kind: input, shape index: {}]   ;;  %s5815_s3 = inlined_call_operand.vmem [shape: f32[1,16], index: 3, kind: input, shape index: {}]   ;;  %s5816_s4 = inlined_call_operand.vmem [shape: f32[512,8], index: 4, kind: output, shape index: {0}]   ;;  %s5817_s5 = inlined_call_operand.vmem [shape: f32[512,8], index: 5, kind: output, shape index: {1}]  }
   0x1   :  { %v84_v0 = vld [vmem:[%s5812_s1 + $0x8] sm:$0xff]  ;;  %v83_v1 = vld [vmem:[%s5812_s1] sm:$0xff]  ;;  %v21_v10 = vld [vmem:[%s5813_s0 + $0x10] sm:$0xff] }
   0x2   :  { %292 = vmatpush.msra.mxu0 %v84_v0  ;;  %2424 = vmatpush.msra.mxu1 %v84_v0  ;;  %v19_v2 = vld [vmem:[%s5813_s0] sm:$0xff]  ;;  %v20_v6 = vld [vmem:[%s5813_s0 + $0x8] sm:$0xff]  ;;  %v37_v11 = vld [vmem:[%s5813_s0 + $0x90] sm:$0xff] }
   0x3   :  { %2425 = vmatpush.msra.mxu2 %v84_v0  ;;  %2426 = vmatpush.msra.mxu3 %v84_v0  ;;  %v35_v3 = vld [vmem:[%s5813_s0 + $0x80] sm:$0xff]  ;;  %v36_v7 = vld [vmem:[%s5813_s0 + $0x88] sm:$0xff]  ;;  %v53_v12 = vld [vmem:[%s5813_s0 + $0x110] sm:$0xff] }
   0x4   :  { %293 = vmatpush.msra.mxu0 %v83_v1  ;;  %2427 = vmatpush.msra.mxu1 %v83_v1  ;;  %v51_v4 = vld [vmem:[%s5813_s0 + $0x100] sm:$0xff]  ;;  %v52_v8 = vld [vmem:[%s5813_s0 + $0x108] sm:$0xff]  ;;  %v69_v13 = vld [vmem:[%s5813_s0 + $0x190] sm:$0xff] }
   0x5   :  { %v67_v5 = vld [vmem:[%s5813_s0 + $0x180] sm:$0xff]  ;;  %2428 = vmatpush.msra.mxu2 %v83_v1  ;;  %2429 = vmatpush.msra.mxu3 %v83_v1  ;;  %v68_v9 = vld [vmem:[%s5813_s0 + $0x188] sm:$0xff]  ;;  %v22_v14 = vld [vmem:[%s5813_s0 + $0x18] sm:$0xff] }
   0x6   :  { %2296 = vmatmul.msk.f32.vlgmr.msra.gmra.mxu0 %vm85_vm0, %v19_v2  ;;  %2312 = vmatmul.msk.f32.vlgmr.msra.gmra.mxu1 %vm85_vm0, %v35_v3  ;;  %v38_v15 = vld [vmem:[%s5813_s0 + $0x98] sm:$0xff]  ;;  %v23_v18 = vld [vmem:[%s5813_s0 + $0x20] sm:$0xff]  ;;  %v24_v22 = vld [vmem:[%s5813_s0 + $0x28] sm:$0xff] }
   0x7   :  { %2328 = vmatmul.msk.f32.vlgmr.msra.gmra.mxu2 %vm85_vm0, %v51_v4  ;;  %2344 = vmatmul.msk.f32.vlgmr.msra.gmra.mxu3 %vm85_vm0, %v67_v5  ;;  %v54_v16 = vld [vmem:[%s5813_s0 + $0x118] sm:$0xff]  ;;  %v39_v19 = vld [vmem:[%s5813_s0 + $0xa0] sm:$0xff]  ;;  %v40_v23 = vld [vmem:[%s5813_s0 + $0xa8] sm:$0xff] }
   0x8   :  { %v70_v17 = vld [vmem:[%s5813_s0 + $0x198] sm:$0xff]  ;;  %v55_v20 = vld [vmem:[%s5813_s0 + $0x120] sm:$0xff]  ;;  %v56_v24 = vld [vmem:[%s5813_s0 + $0x128] sm:$0xff] }
   0x9   :  { %v71_v21 = vld [vmem:[%s5813_s0 + $0x1a0] sm:$0xff]  ;;  %v72_v25 = vld [vmem:[%s5813_s0 + $0x1a8] sm:$0xff]  ;;  %v25_v26 = vld [vmem:[%s5813_s0 + $0x30] sm:$0xff] }
   0xa   :  { %v41_v27 = vld [vmem:[%s5813_s0 + $0xb0] sm:$0xff]  ;;  %v26_v30 = vld [vmem:[%s5813_s0 + $0x38] sm:$0xff]  ;;  %v27_v34 = vld [vmem:[%s5813_s0 + $0x40] sm:$0xff] }
   0xb   :  { %v57_v28 = vld [vmem:[%s5813_s0 + $0x130] sm:$0xff]  ;;  %v42_v31 = vld [vmem:[%s5813_s0 + $0xb8] sm:$0xff]  ;;  %v43_v35 = vld [vmem:[%s5813_s0 + $0xc0] sm:$0xff] }
   0xc   :  { %v73_v29 = vld [vmem:[%s5813_s0 + $0x1b0] sm:$0xff]  ;;  %v58_v32 = vld [vmem:[%s5813_s0 + $0x138] sm:$0xff]  ;;  %v59_v36 = vld [vmem:[%s5813_s0 + $0x140] sm:$0xff] }
   0xd   :  { %v74_v33 = vld [vmem:[%s5813_s0 + $0x1b8] sm:$0xff]  ;;  %v75_v37 = vld [vmem:[%s5813_s0 + $0x1c0] sm:$0xff]  ;;  %v28_v38 = vld [vmem:[%s5813_s0 + $0x48] sm:$0xff] }
   0xe   :  { %2297 = vmatmul.msk.f32.gmra.mxu0 %vm85_vm0, %v20_v6  ;;  %2313 = vmatmul.msk.f32.gmra.mxu1 %vm85_vm0, %v36_v7  ;;  %v44_v39 = vld [vmem:[%s5813_s0 + $0xc8] sm:$0xff]  ;;  %v29_v42 = vld [vmem:[%s5813_s0 + $0x50] sm:$0xff]  ;;  %v30_v46 = vld [vmem:[%s5813_s0 + $0x58] sm:$0xff] }
   0xf   :  { %2329 = vmatmul.msk.f32.gmra.mxu2 %vm85_vm0, %v52_v8  ;;  %2345 = vmatmul.msk.f32.gmra.mxu3 %vm85_vm0, %v68_v9  ;;  %v60_v40 = vld [vmem:[%s5813_s0 + $0x148] sm:$0xff]  ;;  %v45_v43 = vld [vmem:[%s5813_s0 + $0xd0] sm:$0xff]  ;;  %v46_v47 = vld [vmem:[%s5813_s0 + $0xd8] sm:$0xff] }
  0x10   :  { %v76_v41 = vld [vmem:[%s5813_s0 + $0x1c8] sm:$0xff]  ;;  %v61_v44 = vld [vmem:[%s5813_s0 + $0x150] sm:$0xff]  ;;  %v62_v48 = vld [vmem:[%s5813_s0 + $0x158] sm:$0xff] }
  0x11   :  { %v77_v45 = vld [vmem:[%s5813_s0 + $0x1d0] sm:$0xff]  ;;  %v78_v49 = vld [vmem:[%s5813_s0 + $0x1d8] sm:$0xff]  ;;  %v31_v50 = vld [vmem:[%s5813_s0 + $0x60] sm:$0xff] }
  0x12   :  { %v47_v51 = vld [vmem:[%s5813_s0 + $0xe0] sm:$0xff]  ;;  %v32_v54 = vld [vmem:[%s5813_s0 + $0x68] sm:$0xff]  ;;  %v33_v58 = vld [vmem:[%s5813_s0 + $0x70] sm:$0xff] }
  0x13   :  { %v63_v52 = vld [vmem:[%s5813_s0 + $0x160] sm:$0xff]  ;;  %v48_v55 = vld [vmem:[%s5813_s0 + $0xe8] sm:$0xff]  ;;  %v49_v59 = vld [vmem:[%s5813_s0 + $0xf0] sm:$0xff] }
  0x14   :  { %v79_v53 = vld [vmem:[%s5813_s0 + $0x1e0] sm:$0xff]  ;;  %v64_v56 = vld [vmem:[%s5813_s0 + $0x168] sm:$0xff]  ;;  %v65_v60 = vld [vmem:[%s5813_s0 + $0x170] sm:$0xff] }
  0x15   :  { %v80_v57 = vld [vmem:[%s5813_s0 + $0x1e8] sm:$0xff]  ;;  %v81_v61 = vld [vmem:[%s5813_s0 + $0x1f0] sm:$0xff]  ;;  %v34_v62 = vld [vmem:[%s5813_s0 + $0x78] sm:$0xff] }
  0x16   :  { %2298 = vmatmul.msk.f32.gmra.mxu0 %vm85_vm0, %v21_v10  ;;  %2314 = vmatmul.msk.f32.gmra.mxu1 %vm85_vm0, %v37_v11  ;;  %v50_v63 = vld [vmem:[%s5813_s0 + $0xf8] sm:$0xff]  ;;  %v2985_v1 = vld [vmem:[%s5814_s2] ss:$0 sm:$0xff] }
  0x17   :  { %2330 = vmatmul.msk.f32.gmra.mxu2 %vm85_vm0, %v53_v12  ;;  %2346 = vmatmul.msk.f32.gmra.mxu3 %vm85_vm0, %v69_v13  ;;  %v82_v0 = vld [vmem:[%s5813_s0 + $0x1f8] sm:$0xff]  ;;  %v2993_v3 = vld [vmem:[%s5815_s3] ss:$0 sm:$0xff] }
  0x18   :  { %v66_v2 = vld [vmem:[%s5813_s0 + $0x178] sm:$0xff]  ;;  %s2693_s0 = smov 120  }
  0x1e   :  { %2299 = vmatmul.msk.f32.gmra.mxu0 %vm85_vm0, %v22_v14  ;;  %2315 = vmatmul.msk.f32.gmra.mxu1 %vm85_vm0, %v38_v15 }
  0x1f   :  { %2331 = vmatmul.msk.f32.gmra.mxu2 %vm85_vm0, %v54_v16  ;;  %2347 = vmatmul.msk.f32.gmra.mxu3 %vm85_vm0, %v70_v17 }
  0x26   :  { %2300 = vmatmul.msk.f32.gmra.mxu0 %vm85_vm0, %v23_v18  ;;  %2316 = vmatmul.msk.f32.gmra.mxu1 %vm85_vm0, %v39_v19 }
  0x27   :  { %2332 = vmatmul.msk.f32.gmra.mxu2 %vm85_vm0, %v55_v20  ;;  %2348 = vmatmul.msk.f32.gmra.mxu3 %vm85_vm0, %v71_v21 }
  0x2e   :  { %2301 = vmatmul.msk.f32.gmra.mxu0 %vm85_vm0, %v24_v22  ;;  %2317 = vmatmul.msk.f32.gmra.mxu1 %vm85_vm0, %v40_v23 }
  0x2f   :  { %2333 = vmatmul.msk.f32.gmra.mxu2 %vm85_vm0, %v56_v24  ;;  %2349 = vmatmul.msk.f32.gmra.mxu3 %vm85_vm0, %v72_v25 }
  0x36   :  { %2302 = vmatmul.msk.f32.gmra.mxu0 %vm85_vm0, %v25_v26  ;;  %2318 = vmatmul.msk.f32.gmra.mxu1 %vm85_vm0, %v41_v27 }
  0x37   :  { %2334 = vmatmul.msk.f32.gmra.mxu2 %vm85_vm0, %v57_v28  ;;  %2350 = vmatmul.msk.f32.gmra.mxu3 %vm85_vm0, %v73_v29 }
  0x3e   :  { %2303 = vmatmul.msk.f32.gmra.mxu0 %vm85_vm0, %v26_v30  ;;  %2319 = vmatmul.msk.f32.gmra.mxu1 %vm85_vm0, %v42_v31 }
  0x3f   :  { %2335 = vmatmul.msk.f32.gmra.mxu2 %vm85_vm0, %v58_v32  ;;  %2351 = vmatmul.msk.f32.gmra.mxu3 %vm85_vm0, %v74_v33 }
  0x46   :  { %2304 = vmatmul.msk.f32.gmra.mxu0 %vm85_vm0, %v27_v34  ;;  %2320 = vmatmul.msk.f32.gmra.mxu1 %vm85_vm0, %v43_v35 }
  0x47   :  { %2336 = vmatmul.msk.f32.gmra.mxu2 %vm85_vm0, %v59_v36  ;;  %2352 = vmatmul.msk.f32.gmra.mxu3 %vm85_vm0, %v75_v37 }
  0x4e   :  { %2305 = vmatmul.msk.f32.gmra.mxu0 %vm85_vm0, %v28_v38  ;;  %2321 = vmatmul.msk.f32.gmra.mxu1 %vm85_vm0, %v44_v39 }
  0x4f   :  { %2337 = vmatmul.msk.f32.gmra.mxu2 %vm85_vm0, %v60_v40  ;;  %2353 = vmatmul.msk.f32.gmra.mxu3 %vm85_vm0, %v76_v41 }
  0x56   :  { %2306 = vmatmul.msk.f32.gmra.mxu0 %vm85_vm0, %v29_v42  ;;  %2322 = vmatmul.msk.f32.gmra.mxu1 %vm85_vm0, %v45_v43 }
  0x57   :  { %2338 = vmatmul.msk.f32.gmra.mxu2 %vm85_vm0, %v61_v44  ;;  %2354 = vmatmul.msk.f32.gmra.mxu3 %vm85_vm0, %v77_v45 }
  0x5e   :  { %2307 = vmatmul.msk.f32.gmra.mxu0 %vm85_vm0, %v30_v46  ;;  %2323 = vmatmul.msk.f32.gmra.mxu1 %vm85_vm0, %v46_v47 }
  0x5f   :  { %2339 = vmatmul.msk.f32.gmra.mxu2 %vm85_vm0, %v62_v48  ;;  %2355 = vmatmul.msk.f32.gmra.mxu3 %vm85_vm0, %v78_v49 }
  0x66   :  { %2308 = vmatmul.msk.f32.gmra.mxu0 %vm85_vm0, %v31_v50  ;;  %2324 = vmatmul.msk.f32.gmra.mxu1 %vm85_vm0, %v47_v51 }
  0x67   :  { %2340 = vmatmul.msk.f32.gmra.mxu2 %vm85_vm0, %v63_v52  ;;  %2356 = vmatmul.msk.f32.gmra.mxu3 %vm85_vm0, %v79_v53 }
  0x6e   :  { %2309 = vmatmul.msk.f32.gmra.mxu0 %vm85_vm0, %v32_v54  ;;  %2325 = vmatmul.msk.f32.gmra.mxu1 %vm85_vm0, %v48_v55 }
  0x6f   :  { %2341 = vmatmul.msk.f32.gmra.mxu2 %vm85_vm0, %v64_v56  ;;  %2357 = vmatmul.msk.f32.gmra.mxu3 %vm85_vm0, %v80_v57 }
  0x76   :  { %2310 = vmatmul.msk.f32.gmra.mxu0 %vm85_vm0, %v33_v58  ;;  %2326 = vmatmul.msk.f32.gmra.mxu1 %vm85_vm0, %v49_v59 }
  0x77   :  { %2342 = vmatmul.msk.f32.gmra.mxu2 %vm85_vm0, %v65_v60  ;;  %2358 = vmatmul.msk.f32.gmra.mxu3 %vm85_vm0, %v81_v61 }
  0x7e   :  { %2311 = vmatmul.msk.f32.gmra.mxu0 %vm85_vm0, %v34_v62  ;;  %2327 = vmatmul.msk.f32.gmra.mxu1 %vm85_vm0, %v50_v63 }
  0x7f   :  { %2359 = vmatmul.msk.f32.gmra.mxu3 %vm85_vm0, %v82_v0  ;;  %2343 = vmatmul.msk.f32.gmra.mxu2 %vm85_vm0, %v66_v2 }
  0x83   :  { %v295_v4 = vpop.f32.mrf.mxu0  ;;  %v343_v5 = vpop.f32.mrf.mxu1 }
  0x84   :  { %v491_v6 = vmul.f32 %v2985_v1, %v295_v4  ;;  %v507_v7 = vmul.f32 %v2985_v1, %v343_v5 }
  0x86   :  { %v2999_v8 = vadd.f32 %v2993_v3, %v491_v6  ;;  %v3002_v9 = vadd.f32 %v2993_v3, %v507_v7 }
  0x88   :  { %v2360_v10 = vmul.f32 -1.442695, %v2999_v8  ;;  %v2376_v11 = vmul.f32 -1.442695, %v3002_v9 }
  0x8a   :  { %2433 = vpow2.f32 %v2360_v10  ;;  %v391_v12 = vpop.f32.mrf.mxu2  ;;  %v439_v13 = vpop.f32.mrf.mxu3 }
  0x8b   :  { %2435 = vpow2.f32 %v2376_v11  ;;  %v523_v14 = vmul.f32 %v2985_v1, %v391_v12  ;;  %v539_v15 = vmul.f32 %v2985_v1, %v439_v13  ;;  %v298_v16 = vpop.f32.mrf.mxu0  ;;  %v346_v17 = vpop.f32.mrf.mxu1 }
  0x8c   :  { %v492_v18 = vmul.f32 %v2985_v1, %v298_v16  ;;  %v508_v19 = vmul.f32 %v2985_v1, %v346_v17 }
  0x8d   :  { %v3011_v20 = vadd.f32 %v2993_v3, %v523_v14  ;;  %v3014_v21 = vadd.f32 %v2993_v3, %v539_v15 }
  0x8e   :  { %v3017_v22 = vadd.f32 %v2993_v3, %v492_v18  ;;  %v3020_v23 = vadd.f32 %v2993_v3, %v508_v19 }
  0x8f   :  { %v2392_v24 = vmul.f32 -1.442695, %v3011_v20  ;;  %v2408_v25 = vmul.f32 -1.442695, %v3014_v21 }
  0x90   :  { %v2434_v26 = vpop.eup %2433  ;;  %v2361_v29 = vmul.f32 -1.442695, %v3017_v22  ;;  %v2377_v31 = vmul.f32 -1.442695, %v3020_v23 }
  0x91   :  { %v2436_v27 = vpop.eup %2435  ;;  %v3024_v28 = vadd.f32 1.0, %v2434_v26  ;;  %2437 = vpow2.f32 %v2392_v24 }
  0x92   :  { %v3027_v30 = vadd.f32 1.0, %v2436_v27  ;;  %2439 = vpow2.f32 %v2408_v25  ;;  %v394_v32 = vpop.f32.mrf.mxu2  ;;  %v442_v33 = vpop.f32.mrf.mxu3 }
  0x93   :  { %2441 = vrcp.f32 %v3024_v28  ;;  %v524_v34 = vmul.f32 %v2985_v1, %v394_v32  ;;  %v540_v35 = vmul.f32 %v2985_v1, %v442_v33  ;;  %v301_v36 = vpop.f32.mrf.mxu0  ;;  %v349_v37 = vpop.f32.mrf.mxu1  ;;  %v890_v54 = vand.u32 2147483648, %v3024_v28 }
  0x94   :  { %2443 = vrcp.f32 %v3027_v30  ;;  %v493_v38 = vmul.f32 %v2985_v1, %v301_v36  ;;  %v509_v39 = vmul.f32 %v2985_v1, %v349_v37  ;;  %v1130_v44 = vand.u32 2147483648, %v3027_v30 }
  0x95   :  { %2445 = vpow2.f32 %v2361_v29  ;;  %v3037_v40 = vadd.f32 %v2993_v3, %v524_v34  ;;  %v3040_v41 = vadd.f32 %v2993_v3, %v540_v35  ;;  %v1128_v50 = vand.u32 2147483647, %v3027_v30 }
  0x96   :  { %2447 = vpow2.f32 %v2377_v31  ;;  %v3043_v42 = vadd.f32 %v2993_v3, %v493_v38  ;;  %v3046_v43 = vadd.f32 %v2993_v3, %v509_v39  ;;  %v3064_v59 = vor.u32 1.1754944e-38, %v1130_v44 }
  0x97   :  { %v2438_v45 = vpop.eup %2437  ;;  %v2393_v46 = vmul.f32 -1.442695, %v3037_v40  ;;  %v2409_v49 = vmul.f32 -1.442695, %v3040_v41  ;;  %vm1124_vm1 = vweird.f32 %v3027_v30  ;;  %v888_v24 = vand.u32 2147483647, %v3024_v28 }
  0x98   :  { %v2440_v47 = vpop.eup %2439  ;;  %v3050_v48 = vadd.f32 1.0, %v2438_v45  ;;  %v2362_v53 = vmul.f32 -1.442695, %v3043_v42  ;;  %v2378_v56 = vmul.f32 -1.442695, %v3046_v43  ;;  %vm3104_vm2 = vcmp.eq.f32.partialorder %v1128_v50, 8.507059e+37 }
  0x99   :  { %v3054_v51 = vpop.eup %2441  ;;  %v3056_v52 = vadd.f32 1.0, %v2440_v47  ;;  %2449 = vpow2.f32 %v2393_v46  ;;  %v3108_v31 = vor.u32 1.1754944e-38, %v890_v54  ;;  %vm884_vm5 = vweird.f32 %v3024_v28 }
  0x9a   :  { %v3060_v55 = vpop.eup %2443  ;;  %2451 = vrcp.f32 %v3050_v48  ;;  %v397_v57 = vpop.f32.mrf.mxu2  ;;  %v3068_v60 = vmul.f32 %v3054_v51, %v3024_v28  ;;  %vm885_vm6 = vweird.f32 %v3054_v51  ;;  %vm3127_vm7 = vcmp.eq.f32.partialorder %v888_v24, 8.507059e+37 }
  0x9b   :  { %v445_v58 = vpop.f32.mrf.mxu3  ;;  %v2446_v61 = vpop.eup %2445  ;;  %2453 = vrcp.f32 %v3056_v52  ;;  %v525_v62 = vmul.f32 %v2985_v1, %v397_v57  ;;  %v1120_v4 = vmul.f32 %v3060_v55, %v3027_v30  ;;  %vm1125_vm3 = vweird.f32 %v3060_v55  ;;  %vm3186_vm11 = vmor %vm884_vm5, %vm885_vm6 }
  0x9c   :  { %v541_v63 = vmul.f32 %v2985_v1, %v445_v58  ;;  %v304_v0 = vpop.f32.mrf.mxu0  ;;  %v352_v2 = vpop.f32.mrf.mxu1  ;;  %v3075_v6 = vadd.f32 1.0, %v2446_v61  ;;  %2455 = vpow2.f32 %v2409_v49  ;;  %v881_v38 = vsub.f32 1.0, %v3068_v60  ;;  %vm1126_vm8 = vmor %vm1124_vm1, %vm1125_vm3 }
  0x9d   :  { %v2448_v5 = vpop.eup %2447  ;;  %v494_v7 = vmul.f32 %v2985_v1, %v304_v0  ;;  %v510_v10 = vmul.f32 %v2985_v1, %v352_v2  ;;  %2457 = vpow2.f32 %v2362_v53  ;;  %v3083_v12 = vadd.f32 %v2993_v3, %v525_v62 }
  0x9e   :  { %v3080_v11 = vadd.f32 1.0, %v2448_v5  ;;  %v3086_v13 = vadd.f32 %v2993_v3, %v541_v63  ;;  %2459 = vrcp.f32 %v3075_v6  ;;  %v1121_v16 = vsub.f32 1.0, %v1120_v4 }
  0x9f   :  { %v3090_v14 = vadd.f32 %v2993_v3, %v494_v7  ;;  %v3093_v15 = vadd.f32 %v2993_v3, %v510_v10  ;;  %v2450_v17 = vpop.eup %2449  ;;  %v2394_v18 = vmul.f32 -1.442695, %v3083_v12  ;;  %v882_v5 = vmul.f32 %v3054_v51, %v881_v38 }
  0xa0   :  { %2461 = vrcp.f32 %v3080_v11  ;;  %v2410_v19 = vmul.f32 -1.442695, %v3086_v13  ;;  %v3099_v25 = vpop.eup %2451  ;;  %v3101_v26 = vadd.f32 1.0, %v2450_v17  ;;  %v1122_v33 = vmul.f32 %v3060_v55, %v1121_v16 }
  0xa1   :  { %2463 = vpow2.f32 %v2378_v56  ;;  %v2363_v27 = vmul.f32 -1.442695, %v3090_v14  ;;  %v3110_v32 = vpop.eup %2453  ;;  %v2379_v35 = vmul.f32 -1.442695, %v3093_v15  ;;  %v3121_v39 = vmul.f32 %v3099_v25, %v3050_v48 }
  0xa2   :  { %2465 = vpow2.f32 %v2394_v18  ;;  %v2456_v34 = vpop.eup %2455  ;;  %v400_v36 = vpop.f32.mrf.mxu2  ;;  %v1123_v63 = vadd.f32 %v3060_v55, %v1122_v33  ;;  %vm1364_vm9 = vweird.f32 %v3050_v48  ;;  %vm1365_vm10 = vweird.f32 %v3099_v25 }
  0xa3   :  { %2467 = vrcp.f32 %v3101_v26  ;;  %v448_v37 = vpop.f32.mrf.mxu3  ;;  %v2458_v44 = vpop.eup %2457  ;;  %v3123_v45 = vadd.f32 1.0, %v2456_v34  ;;  %v526_v46 = vmul.f32 %v2985_v1, %v400_v36  ;;  %v1368_v17 = vand.u32 2147483647, %v3050_v48  ;;  %vm1366_vm13 = vmor %vm1364_vm9, %vm1365_vm10 }
  0xa4   :  { %2469 = vpow2.f32 %v2410_v19  ;;  %v542_v47 = vmul.f32 %v2985_v1, %v448_v37  ;;  %v307_v49 = vpop.f32.mrf.mxu0  ;;  %v355_v50 = vpop.f32.mrf.mxu1  ;;  %v3133_v56 = vadd.f32 1.0, %v2458_v44  ;;  %v1127_v33 = vsel %vm1126_vm8, %v3060_v55, %v1123_v63 }
  0xa5   :  { %v3131_v54 = vpop.eup %2459  ;;  %2471 = vpow2.f32 %v2363_v27  ;;  %v495_v57 = vmul.f32 %v2985_v1, %v307_v49  ;;  %v511_v58 = vmul.f32 %v2985_v1, %v355_v50  ;;  %v3141_v61 = vadd.f32 %v2993_v3, %v526_v46 }
  0xa6   :  { %v3137_v60 = vpop.eup %2461  ;;  %2473 = vrcp.f32 %v3123_v45  ;;  %v3144_v62 = vadd.f32 %v2993_v3, %v542_v47  ;;  %v883_v36 = vadd.f32 %v3054_v51, %v882_v5  ;;  %vm3199_vm12 = vcmp.eq.f32.partialorder %v1368_v17, 8.507059e+37 }
  0xa7   :  { %v2464_v0 = vpop.eup %2463  ;;  %2475 = vrcp.f32 %v3133_v56  ;;  %v3149_v2 = vadd.f32 %v2993_v3, %v495_v57  ;;  %v3152_v4 = vadd.f32 %v2993_v3, %v511_v58  ;;  %v2395_v16 = vmul.f32 -1.442695, %v3141_v61 }
  0xa8   :  { %v2466_v7 = vpop.eup %2465  ;;  %v3155_v10 = vadd.f32 1.0, %v2464_v0  ;;  %2477 = vpow2.f32 %v2379_v35  ;;  %v2411_v24 = vmul.f32 -1.442695, %v3144_v62  ;;  %v1132_v35 = vsel %vm3104_vm2, %v3064_v59, %v1127_v33 }
  0xa9   :  { %5878 = vst [vmem:[#allocation2_spill] sm:$0xff] %v3152_v4  ;;  %v3165_v18 = vpop.eup %2467  ;;  %v3167_v19 = vadd.f32 1.0, %v2466_v7  ;;  %v2364_v27 = vmul.f32 -1.442695, %v3149_v2  ;;  %v2380_v30 = vmul.f32 -1.442695, %v3152_v4  ;;  %v1855_v44 = vmul.f32 %v1132_v35, %v3002_v9 }
  0xaa   :  { %v2470_v34 = vpop.eup %2469  ;;  %2479 = vrcp.f32 %v3155_v10  ;;  %v403_v46 = vpop.f32.mrf.mxu2  ;;  %v1361_v59 = vsub.f32 1.0, %v3121_v39  ;;  %v887_v9 = vsel %vm3186_vm11, %v3054_v51, %v883_v36  ;;  %vm1604_vm14 = vweird.f32 %v3056_v52 }
  0xab   :  { %v2472_v37 = vpop.eup %2471  ;;  %2481 = vrcp.f32 %v3167_v19  ;;  %v3179_v38 = vadd.f32 1.0, %v2470_v34  ;;  %v451_v29 = vpop.f32.mrf.mxu3  ;;  %v527_v50 = vmul.f32 %v2985_v1, %v403_v46  ;;  %2064 = vrot.lane.b32.xlu1 %v1855_v44, %s2693_s0  ;;  %1920 = vst.msk [vmem:[%s5816_s4 + $0x80] sm:$0xff] %vm1903_vm4, %v1855_v44  ;;  %v892_v51 = vsel %vm3127_vm7, %v3108_v31, %v887_v9 }
  0xac   :  { %v3191_v47 = vpop.eup %2473  ;;  %v3193_v49 = vadd.f32 1.0, %v2472_v37  ;;  %2483 = vpow2.f32 %v2395_v16  ;;  %v310_v28 = vpop.f32.mrf.mxu0  ;;  %v543_v39 = vmul.f32 %v2985_v1, %v451_v29  ;;  %v1839_v7 = vmul.f32 %v892_v51, %v2999_v8 }
  0xad   :  { %v358_v57 = vpop.f32.mrf.mxu1  ;;  %v3203_v63 = vpop.eup %2475  ;;  %2485 = vrcp.f32 %v3179_v38  ;;  %v496_v0 = vmul.f32 %v2985_v1, %v310_v28  ;;  %v3219_v16 = vadd.f32 %v2993_v3, %v527_v50  ;;  %v1362_v35 = vmul.f32 %v3099_v25, %v1361_v59 }
  0xae   :  { %v2478_v5 = vpop.eup %2477  ;;  %2487 = vrcp.f32 %v3193_v49  ;;  %v512_v17 = vmul.f32 %v2985_v1, %v358_v57  ;;  %v3225_v53 = vadd.f32 %v2993_v3, %v543_v39  ;;  %2032 = vrot.lane.b32.xlu0 %v1839_v7, %s2693_s0  ;;  %1904 = vst.msk [vmem:[%s5816_s4] sm:$0xff] %vm1903_vm4, %v1839_v7  ;;  %v1370_v44 = vand.u32 2147483648, %v3050_v48 }
  0xaf   :  { %5883 = vst [vmem:[#allocation3_spill] sm:$0xff] %v3219_v16  ;;  %v3222_v33 = vadd.f32 1.0, %v2478_v5  ;;  %2489 = vpow2.f32 %v2411_v24  ;;  %v3228_v31 = vadd.f32 %v2993_v3, %v496_v0  ;;  %v2396_v8 = vmul.f32 -1.442695, %v3219_v16 }
  0xb0   :  { %5884 = vst [vmem:[#allocation4_spill] sm:$0xff] %v3225_v53  ;;  %v3230_v34 = vpop.eup %2479  ;;  %2491 = vpow2.f32 %v2364_v27  ;;  %v3239_v24 = vadd.f32 %v2993_v3, %v512_v17  ;;  %v2412_v27 = vmul.f32 -1.442695, %v3225_v53  ;;  %v1363_v29 = vadd.f32 %v3099_v25, %v1362_v35 }
  0xb1   :  { %5885 = vst [vmem:[#allocation5_spill] sm:$0xff] %v3228_v31  ;;  %v3242_v36 = vpop.eup %2481  ;;  %2493 = vrcp.f32 %v3222_v33  ;;  %v2365_v37 = vmul.f32 -1.442695, %v3228_v31  ;;  %v1600_v9 = vmul.f32 %v3110_v32, %v3056_v52  ;;  %v1371_v28 = vor.u32 1.1754944e-38, %v1370_v44 }
  0xb2   :  { %5886 = vst [vmem:[#allocation6_spill] sm:$0xff] %v3239_v24  ;;  %v2484_v55 = vpop.eup %2483  ;;  %2495 = vpow2.f32 %v2380_v30  ;;  %v2381_v46 = vmul.f32 -1.442695, %v3239_v24  ;;  %v1367_v57 = vsel %vm1366_vm13, %v3099_v25, %v1363_v29  ;;  %vm1605_vm15 = vweird.f32 %v3110_v32  ;;  %v406_v7 = vpop.f32.mrf.mxu2 }
  0xb3   :  { %v3252_v59 = vpop.eup %2485  ;;  %v3254_v50 = vadd.f32 1.0, %v2484_v55  ;;  %2497 = vpow2.f32 %v2396_v8  ;;  %v1601_v51 = vsub.f32 1.0, %v1600_v9  ;;  %v1372_v0 = vsel %vm3199_vm12, %v1371_v28, %v1367_v57  ;;  %v454_v17 = vpop.f32.mrf.mxu3  ;;  %vm1606_vm1 = vmor %vm1604_vm14, %vm1605_vm15 }
  0xb4   :  { %v3261_v30 = vpop.eup %2487  ;;  %2499 = vpow2.f32 %v2412_v27  ;;  %v1608_v48 = vand.u32 2147483647, %v3056_v52  ;;  %v1610_v5 = vand.u32 2147483648, %v3056_v52  ;;  %v1871_v25 = vmul.f32 %v1372_v0, %v3011_v20  ;;  %v313_v44 = vpop.f32.mrf.mxu0 }
  0xb5   :  { %v2490_v39 = vpop.eup %2489  ;;  %2501 = vrcp.f32 %v3254_v50  ;;  %v1602_v27 = vmul.f32 %v3110_v32, %v1601_v51  ;;  %v361_v55 = vpop.f32.mrf.mxu1  ;;  %v497_v0 = vmul.f32 %v2985_v1, %v313_v44  ;;  %vm1619_vm2 = vweird.f32 %v3123_v45 }
  0xb6   :  { %v2492_v8 = vpop.eup %2491  ;;  %v3270_v35 = vadd.f32 1.0, %v2490_v39  ;;  %2503 = vpow2.f32 %v2365_v37  ;;  %vm3278_vm0 = vcmp.eq.f32.partialorder %v1608_v48, 8.507059e+37  ;;  %v1611_v28 = vor.u32 1.1754944e-38, %v1610_v5  ;;  %2096 = vrot.lane.b32.xlu2 %v1871_v25, %s2693_s0  ;;  %1936 = vst.msk [vmem:[%s5816_s4 + $0x100] sm:$0xff] %vm1903_vm4, %v1871_v25 }
  0xb7   :  { %v3274_v29 = vpop.eup %2493  ;;  %v3276_v58 = vadd.f32 1.0, %v2492_v8  ;;  %2505 = vpow2.f32 %v2381_v46  ;;  %v1603_v20 = vadd.f32 %v3110_v32, %v1602_v27  ;;  %v528_v37 = vmul.f32 %v2985_v1, %v406_v7 }
  0xb8   :  { %v2496_v57 = vpop.eup %2495  ;;  %2507 = vrcp.f32 %v3270_v35  ;;  %v544_v46 = vmul.f32 %v2985_v1, %v454_v17  ;;  %v513_v48 = vmul.f32 %v2985_v1, %v361_v55  ;;  %v3317_v55 = vadd.f32 %v2993_v3, %v497_v0 }
  0xb9   :  { %v2498_v51 = vpop.eup %2497  ;;  %2509 = vrcp.f32 %v3276_v58  ;;  %v3292_v39 = vadd.f32 1.0, %v2496_v57  ;;  %v1607_v7 = vsel %vm1606_vm1, %v3110_v32, %v1603_v20  ;;  %v3304_v17 = vadd.f32 %v2993_v3, %v528_v37 }
  0xba   :  { %v2500_v5 = vpop.eup %2499  ;;  %v3300_v8 = vadd.f32 1.0, %v2498_v51  ;;  %v3307_v25 = vadd.f32 %v2993_v3, %v544_v46  ;;  %v1612_v44 = vsel %vm3278_vm0, %v1611_v28, %v1607_v7  ;;  %5892 = vst [vmem:[#allocation10_spill] sm:$0xff] %v3317_v55  ;;  %v2366_v9 = vmul.f32 -1.442695, %v3317_v55 }
  0xbb   :  { %5889 = vst [vmem:[#allocation7_spill] sm:$0xff] %v3304_v17  ;;  %v3309_v27 = vpop.eup %2501  ;;  %2511 = vrcp.f32 %v3292_v39  ;;  %v3312_v52 = vadd.f32 1.0, %v2500_v5  ;;  %v1887_v32 = vmul.f32 %v1612_v44, %v3014_v21  ;;  %v2397_v20 = vmul.f32 -1.442695, %v3304_v17 }
  0xbc   :  { %5890 = vst [vmem:[#allocation8_spill] sm:$0xff] %v3307_v25  ;;  %v2504_v57 = vpop.eup %2503  ;;  %2513 = vrcp.f32 %v3300_v8  ;;  %v2413_v37 = vmul.f32 -1.442695, %v3307_v25  ;;  %v3328_v28 = vadd.f32 %v2993_v3, %v513_v48  ;;  %v1615_v21 = vmul.f32 %v3191_v47, %v3123_v45  ;;  %v316_v55 = vpop.f32.mrf.mxu0 }
  0xbd   :  { %5891 = vst [vmem:[#allocation9_spill] sm:$0xff] %v3312_v52  ;;  %v2506_v46 = vpop.eup %2505  ;;  %2515 = vrcp.f32 %v3312_v52  ;;  %v3324_v51 = vadd.f32 1.0, %v2504_v57  ;;  %2128 = vrot.lane.b32.xlu0 %v1887_v32, %s2693_s0  ;;  %vm1620_vm3 = vweird.f32 %v3191_v47  ;;  %v1623_v44 = vand.u32 2147483647, %v3123_v45 }
  0xbe   :  { %5894 = vst [vmem:[#allocation12_spill] sm:$0xff] %v3328_v28  ;;  %v3330_v0 = vpop.eup %2507  ;;  %v3332_v5 = vadd.f32 1.0, %v2506_v46  ;;  %2517 = vpow2.f32 %v2397_v20  ;;  %v2382_v48 = vmul.f32 -1.442695, %v3328_v28  ;;  %v1616_v57 = vsub.f32 1.0, %v1615_v21  ;;  %vm3374_vm8 = vmor %vm1619_vm2, %vm1620_vm3 }
  0xbf   :  { %5893 = vst [vmem:[#allocation11_spill] sm:$0xff] %v3324_v51  ;;  %v3342_v7 = vpop.eup %2509  ;;  %2519 = vrcp.f32 %v3324_v51  ;;  %v1135_v20 = vmul.f32 %v3137_v60, %v3080_v11  ;;  %vm3354_vm5 = vcmp.eq.f32.partialorder %v1623_v44, 8.507059e+37  ;;  %vm1139_vm6 = vweird.f32 %v3080_v11 }
  0xc0   :  { %5895 = vst [vmem:[#allocation13_spill] sm:$0xff] %v3332_v5  ;;  %2521 = vrcp.f32 %v3332_v5  ;;  %vm1140_vm7 = vweird.f32 %v3137_v60  ;;  %v1617_v21 = vmul.f32 %v3191_v47, %v1616_v57  ;;  %v1145_v44 = vand.u32 2147483648, %v3080_v11  ;;  %v409_v57 = vpop.f32.mrf.mxu2 }
  0xc1   :  { %1952 = vst.msk [vmem:[%s5816_s4 + $0x180] sm:$0xff] %vm1903_vm4, %v1887_v32  ;;  %v1625_v32 = vand.u32 2147483648, %v3123_v45  ;;  %v3352_v46 = vpop.eup %2511  ;;  %2523 = vpow2.f32 %v2413_v37  ;;  %v1136_v17 = vsub.f32 1.0, %v1135_v20  ;;  %v1143_v37 = vand.u32 2147483647, %v3080_v11  ;;  %vm3389_vm11 = vmor %vm1139_vm6, %vm1140_vm7 }
  0xc2   :  { %v3360_v28 = vpop.eup %2513  ;;  %2525 = vpow2.f32 %v2366_v9  ;;  %v895_v31 = vmul.f32 %v3131_v54, %v3075_v6  ;;  %v1618_v5 = vadd.f32 %v3191_v47, %v1617_v21  ;;  %vm899_vm9 = vweird.f32 %v3075_v6 }
  0xc3   :  { %v1626_v25 = vor.u32 1.1754944e-38, %v1625_v32  ;;  %v3363_v24 = vpop.eup %2515  ;;  %2527 = vpow2.f32 %v2382_v48  ;;  %v1137_v48 = vmul.f32 %v3137_v60, %v1136_v17  ;;  %vm900_vm10 = vweird.f32 %v3131_v54 }
  0xc4   :  { %5898 = vst [vmem:[#allocation14_spill] sm:$0xff] %v3363_v24  ;;  %v2518_v53 = vpop.eup %2517  ;;  %vm3393_vm12 = vcmp.eq.f32.partialorder %v1143_v37, 8.507059e+37  ;;  %v1146_v17 = vor.u32 1.1754944e-38, %v1145_v44  ;;  %v896_v51 = vsub.f32 1.0, %v895_v31  ;;  %v903_v11 = vand.u32 2147483647, %v3075_v6  ;;  %vm901_vm14 = vmor %vm899_vm9, %vm900_vm10 }
  0xc5   :  { %v3381_v32 = vpop.eup %2519  ;;  %v3383_v20 = vadd.f32 1.0, %v2518_v53  ;;  %v1622_v53 = vsel %vm3374_vm8, %v3191_v47, %v1618_v5  ;;  %v905_v24 = vand.u32 2147483648, %v3075_v6  ;;  %v529_v44 = vmul.f32 %v2985_v1, %v409_v57 }
  0xc6   :  { %5901 = vst [vmem:[#allocation15_spill] sm:$0xff] %v3381_v32  ;;  %v3397_v16 = vpop.eup %2521  ;;  %v1138_v32 = vadd.f32 %v3137_v60, %v1137_v48  ;;  %v1627_v37 = vsel %vm3354_vm5, %v1626_v25, %v1622_v53  ;;  %v897_v31 = vmul.f32 %v3131_v54, %v896_v51  ;;  %vm3416_vm13 = vcmp.eq.f32.partialorder %v903_v11, 8.507059e+37  ;;  %v457_v48 = vpop.f32.mrf.mxu3 }
  0xc7   :  { %5906 = vst [vmem:[#allocation16_spill] sm:$0xff] %v3397_v16  ;;  %v2524_v52 = vpop.eup %2523  ;;  %2529 = vrcp.f32 %v3383_v20  ;;  %v1888_v47 = vmul.f32 %v1627_v37, %v3040_v41  ;;  %v906_v57 = vor.u32 1.1754944e-38, %v905_v24  ;;  %v364_v41 = vpop.f32.mrf.mxu1  ;;  %v498_v21 = vmul.f32 %v2985_v1, %v316_v55 }
  0xc8   :  { %v2526_v16 = vpop.eup %2525  ;;  %v3410_v4 = vadd.f32 1.0, %v2524_v52  ;;  %v1142_v5 = vsel %vm3389_vm11, %v3137_v60, %v1138_v32  ;;  %v898_v52 = vadd.f32 %v3131_v54, %v897_v31  ;;  %v545_v32 = vmul.f32 %v2985_v1, %v457_v48 }
  0xc9   :  { %v2528_v25 = vpop.eup %2527  ;;  %v3420_v53 = vadd.f32 1.0, %v2526_v16  ;;  %v1147_v51 = vsel %vm3393_vm12, %v1146_v17, %v1142_v5  ;;  %1953 = vst.msk [vmem:[%s5816_s4 + $0x188] sm:$0xff] %vm1903_vm4, %v1888_v47  ;;  %2130 = vrot.lane.b32.xlu1 %v1888_v47, %s2693_s0  ;;  %v3439_v16 = vadd.f32 %v2993_v3, %v529_v44  ;;  %v3462_v31 = vadd.f32 %v2993_v3, %v498_v21 }
  0xca   :  { %2531 = vrcp.f32 %v3410_v4  ;;  %v3426_v45 = vadd.f32 1.0, %v2528_v25  ;;  %v1856_v60 = vmul.f32 %v1147_v51, %v3020_v23  ;;  %v902_v24 = vsel %vm901_vm14, %v3131_v54, %v898_v52 }
  0xcb   :  { %2533 = vrcp.f32 %v3420_v53  ;;  %v907_v23 = vsel %vm3416_vm13, %v906_v57, %v902_v24  ;;  %v2398_v6 = vmul.f32 -1.442695, %v3439_v16  ;;  %v514_v54 = vmul.f32 %v2985_v1, %v364_v41  ;;  %5909 = vst [vmem:[#allocation17_spill] sm:$0xff] %v3462_v31 }
  0xcc   :  { %2535 = vrcp.f32 %v3426_v45  ;;  %2066 = vrot.lane.b32.xlu2 %v1856_v60, %s2693_s0  ;;  %1921 = vst.msk [vmem:[%s5816_s4 + $0x88] sm:$0xff] %vm1903_vm4, %v1856_v60  ;;  %v1840_v11 = vmul.f32 %v907_v23, %v3017_v22  ;;  %v3459_v37 = vadd.f32 %v2993_v3, %v545_v32  ;;  %v1630_v44 = vmul.f32 %v3252_v59, %v3179_v38 }
  0xcd   :  { %v3455_v17 = vpop.eup %2529  ;;  %2537 = vpow2.f32 %v2398_v6  ;;  %v3467_v47 = vadd.f32 %v2993_v3, %v514_v54  ;;  %vm1634_vm15 = vweird.f32 %v3179_v38  ;;  %vm1635_vm0 = vweird.f32 %v3252_v59 }
  0xce   :  { %2034 = vrot.lane.b32.xlu0 %v1840_v11, %s2693_s0  ;;  %1905 = vst.msk [vmem:[%s5816_s4 + $0x8] sm:$0xff] %vm1903_vm4, %v1840_v11  ;;  %v2414_v22 = vmul.f32 -1.442695, %v3459_v37  ;;  %v2367_v5 = vmul.f32 -1.442695, %v3462_v31  ;;  %v1631_v9 = vsub.f32 1.0, %v1630_v44  ;;  %v910_v48 = vmul.f32 %v3203_v63, %v3133_v56  ;;  %vm1636_vm5 = vmor %vm1634_vm15, %vm1635_vm0  ;;  %v319_v31 = vpop.f32.mrf.mxu0 }
  0xcf   :  { %5910 = vst [vmem:[#allocation18_spill] sm:$0xff] %v3467_v47  ;;  %v2383_v25 = vmul.f32 -1.442695, %v3467_v47  ;;  %v1638_v51 = vand.u32 2147483647, %v3179_v38  ;;  %v1640_v52 = vand.u32 2147483648, %v3179_v38  ;;  %vm914_vm1 = vweird.f32 %v3133_v56  ;;  %v367_v47 = vpop.f32.mrf.mxu1 }
  0xd0   :  { %v3480_v55 = vpop.eup %2531  ;;  %2539 = vpow2.f32 %v2414_v22  ;;  %v1632_v41 = vmul.f32 %v3252_v59, %v1631_v9  ;;  %v911_v60 = vsub.f32 1.0, %v910_v48  ;;  %vm915_vm2 = vweird.f32 %v3203_v63  ;;  %v412_v9 = vpop.f32.mrf.mxu2 }
  0xd1   :  { %v3486_v57 = vpop.eup %2533  ;;  %2541 = vpow2.f32 %v2367_v5  ;;  %vm3492_vm3 = vcmp.eq.f32.partialorder %v1638_v51, 8.507059e+37  ;;  %v1641_v21 = vor.u32 1.1754944e-38, %v1640_v52  ;;  %v918_v23 = vand.u32 2147483647, %v3133_v56  ;;  %vm916_vm9 = vmor %vm914_vm1, %vm915_vm2 }
  0xd2   :  { %v3490_v24 = vpop.eup %2535  ;;  %2543 = vpow2.f32 %v2383_v25  ;;  %v1633_v6 = vadd.f32 %v3252_v59, %v1632_v41  ;;  %v912_v54 = vmul.f32 %v3203_v63, %v911_v60  ;;  %v920_v11 = vand.u32 2147483648, %v3133_v56 }
  0xd3   :  { %v2538_v44 = vpop.eup %2537  ;;  %vm3504_vm6 = vcmp.eq.f32.partialorder %v918_v23, 8.507059e+37  ;;  %v1375_v5 = vmul.f32 %v3165_v18, %v3101_v26  ;;  %vm1379_vm7 = vweird.f32 %v3101_v26  ;;  %vm1380_vm8 = vweird.f32 %v3165_v18 }
  0xd4   :  { %v3512_v48 = vadd.f32 1.0, %v2538_v44  ;;  %v1637_v25 = vsel %vm1636_vm5, %v3252_v59, %v1633_v6  ;;  %v913_v51 = vadd.f32 %v3203_v63, %v912_v54  ;;  %v921_v38 = vor.u32 1.1754944e-38, %v920_v11  ;;  %vm1381_vm11 = vmor %vm1379_vm7, %vm1380_vm8 }
  0xd5   :  { %v1642_v52 = vsel %vm3492_vm3, %v1641_v21, %v1637_v25  ;;  %v1376_v41 = vsub.f32 1.0, %v1375_v5  ;;  %v1383_v60 = vand.u32 2147483647, %v3101_v26  ;;  %v1385_v23 = vand.u32 2147483648, %v3101_v26  ;;  %v460_v21 = vpop.f32.mrf.mxu3 }
  0xd6   :  { %v2540_v44 = vpop.eup %2539  ;;  %2545 = vrcp.f32 %v3512_v48  ;;  %v1889_v59 = vmul.f32 %v1642_v52, %v3086_v13  ;;  %v917_v6 = vsel %vm916_vm9, %v3203_v63, %v913_v51  ;;  %v530_v32 = vmul.f32 %v2985_v1, %v412_v9 }
  0xd7   :  { %v2542_v54 = vpop.eup %2541  ;;  %v3528_v11 = vadd.f32 1.0, %v2540_v44  ;;  %v922_v56 = vsel %vm3504_vm6, %v921_v38, %v917_v6  ;;  %v1377_v5 = vmul.f32 %v3165_v18, %v1376_v41  ;;  %vm3533_vm10 = vcmp.eq.f32.partialorder %v1383_v60, 8.507059e+37 }
  0xd8   :  { %v2544_v13 = vpop.eup %2543  ;;  %v3537_v52 = vadd.f32 1.0, %v2542_v54  ;;  %1954 = vst.msk [vmem:[%s5816_s4 + $0x190] sm:$0xff] %vm1903_vm4, %v1889_v59  ;;  %2132 = vrot.lane.b32.xlu2 %v1889_v59, %s2693_s0  ;;  %v1841_v63 = vmul.f32 %v922_v56, %v3043_v42  ;;  %v1386_v22 = vor.u32 1.1754944e-38, %v1385_v23  ;;  %v3546_v9 = vadd.f32 %v2993_v3, %v530_v32 }
  0xd9   :  { %2547 = vrcp.f32 %v3528_v11  ;;  %v3549_v51 = vadd.f32 1.0, %v2544_v13  ;;  %v1378_v38 = vadd.f32 %v3165_v18, %v1377_v5  ;;  %v546_v41 = vmul.f32 %v2985_v1, %v460_v21 }
  0xda   :  { %2549 = vrcp.f32 %v3537_v52  ;;  %2036 = vrot.lane.b32.xlu1 %v1841_v63, %s2693_s0  ;;  %1906 = vst.msk [vmem:[%s5816_s4 + $0x10] sm:$0xff] %vm1903_vm4, %v1841_v63  ;;  %v2399_v42 = vmul.f32 -1.442695, %v3546_v9  ;;  %v499_v60 = vmul.f32 %v2985_v1, %v319_v31  ;;  %v515_v23 = vmul.f32 %v2985_v1, %v367_v47 }
  0xdb   :  { %2551 = vrcp.f32 %v3549_v51  ;;  %v1382_v44 = vsel %vm1381_vm11, %v3165_v18, %v1378_v38  ;;  %v3569_v59 = vadd.f32 %v2993_v3, %v546_v41  ;;  %v1405_v6 = vmul.f32 %v3309_v27, %v3254_v50 }
  0xdc   :  { %v3573_v32 = vpop.eup %2545  ;;  %v1387_v26 = vsel %vm3533_vm10, %v1386_v22, %v1382_v44  ;;  %2553 = vpow2.f32 %v2399_v42  ;;  %v3578_v31 = vadd.f32 %v2993_v3, %v499_v60  ;;  %v3581_v47 = vadd.f32 %v2993_v3, %v515_v23 }
  0xdd   :  { %5917 = vst [vmem:[#allocation19_spill] sm:$0xff] %v3569_v59  ;;  %v1872_v18 = vmul.f32 %v1387_v26, %v3037_v40  ;;  %v2415_v21 = vmul.f32 -1.442695, %v3569_v59  ;;  %v1406_v54 = vsub.f32 1.0, %v1405_v6  ;;  %vm1409_vm12 = vweird.f32 %v3254_v50 }
  0xde   :  { %5918 = vst [vmem:[#allocation20_spill] sm:$0xff] %v3578_v31  ;;  %v2368_v56 = vmul.f32 -1.442695, %v3578_v31  ;;  %v2384_v5 = vmul.f32 -1.442695, %v3581_v47  ;;  %vm1410_vm13 = vweird.f32 %v3309_v27  ;;  %v1415_v40 = vand.u32 2147483648, %v3254_v50 }
  0xdf   :  { %5919 = vst [vmem:[#allocation21_spill] sm:$0xff] %v3581_v47  ;;  %v1413_v25 = vand.u32 2147483647, %v3254_v50  ;;  %v3590_v13 = vpop.eup %2547  ;;  %2098 = vrot.lane.b32.xlu0 %v1872_v18, %s2693_s0  ;;  %2555 = vpow2.f32 %v2415_v21  ;;  %v1407_v3 = vmul.f32 %v3309_v27, %v1406_v54  ;;  %v1390_v63 = vmul.f32 %v3242_v36, %v3167_v19  ;;  %vm1411_vm1 = vmor %vm1409_vm12, %vm1410_vm13 }
  0xe0   :  { %1937 = vst.msk [vmem:[%s5816_s4 + $0x108] sm:$0xff] %vm1903_vm4, %v1872_v18  ;;  %v3601_v22 = vpop.eup %2549  ;;  %2557 = vpow2.f32 %v2368_v56  ;;  %vm1394_vm15 = vweird.f32 %v3167_v19  ;;  %vm1395_vm0 = vweird.f32 %v3242_v36  ;;  %v1416_v60 = vor.u32 1.1754944e-38, %v1415_v40 }
  0xe1   :  { %vm3603_vm14 = vcmp.eq.f32.partialorder %v1413_v25, 8.507059e+37  ;;  %v3609_v41 = vpop.eup %2551  ;;  %2559 = vpow2.f32 %v2384_v5  ;;  %v1408_v42 = vadd.f32 %v3309_v27, %v1407_v3  ;;  %v1391_v23 = vsub.f32 1.0, %v1390_v63  ;;  %v415_v5 = vpop.f32.mrf.mxu2  ;;  %vm3642_vm6 = vmor %vm1394_vm15, %vm1395_vm0 }
  0xe2   :  { %v2554_v44 = vpop.eup %2553  ;;  %v1398_v6 = vand.u32 2147483647, %v3167_v19  ;;  %v1400_v26 = vand.u32 2147483648, %v3167_v19  ;;  %v1150_v18 = vmul.f32 %v3230_v34, %v3155_v10  ;;  %vm1154_vm2 = vweird.f32 %v3155_v10  ;;  %v463_v63 = vpop.f32.mrf.mxu3 }
  0xe3   :  { %v3621_v21 = vadd.f32 1.0, %v2554_v44  ;;  %v1412_v54 = vsel %vm1411_vm1, %v3309_v27, %v1408_v42  ;;  %v1392_v56 = vmul.f32 %v3242_v36, %v1391_v23  ;;  %vm1155_vm3 = vweird.f32 %v3230_v34 }
  0xe4   :  { %v1417_v50 = vsel %vm3603_vm14, %v1416_v60, %v1412_v54  ;;  %vm3628_vm5 = vcmp.eq.f32.partialorder %v1398_v6, 8.507059e+37  ;;  %v1401_v3 = vor.u32 1.1754944e-38, %v1400_v26  ;;  %v1151_v40 = vsub.f32 1.0, %v1150_v18  ;;  %vm3663_vm7 = vmor %vm1154_vm2, %vm1155_vm3 }
  0xe5   :  { %v2556_v47 = vpop.eup %2555  ;;  %2561 = vrcp.f32 %v3621_v21  ;;  %v1874_v27 = vmul.f32 %v1417_v50, %v3141_v61  ;;  %v1393_v42 = vadd.f32 %v3242_v36, %v1392_v56  ;;  %v1158_v23 = vand.u32 2147483647, %v3155_v10 }
  0xe6   :  { %v2558_v44 = vpop.eup %2557  ;;  %v3636_v31 = vadd.f32 1.0, %v2556_v47  ;;  %v1152_v60 = vmul.f32 %v3230_v34, %v1151_v40  ;;  %v1160_v6 = vand.u32 2147483648, %v3155_v10  ;;  %v531_v61 = vmul.f32 %v2985_v1, %v415_v5  ;;  %v322_v5 = vpop.f32.mrf.mxu0 }
  0xe7   :  { %v2560_v26 = vpop.eup %2559  ;;  %v3649_v18 = vadd.f32 1.0, %v2558_v44  ;;  %1939 = vst.msk [vmem:[%s5816_s4 + $0x118] sm:$0xff] %vm1903_vm4, %v1874_v27  ;;  %2102 = vrot.lane.b32.xlu2 %v1874_v27, %s2693_s0  ;;  %v1397_v19 = vsel %vm3642_vm6, %v3242_v36, %v1393_v42  ;;  %vm3667_vm8 = vcmp.eq.f32.partialorder %v1158_v23, 8.507059e+37  ;;  %v547_v56 = vmul.f32 %v2985_v1, %v463_v63  ;;  %v3683_v42 = vld [vmem:[%s5815_s3] ss:$0 sm:$0xff] }
  0xe8   :  { %2563 = vrcp.f32 %v3636_v31  ;;  %v3673_v50 = vadd.f32 1.0, %v2560_v26  ;;  %v1402_v36 = vsel %vm3628_vm5, %v1401_v3, %v1397_v19  ;;  %v1153_v10 = vadd.f32 %v3230_v34, %v1152_v60 }
  0xe9   :  { %2565 = vrcp.f32 %v3649_v18  ;;  %v1873_v40 = vmul.f32 %v1402_v36, %v3083_v12  ;;  %v1161_v27 = vor.u32 1.1754944e-38, %v1160_v6  ;;  %v3686_v1 = vadd.f32 %v3683_v42, %v531_v61  ;;  %v3698_v12 = vld [vmem:[%s5814_s2] ss:$0 sm:$0xff] }
  0xea   :  { %5930 = vst [vmem:[#allocation22_spill] sm:$0xff] %v3673_v50  ;;  %2567 = vrcp.f32 %v3673_v50  ;;  %v1157_v25 = vsel %vm3663_vm7, %v3230_v34, %v1153_v10  ;;  %v3693_v3 = vadd.f32 %v3683_v42, %v547_v56  ;;  %v500_v63 = vmul.f32 %v3698_v12, %v322_v5 }
  0xeb   :  { %5931 = vst [vmem:[#allocation23_spill] sm:$0xff] %v3686_v1  ;;  %v3701_v23 = vpop.eup %2561  ;;  %2100 = vrot.lane.b32.xlu1 %v1873_v40, %s2693_s0  ;;  %v1162_v34 = vsel %vm3667_vm8, %v1161_v27, %v1157_v25  ;;  %v2400_v44 = vmul.f32 -1.442695, %v3686_v1  ;;  %v925_v38 = vmul.f32 %v3261_v30, %v3193_v49  ;;  %vm929_vm9 = vweird.f32 %v3193_v49 }
  0xec   :  { %5932 = vst [vmem:[#allocation24_spill] sm:$0xff] %v3693_v3  ;;  %v1857_v60 = vmul.f32 %v1162_v34, %v3046_v43  ;;  %v2416_v6 = vmul.f32 -1.442695, %v3693_v3  ;;  %v3717_v61 = vadd.f32 %v3683_v42, %v500_v63  ;;  %vm930_vm10 = vweird.f32 %v3261_v30 }
  0xed   :  { %1938 = vst.msk [vmem:[%s5816_s4 + $0x110] sm:$0xff] %vm1903_vm4, %v1873_v40  ;;  %2569 = vpow2.f32 %v2400_v44  ;;  %v926_v26 = vsub.f32 1.0, %v925_v38  ;;  %v933_v19 = vand.u32 2147483647, %v3193_v49  ;;  %v935_v47 = vand.u32 2147483648, %v3193_v49  ;;  %vm3747_vm14 = vmor %vm929_vm9, %vm930_vm10  ;;  %v370_v38 = vpop.f32.mrf.mxu1 }
  0xee   :  { %5933 = vst [vmem:[#allocation25_spill] sm:$0xff] %v3717_v61  ;;  %v3722_v54 = vpop.eup %2563  ;;  %2068 = vrot.lane.b32.xlu0 %v1857_v60, %s2693_s0  ;;  %2571 = vpow2.f32 %v2416_v6  ;;  %v2369_v43 = vmul.f32 -1.442695, %v3717_v61  ;;  %v940_v56 = vmul.f32 %v3342_v7, %v3276_v58  ;;  %vm944_vm11 = vweird.f32 %v3276_v58  ;;  %v418_v61 = vpop.f32.mrf.mxu2 }
  0xef   :  { %1922 = vst.msk [vmem:[%s5816_s4 + $0x90] sm:$0xff] %vm1903_vm4, %v1857_v60  ;;  %v3733_v5 = vpop.eup %2565  ;;  %v927_v36 = vmul.f32 %v3261_v30, %v926_v26  ;;  %vm3736_vm12 = vcmp.eq.f32.partialorder %v933_v19, 8.507059e+37  ;;  %v936_v40 = vor.u32 1.1754944e-38, %v935_v47  ;;  %vm945_vm13 = vweird.f32 %v3342_v7 }
  0xf0   :  { %v3741_v27 = vpop.eup %2567  ;;  %2573 = vpow2.f32 %v2369_v43  ;;  %v941_v63 = vsub.f32 1.0, %v940_v56  ;;  %v948_v34 = vand.u32 2147483647, %v3276_v58  ;;  %v950_v44 = vand.u32 2147483648, %v3276_v58  ;;  %vm3771_vm2 = vmor %vm944_vm11, %vm945_vm13 }
  0xf1   :  { %5936 = vst [vmem:[#allocation26_spill] sm:$0xff] %v3741_v27  ;;  %v928_v60 = vadd.f32 %v3261_v30, %v927_v36  ;;  %v1645_v6 = vmul.f32 %v3330_v0, %v3270_v35  ;;  %vm1649_vm15 = vweird.f32 %v3270_v35  ;;  %vm1650_vm0 = vweird.f32 %v3330_v0  ;;  %v466_v27 = vpop.f32.mrf.mxu3 }
  0xf2   :  { %v942_v49 = vmul.f32 %v3342_v7, %v941_v63  ;;  %vm3759_vm1 = vcmp.eq.f32.partialorder %v948_v34, 8.507059e+37  ;;  %v951_v19 = vor.u32 1.1754944e-38, %v950_v44  ;;  %v1653_v47 = vand.u32 2147483647, %v3270_v35  ;;  %vm1651_vm5 = vmor %vm1649_vm15, %vm1650_vm0 }
  0xf3   :  { %v2570_v43 = vpop.eup %2569  ;;  %v932_v56 = vsel %vm3747_vm14, %v3261_v30, %v928_v60  ;;  %v1646_v63 = vsub.f32 1.0, %v1645_v6  ;;  %v1655_v34 = vand.u32 2147483648, %v3270_v35  ;;  %v516_v44 = vmul.f32 %v3698_v12, %v370_v38 }
  0xf4   :  { %v2572_v3 = vpop.eup %2571  ;;  %v3777_v1 = vadd.f32 1.0, %v2570_v43  ;;  %v937_v30 = vsel %vm3736_vm12, %v936_v40, %v932_v56  ;;  %v943_v25 = vadd.f32 %v3342_v7, %v942_v49  ;;  %vm3782_vm3 = vcmp.eq.f32.partialorder %v1653_v47, 8.507059e+37 }
  0xf5   :  { %v3786_v60 = vadd.f32 1.0, %v2572_v3  ;;  %v1842_v6 = vmul.f32 %v937_v30, %v3090_v14  ;;  %v1647_v59 = vmul.f32 %v3330_v0, %v1646_v63  ;;  %v1656_v38 = vor.u32 1.1754944e-38, %v1655_v34 }
  0xf6   :  { %v2574_v50 = vpop.eup %2573  ;;  %2575 = vrcp.f32 %v3777_v1  ;;  %v947_v10 = vsel %vm3771_vm2, %v3342_v7, %v943_v25  ;;  %v3795_v40 = vadd.f32 %v3683_v42, %v516_v44  ;;  %v532_v49 = vmul.f32 %v3698_v12, %v418_v61 }
  0xf7   :  { %2577 = vrcp.f32 %v3786_v60  ;;  %v3799_v3 = vadd.f32 1.0, %v2574_v50  ;;  %2038 = vrot.lane.b32.xlu1 %v1842_v6, %s2693_s0  ;;  %1907 = vst.msk [vmem:[%s5816_s4 + $0x18] sm:$0xff] %vm1903_vm4, %v1842_v6  ;;  %v952_v14 = vsel %vm3759_vm1, %v951_v19, %v947_v10  ;;  %v1648_v7 = vadd.f32 %v3330_v0, %v1647_v59 }
  0xf8   :  { %5945 = vst [vmem:[#allocation27_spill] sm:$0xff] %v3795_v40  ;;  %v1843_v47 = vmul.f32 %v952_v14, %v3149_v2  ;;  %v2385_v50 = vmul.f32 -1.442695, %v3795_v40  ;;  %v3816_v61 = vadd.f32 %v3683_v42, %v532_v49  ;;  %v548_v43 = vmul.f32 %v3698_v12, %v466_v27 }
  0xf9   :  { %2579 = vrcp.f32 %v3799_v3  ;;  %v1652_v26 = vsel %vm1651_vm5, %v3330_v0, %v1648_v7  ;;  %v1165_v59 = vmul.f32 %v3274_v29, %v3222_v33  ;;  %vm1169_vm6 = vweird.f32 %v3222_v33 }
  0xfa   :  { %5946 = vst [vmem:[#allocation28_spill] sm:$0xff] %v3816_v61  ;;  %2040 = vrot.lane.b32.xlu2 %v1843_v47, %s2693_s0  ;;  %v1657_v2 = vsel %vm3782_vm3, %v1656_v38, %v1652_v26  ;;  %2581 = vpow2.f32 %v2385_v50  ;;  %v2401_v35 = vmul.f32 -1.442695, %v3816_v61  ;;  %v3833_v0 = vadd.f32 %v3683_v42, %v548_v43  ;;  %v5980_v61 = vld [vmem:[#allocation4_spill] sm:$0xff] }
  0xfb   :  { %1908 = vst.msk [vmem:[%s5816_s4 + $0x20] sm:$0xff] %vm1903_vm4, %v1843_v47  ;;  %v1890_v27 = vmul.f32 %v1657_v2, %v3144_v62  ;;  %v1166_v19 = vsub.f32 1.0, %v1165_v59  ;;  %vm1170_vm7 = vweird.f32 %v3274_v29  ;;  %v1173_v56 = vand.u32 2147483647, %v3222_v33 }
  0xfc   :  { %5947 = vst [vmem:[#allocation29_spill] sm:$0xff] %v3833_v0  ;;  %v3838_v36 = vpop.eup %2575  ;;  %2583 = vpow2.f32 %v2401_v35  ;;  %v2417_v63 = vmul.f32 -1.442695, %v3833_v0  ;;  %v1175_v34 = vand.u32 2147483648, %v3222_v33  ;;  %v1180_v44 = vmul.f32 %v3352_v46, %v3292_v39  ;;  %vm3862_vm11 = vmor %vm1169_vm6, %vm1170_vm7 }
  0xfd   :  { %v3844_v30 = vpop.eup %2577  ;;  %1955 = vst.msk [vmem:[%s5816_s4 + $0x198] sm:$0xff] %vm1903_vm4, %v1890_v27  ;;  %2134 = vrot.lane.b32.xlu0 %v1890_v27, %s2693_s0  ;;  %v1167_v62 = vmul.f32 %v3274_v29, %v1166_v19  ;;  %vm3852_vm8 = vcmp.eq.f32.partialorder %v1173_v56, 8.507059e+37  ;;  %vm1184_vm9 = vweird.f32 %v3292_v39  ;;  %vm1185_vm10 = vweird.f32 %v3352_v46  ;;  %v325_v56 = vpop.f32.mrf.mxu0 }
  0xfe   :  { %2585 = vpow2.f32 %v2417_v63  ;;  %v1176_v6 = vor.u32 1.1754944e-38, %v1175_v34  ;;  %v1181_v38 = vsub.f32 1.0, %v1180_v44  ;;  %v1188_v10 = vand.u32 2147483647, %v3292_v39  ;;  %vm3890_vm15 = vmor %vm1184_vm9, %vm1185_vm10  ;;  %v373_v63 = vpop.f32.mrf.mxu1 }
  0xff   :  { %v3867_v49 = vpop.eup %2579  ;;  %v1168_v14 = vadd.f32 %v3274_v29, %v1167_v62  ;;  %v1190_v7 = vand.u32 2147483648, %v3292_v39  ;;  %v1420_v47 = vmul.f32 %v3360_v28, %v3300_v8  ;;  %vm1424_vm12 = vweird.f32 %v3300_v8 }
 0x100   :  { %v2582_v33 = vpop.eup %2581  ;;  %v1182_v50 = vmul.f32 %v3352_v46, %v1181_v38  ;;  %vm3875_vm13 = vcmp.eq.f32.partialorder %v1188_v10, 8.507059e+37  ;;  %vm1425_vm14 = vweird.f32 %v3360_v28  ;;  %v1428_v26 = vand.u32 2147483647, %v3300_v8 }
 0x101   :  { %v3881_v59 = vadd.f32 1.0, %v2582_v33  ;;  %v1172_v2 = vsel %vm3862_vm11, %v3274_v29, %v1168_v14  ;;  %v1191_v27 = vor.u32 1.1754944e-38, %v1190_v7  ;;  %v1421_v19 = vsub.f32 1.0, %v1420_v47  ;;  %v421_v14 = vpop.f32.mrf.mxu2  ;;  %vm1426_vm1 = vmor %vm1424_vm12, %vm1425_vm14 }
 0x102   :  { %v2584_v34 = vpop.eup %2583  ;;  %v1177_v44 = vsel %vm3852_vm8, %v1176_v6, %v1172_v2  ;;  %v1183_v62 = vadd.f32 %v3352_v46, %v1182_v50  ;;  %vm3897_vm0 = vcmp.eq.f32.partialorder %v1428_v26, 8.507059e+37  ;;  %v1430_v39 = vand.u32 2147483648, %v3300_v8  ;;  %v5958_v26 = vld [vmem:[#allocation2_spill] sm:$0xff] }
 0x103   :  { %2587 = vrcp.f32 %v3881_v59  ;;  %v3903_v58 = vadd.f32 1.0, %v2584_v34  ;;  %v1858_v38 = vmul.f32 %v1177_v44, %v3093_v15  ;;  %v1422_v10 = vmul.f32 %v3360_v28, %v1421_v19 }
 0x104   :  { %v2586_v7 = vpop.eup %2585  ;;  %v1187_v25 = vsel %vm3890_vm15, %v3352_v46, %v1183_v62  ;;  %v1431_v6 = vor.u32 1.1754944e-38, %v1430_v39  ;;  %v501_v47 = vmul.f32 %v3698_v12, %v325_v56  ;;  %v517_v33 = vmul.f32 %v3698_v12, %v373_v63  ;;  %v5962_v63 = vld [vmem:[#allocation14_spill] sm:$0xff] }
 0x105   :  { %2589 = vrcp.f32 %v3903_v58  ;;  %v3913_v50 = vadd.f32 1.0, %v2586_v7  ;;  %1923 = vst.msk [vmem:[%s5816_s4 + $0x98] sm:$0xff] %vm1903_vm4, %v1858_v38  ;;  %2070 = vrot.lane.b32.xlu1 %v1858_v38, %s2693_s0  ;;  %v1192_v15 = vsel %vm3875_vm13, %v1191_v27, %v1187_v25  ;;  %v1423_v46 = vadd.f32 %v3360_v28, %v1422_v10  ;;  %v5961_v27 = vld [vmem:[#allocation9_spill] sm:$0xff]  ;;  %v5964_v38 = vld [vmem:[#allocation3_spill] sm:$0xff] }
 0x106   :  { %v1859_v2 = vmul.f32 %v1192_v15, %v5958_v26  ;;  %v3929_v35 = vadd.f32 %v3683_v42, %v501_v47  ;;  %v3932_v19 = vadd.f32 %v3683_v42, %v517_v33  ;;  %v533_v56 = vmul.f32 %v3698_v12, %v421_v14  ;;  %v5966_v47 = vld [vmem:[#allocation15_spill] sm:$0xff] }
 0x107   :  { %2591 = vrcp.f32 %v3913_v50  ;;  %v1427_v43 = vsel %vm1426_vm1, %v3360_v28, %v1423_v46  ;;  %v1660_v34 = vmul.f32 %v5962_v63, %v5961_v27  ;;  %vm1664_vm2 = vweird.f32 %v5961_v27 }
 0x108   :  { %5959 = vst [vmem:[#allocation2_spill] sm:$0xff] %v3929_v35  ;;  %2072 = vrot.lane.b32.xlu2 %v1859_v2, %s2693_s0  ;;  %v1432_v8 = vsel %vm3897_vm0, %v1431_v6, %v1427_v43  ;;  %v2370_v44 = vmul.f32 -1.442695, %v3929_v35  ;;  %v2386_v62 = vmul.f32 -1.442695, %v3932_v19  ;;  %v3950_v28 = vadd.f32 %v3683_v42, %v533_v56  ;;  %v5965_v6 = vld [vmem:[#allocation11_spill] sm:$0xff]  ;;  %v376_v35 = vpop.f32.mrf.mxu1 }
 0x109   :  { %5960 = vst [vmem:[#allocation30_spill] sm:$0xff] %v3932_v19  ;;  %v3952_v39 = vpop.eup %2587  ;;  %v1875_v10 = vmul.f32 %v1432_v8, %v5964_v38  ;;  %v1661_v14 = vsub.f32 1.0, %v1660_v34  ;;  %vm1665_vm3 = vweird.f32 %v5962_v63  ;;  %v1668_v7 = vand.u32 2147483647, %v5961_v27  ;;  %v5972_v38 = vld [vmem:[#allocation13_spill] sm:$0xff] }
 0x10a   :  { %1924 = vst.msk [vmem:[%s5816_s4 + $0xa0] sm:$0xff] %vm1903_vm4, %v1859_v2  ;;  %2593 = vpow2.f32 %v2370_v44  ;;  %v2402_v29 = vmul.f32 -1.442695, %v3950_v28  ;;  %v1670_v25 = vand.u32 2147483648, %v5961_v27  ;;  %v955_v33 = vmul.f32 %v5966_v47, %v5965_v6  ;;  %vm3976_vm7 = vmor %vm1664_vm2, %vm1665_vm3 }
 0x10b   :  { %5963 = vst [vmem:[#allocation9_spill] sm:$0xff] %v3950_v28  ;;  %v3961_v15 = vpop.eup %2589  ;;  %2104 = vrot.lane.b32.xlu0 %v1875_v10, %s2693_s0  ;;  %2595 = vpow2.f32 %v2386_v62  ;;  %v1662_v46 = vmul.f32 %v5962_v63, %v1661_v14  ;;  %vm3969_vm5 = vcmp.eq.f32.partialorder %v1668_v7, 8.507059e+37  ;;  %vm959_vm6 = vweird.f32 %v5965_v6 }
 0x10c   :  { %1940 = vst.msk [vmem:[%s5816_s4 + $0x120] sm:$0xff] %vm1903_vm4, %v1875_v10  ;;  %2597 = vpow2.f32 %v2402_v29  ;;  %v1671_v56 = vor.u32 1.1754944e-38, %v1670_v25  ;;  %v956_v43 = vsub.f32 1.0, %v955_v33  ;;  %vm960_vm8 = vweird.f32 %v5966_v47  ;;  %v5973_v10 = vld [vmem:[#allocation16_spill] sm:$0xff]  ;;  %v328_v29 = vpop.f32.mrf.mxu0 }
 0x10d   :  { %v3981_v34 = vpop.eup %2591  ;;  %v1663_v8 = vadd.f32 %v5962_v63, %v1662_v46  ;;  %v963_v44 = vand.u32 2147483647, %v5965_v6  ;;  %v965_v62 = vand.u32 2147483648, %v5965_v6  ;;  %v1195_v14 = vmul.f32 %v5973_v10, %v5972_v38  ;;  %vm3997_vm11 = vmor %vm959_vm6, %vm960_vm8 }
 0x10e   :  { %5971 = vst [vmem:[#allocation14_spill] sm:$0xff] %v3981_v34  ;;  %v957_v27 = vmul.f32 %v5966_v47, %v956_v43  ;;  %vm1199_vm9 = vweird.f32 %v5972_v38  ;;  %vm1200_vm10 = vweird.f32 %v5973_v10  ;;  %v1203_v7 = vand.u32 2147483647, %v5972_v38 }
 0x10f   :  { %v1667_v25 = vsel %vm3976_vm7, %v5962_v63, %v1663_v8  ;;  %vm4001_vm12 = vcmp.eq.f32.partialorder %v963_v44, 8.507059e+37  ;;  %v966_v43 = vor.u32 1.1754944e-38, %v965_v62  ;;  %v1196_v28 = vsub.f32 1.0, %v1195_v14  ;;  %vm4027_vm14 = vmor %vm1199_vm9, %vm1200_vm10 }
 0x110   :  { %v2594_v19 = vpop.eup %2593  ;;  %v1672_v0 = vsel %vm3969_vm5, %v1671_v56, %v1667_v25  ;;  %v958_v2 = vadd.f32 %v5966_v47, %v957_v27  ;;  %vm4008_vm13 = vcmp.eq.f32.partialorder %v1203_v7, 8.507059e+37  ;;  %v1205_v6 = vand.u32 2147483648, %v5972_v38 }
 0x111   :  { %v2596_v8 = vpop.eup %2595  ;;  %v4013_v44 = vadd.f32 1.0, %v2594_v19  ;;  %v1891_v40 = vmul.f32 %v1672_v0, %v5980_v61  ;;  %v1197_v62 = vmul.f32 %v5973_v10, %v1196_v28  ;;  %v502_v14 = vmul.f32 %v3698_v12, %v328_v29  ;;  %v469_v28 = vpop.f32.mrf.mxu3 }
 0x112   :  { %v2598_v34 = vpop.eup %2597  ;;  %v4018_v26 = vadd.f32 1.0, %v2596_v8  ;;  %v962_v56 = vsel %vm3997_vm11, %v5966_v47, %v958_v2  ;;  %v1206_v61 = vor.u32 1.1754944e-38, %v1205_v6  ;;  %v518_v0 = vmul.f32 %v3698_v12, %v376_v35  ;;  %v5983_v35 = vld [vmem:[#allocation5_spill] sm:$0xff] }
 0x113   :  { %2599 = vrcp.f32 %v4013_v44  ;;  %v4033_v27 = vadd.f32 1.0, %v2598_v34  ;;  %1956 = vst.msk [vmem:[%s5816_s4 + $0x1a0] sm:$0xff] %vm1903_vm4, %v1891_v40  ;;  %2136 = vrot.lane.b32.xlu1 %v1891_v40, %s2693_s0  ;;  %v967_v47 = vsel %vm4001_vm12, %v966_v43, %v962_v56  ;;  %v1198_v38 = vadd.f32 %v5973_v10, %v1197_v62 }
 0x114   :  { %2601 = vrcp.f32 %v4018_v26  ;;  %v1844_v7 = vmul.f32 %v967_v47, %v5983_v35  ;;  %v4046_v29 = vadd.f32 %v3683_v42, %v502_v14  ;;  %v4049_v34 = vadd.f32 %v3683_v42, %v518_v0  ;;  %v424_v47 = vpop.f32.mrf.mxu2 }
 0x115   :  { %2603 = vrcp.f32 %v4033_v27  ;;  %v1202_v40 = vsel %vm4027_vm14, %v5973_v10, %v1198_v38  ;;  %v549_v25 = vmul.f32 %v3698_v12, %v469_v28  ;;  %v1435_v33 = vmul.f32 %v3455_v17, %v3383_v20  ;;  %v5986_v10 = vld [vmem:[#allocation6_spill] sm:$0xff] }
 0x116   :  { %5984 = vst [vmem:[#allocation3_spill] sm:$0xff] %v4046_v29  ;;  %2042 = vrot.lane.b32.xlu2 %v1844_v7, %s2693_s0  ;;  %v1207_v46 = vsel %vm4008_vm13, %v1206_v61, %v1202_v40  ;;  %v2371_v43 = vmul.f32 -1.442695, %v4046_v29  ;;  %v2387_v2 = vmul.f32 -1.442695, %v4049_v34  ;;  %vm1439_vm15 = vweird.f32 %v3383_v20 }
 0x117   :  { %5985 = vst [vmem:[#allocation11_spill] sm:$0xff] %v4049_v34  ;;  %v1860_v6 = vmul.f32 %v1207_v46, %v5986_v10  ;;  %v4070_v8 = vadd.f32 %v3683_v42, %v549_v25  ;;  %v1436_v62 = vsub.f32 1.0, %v1435_v33  ;;  %vm1440_vm0 = vweird.f32 %v3455_v17 }
 0x118   :  { %1909 = vst.msk [vmem:[%s5816_s4 + $0x28] sm:$0xff] %vm1903_vm4, %v1844_v7  ;;  %2605 = vpow2.f32 %v2371_v43  ;;  %v1443_v14 = vand.u32 2147483647, %v3383_v20  ;;  %v1445_v63 = vand.u32 2147483648, %v3383_v20  ;;  %v1675_v56 = vmul.f32 %v3480_v55, %v3410_v4  ;;  %vm4091_vm2 = vmor %vm1439_vm15, %vm1440_vm0 }
 0x119   :  { %5987 = vst [vmem:[#allocation15_spill] sm:$0xff] %v4070_v8  ;;  %v4077_v19 = vpop.eup %2599  ;;  %2074 = vrot.lane.b32.xlu0 %v1860_v6, %s2693_s0  ;;  %2607 = vpow2.f32 %v2387_v2  ;;  %v2418_v61 = vmul.f32 -1.442695, %v4070_v8  ;;  %v1437_v0 = vmul.f32 %v3455_v17, %v1436_v62  ;;  %vm1679_vm1 = vweird.f32 %v3410_v4  ;;  %v331_v2 = vpop.f32.mrf.mxu0 }
 0x11a   :  { %1925 = vst.msk [vmem:[%s5816_s4 + $0xa8] sm:$0xff] %vm1903_vm4, %v1860_v6  ;;  %v4087_v28 = vpop.eup %2601  ;;  %vm4095_vm3 = vcmp.eq.f32.partialorder %v1443_v14, 8.507059e+37  ;;  %v1446_v35 = vor.u32 1.1754944e-38, %v1445_v63  ;;  %v1676_v7 = vsub.f32 1.0, %v1675_v56  ;;  %vm1680_vm5 = vweird.f32 %v3480_v55 }
 0x11b   :  { %v4100_v40 = vpop.eup %2603  ;;  %2609 = vpow2.f32 %v2418_v61  ;;  %v1438_v25 = vadd.f32 %v3455_v17, %v1437_v0  ;;  %v1683_v33 = vand.u32 2147483647, %v3410_v4  ;;  %v1685_v20 = vand.u32 2147483648, %v3410_v4  ;;  %vm4115_vm8 = vmor %vm1679_vm1, %vm1680_vm5 }
 0x11c   :  { %v1677_v46 = vmul.f32 %v3480_v55, %v1676_v7  ;;  %v970_v43 = vmul.f32 %v3486_v57, %v3420_v53  ;;  %vm974_vm6 = vweird.f32 %v3420_v53  ;;  %vm975_vm7 = vweird.f32 %v3486_v57 }
 0x11d   :  { %v1442_v10 = vsel %vm4091_vm2, %v3455_v17, %v1438_v25  ;;  %vm4119_vm9 = vcmp.eq.f32.partialorder %v1683_v33, 8.507059e+37  ;;  %v1686_v14 = vor.u32 1.1754944e-38, %v1685_v20  ;;  %v978_v63 = vand.u32 2147483647, %v3420_v53  ;;  %v5996_v33 = vld [vmem:[#allocation7_spill] sm:$0xff]  ;;  %vm4154_vm11 = vmor %vm974_vm6, %vm975_vm7 }
 0x11e   :  { %v2606_v56 = vpop.eup %2605  ;;  %v1447_v61 = vsel %vm4095_vm3, %v1446_v35, %v1442_v10  ;;  %v1678_v0 = vadd.f32 %v3480_v55, %v1677_v46  ;;  %v971_v17 = vsub.f32 1.0, %v970_v43  ;;  %v980_v4 = vand.u32 2147483648, %v3420_v53  ;;  %v472_v43 = vpop.f32.mrf.mxu3 }
 0x11f   :  { %v2608_v7 = vpop.eup %2607  ;;  %v4128_v25 = vadd.f32 1.0, %v2606_v56  ;;  %v1876_v34 = vmul.f32 %v1447_v61, %v5996_v33  ;;  %vm4131_vm10 = vcmp.eq.f32.partialorder %v978_v63, 8.507059e+37  ;;  %v503_v20 = vmul.f32 %v3698_v12, %v331_v2 }
 0x120   :  { %v4136_v8 = vadd.f32 1.0, %v2608_v7  ;;  %v1682_v38 = vsel %vm4115_vm8, %v3480_v55, %v1678_v0  ;;  %v972_v35 = vmul.f32 %v3486_v57, %v971_v17  ;;  %v981_v46 = vor.u32 1.1754944e-38, %v980_v4 }
 0x121   :  { %v2610_v10 = vpop.eup %2609  ;;  %2611 = vrcp.f32 %v4128_v25  ;;  %1941 = vst.msk [vmem:[%s5816_s4 + $0x128] sm:$0xff] %vm1903_vm4, %v1876_v34  ;;  %2106 = vrot.lane.b32.xlu1 %v1876_v34, %s2693_s0  ;;  %v1687_v2 = vsel %vm4119_vm9, %v1686_v14, %v1682_v38  ;;  %v4159_v6 = vadd.f32 %v3683_v42, %v503_v20  ;;  %v534_v63 = vmul.f32 %v3698_v12, %v424_v47  ;;  %v6002_v34 = vld [vmem:[#allocation8_spill] sm:$0xff]  ;;  %v6005_v20 = vld [vmem:[#allocation10_spill] sm:$0xff] }
 0x122   :  { %2613 = vrcp.f32 %v4136_v8  ;;  %v4163_v56 = vadd.f32 1.0, %v2610_v10  ;;  %v1892_v62 = vmul.f32 %v1687_v2, %v6002_v34  ;;  %v973_v14 = vadd.f32 %v3486_v57, %v972_v35 }
 0x123   :  { %6001 = vst [vmem:[#allocation13_spill] sm:$0xff] %v4159_v6  ;;  %v2372_v61 = vmul.f32 -1.442695, %v4159_v6  ;;  %v4169_v53 = vadd.f32 %v3683_v42, %v534_v63  ;;  %v550_v0 = vmul.f32 %v3698_v12, %v472_v43  ;;  %v1210_v17 = vmul.f32 %v3490_v24, %v3426_v45 }
 0x124   :  { %2615 = vrcp.f32 %v4163_v56  ;;  %1957 = vst.msk [vmem:[%s5816_s4 + $0x1a8] sm:$0xff] %vm1903_vm4, %v1892_v62  ;;  %2138 = vrot.lane.b32.xlu2 %v1892_v62, %s2693_s0  ;;  %v977_v4 = vsel %vm4154_vm11, %v3486_v57, %v973_v14  ;;  %vm1214_vm12 = vweird.f32 %v3426_v45  ;;  %vm1215_vm13 = vweird.f32 %v3490_v24 }
 0x125   :  { %6003 = vst [vmem:[#allocation16_spill] sm:$0xff] %v4169_v53  ;;  %v982_v47 = vsel %vm4131_vm10, %v981_v46, %v977_v4  ;;  %2617 = vpow2.f32 %v2372_v61  ;;  %v2403_v7 = vmul.f32 -1.442695, %v4169_v53  ;;  %v4189_v33 = vadd.f32 %v3683_v42, %v550_v0  ;;  %vm4217_vm1 = vmor %vm1214_vm12, %vm1215_vm13 }
 0x126   :  { %v1845_v38 = vmul.f32 %v982_v47, %v6005_v20  ;;  %v1211_v35 = vsub.f32 1.0, %v1210_v17  ;;  %v1218_v43 = vand.u32 2147483647, %v3426_v45  ;;  %v1220_v57 = vand.u32 2147483648, %v3426_v45  ;;  %v379_v45 = vpop.f32.mrf.mxu1  ;;  %v475_v53 = vpop.f32.mrf.mxu3 }
 0x127   :  { %6004 = vst [vmem:[#allocation4_spill] sm:$0xff] %v4189_v33  ;;  %v4194_v10 = vpop.eup %2611  ;;  %2619 = vpow2.f32 %v2403_v7  ;;  %v2419_v2 = vmul.f32 -1.442695, %v4189_v33  ;;  %v1450_v29 = vmul.f32 %v3573_v32, %v3512_v48  ;;  %vm1454_vm14 = vweird.f32 %v3512_v48 }
 0x128   :  { %v4200_v46 = vpop.eup %2613  ;;  %2044 = vrot.lane.b32.xlu0 %v1845_v38, %s2693_s0  ;;  %1910 = vst.msk [vmem:[%s5816_s4 + $0x30] sm:$0xff] %vm1903_vm4, %v1845_v38  ;;  %v1212_v55 = vmul.f32 %v3490_v24, %v1211_v35  ;;  %vm4208_vm15 = vcmp.eq.f32.partialorder %v1218_v43, 8.507059e+37  ;;  %v1221_v34 = vor.u32 1.1754944e-38, %v1220_v57  ;;  %vm1455_vm0 = vweird.f32 %v3573_v32 }
 0x129   :  { %6006 = vst [vmem:[#allocation5_spill] sm:$0xff] %v4200_v46  ;;  %2621 = vpow2.f32 %v2419_v2  ;;  %v1451_v14 = vsub.f32 1.0, %v1450_v29  ;;  %v1458_v61 = vand.u32 2147483647, %v3512_v48  ;;  %v1460_v0 = vand.u32 2147483648, %v3512_v48  ;;  %vm4245_vm6 = vmor %vm1454_vm14, %vm1455_vm0 }
 0x12a   :  { %v4223_v17 = vpop.eup %2615  ;;  %v1213_v4 = vadd.f32 %v3490_v24, %v1212_v55  ;;  %v1690_v47 = vmul.f32 %v3590_v13, %v3528_v11  ;;  %vm1694_vm2 = vweird.f32 %v3528_v11  ;;  %vm1695_vm3 = vweird.f32 %v3590_v13 }
 0x12b   :  { %v2618_v7 = vpop.eup %2617  ;;  %v1452_v20 = vmul.f32 %v3573_v32, %v1451_v14  ;;  %vm4231_vm5 = vcmp.eq.f32.partialorder %v1458_v61, 8.507059e+37  ;;  %v1461_v35 = vor.u32 1.1754944e-38, %v1460_v0  ;;  %v1698_v43 = vand.u32 2147483647, %v3528_v11  ;;  %v427_v61 = vpop.f32.mrf.mxu2  ;;  %vm4270_vm8 = vmor %vm1694_vm2, %vm1695_vm3 }
 0x12c   :  { %v4236_v57 = vadd.f32 1.0, %v2618_v7  ;;  %v1217_v2 = vsel %vm4217_vm1, %v3490_v24, %v1213_v4  ;;  %v1691_v55 = vsub.f32 1.0, %v1690_v47  ;;  %v1700_v14 = vand.u32 2147483648, %v3528_v11  ;;  %v6017_v4 = vld [vmem:[#allocation12_spill] sm:$0xff] }
 0x12d   :  { %v2620_v0 = vpop.eup %2619  ;;  %v1222_v7 = vsel %vm4208_vm15, %v1221_v34, %v1217_v2  ;;  %v1453_v6 = vadd.f32 %v3573_v32, %v1452_v20  ;;  %vm4253_vm7 = vcmp.eq.f32.partialorder %v1698_v43, 8.507059e+37  ;;  %v519_v48 = vmul.f32 %v3698_v12, %v379_v45 }
 0x12e   :  { %2623 = vrcp.f32 %v4236_v57  ;;  %v4259_v62 = vadd.f32 1.0, %v2620_v0  ;;  %v1861_v47 = vmul.f32 %v1222_v7, %v6017_v4  ;;  %v1692_v33 = vmul.f32 %v3590_v13, %v1691_v55 }
 0x12f   :  { %v2622_v46 = vpop.eup %2621  ;;  %v1457_v63 = vsel %vm4245_vm6, %v3573_v32, %v1453_v6  ;;  %v1701_v45 = vor.u32 1.1754944e-38, %v1700_v14  ;;  %v4275_v20 = vadd.f32 %v3683_v42, %v519_v48  ;;  %v535_v43 = vmul.f32 %v3698_v12, %v427_v61 }
 0x130   :  { %2625 = vrcp.f32 %v4259_v62  ;;  %v4279_v2 = vadd.f32 1.0, %v2622_v46  ;;  %1926 = vst.msk [vmem:[%s5816_s4 + $0xb0] sm:$0xff] %vm1903_vm4, %v1861_v47  ;;  %2076 = vrot.lane.b32.xlu1 %v1861_v47, %s2693_s0  ;;  %v1462_v11 = vsel %vm4231_vm5, %v1461_v35, %v1457_v63  ;;  %v1693_v32 = vadd.f32 %v3590_v13, %v1692_v33 }
 0x131   :  { %v1877_v6 = vmul.f32 %v1462_v11, %v3439_v16  ;;  %v2388_v29 = vmul.f32 -1.442695, %v4275_v20  ;;  %v4292_v55 = vadd.f32 %v3683_v42, %v535_v43  ;;  %v551_v46 = vmul.f32 %v3698_v12, %v475_v53 }
 0x132   :  { %2627 = vrcp.f32 %v4279_v2  ;;  %v1697_v14 = vsel %vm4270_vm8, %v3590_v13, %v1693_v32  ;;  %v1225_v38 = vmul.f32 %v3609_v41, %v3549_v51  ;;  %vm1229_vm9 = vweird.f32 %v3549_v51 }
 0x133   :  { %1942 = vst.msk [vmem:[%s5816_s4 + $0x130] sm:$0xff] %vm1903_vm4, %v1877_v6  ;;  %2108 = vrot.lane.b32.xlu2 %v1877_v6, %s2693_s0  ;;  %v1702_v16 = vsel %vm4253_vm7, %v1701_v45, %v1697_v14  ;;  %2629 = vpow2.f32 %v2388_v29  ;;  %v2404_v53 = vmul.f32 -1.442695, %v4292_v55  ;;  %v4311_v13 = vadd.f32 %v3683_v42, %v551_v46 }
 0x134   :  { %v4313_v33 = vpop.eup %2623  ;;  %v1893_v35 = vmul.f32 %v1702_v16, %v3459_v37  ;;  %v1226_v61 = vsub.f32 1.0, %v1225_v38  ;;  %vm1230_vm10 = vweird.f32 %v3609_v41  ;;  %v1233_v0 = vand.u32 2147483647, %v3549_v51 }
 0x135   :  { %6020 = vst [vmem:[#allocation6_spill] sm:$0xff] %v4311_v13  ;;  %2631 = vpow2.f32 %v2404_v53  ;;  %v2420_v7 = vmul.f32 -1.442695, %v4311_v13  ;;  %v1235_v24 = vand.u32 2147483648, %v3549_v51  ;;  %v985_v48 = vmul.f32 %v3601_v22, %v3537_v52  ;;  %vm4338_vm14 = vmor %vm1229_vm9, %vm1230_vm10 }
 0x136   :  { %v4322_v4 = vpop.eup %2625  ;;  %1958 = vst.msk [vmem:[%s5816_s4 + $0x1b0] sm:$0xff] %vm1903_vm4, %v1893_v35  ;;  %2140 = vrot.lane.b32.xlu0 %v1893_v35, %s2693_s0  ;;  %v1227_v37 = vmul.f32 %v3609_v41, %v1226_v61  ;;  %vm4330_vm11 = vcmp.eq.f32.partialorder %v1233_v0, 8.507059e+37  ;;  %vm989_vm12 = vweird.f32 %v3537_v52  ;;  %vm990_vm13 = vweird.f32 %v3601_v22  ;;  %v6034_v35 = vld [vmem:[#allocation17_spill] sm:$0xff] }
 0x137   :  { %2633 = vpow2.f32 %v2420_v7  ;;  %v1236_v34 = vor.u32 1.1754944e-38, %v1235_v24  ;;  %v986_v45 = vsub.f32 1.0, %v985_v48  ;;  %v993_v43 = vand.u32 2147483647, %v3537_v52  ;;  %vm4366_vm2 = vmor %vm989_vm12, %vm990_vm13  ;;  %v334_v7 = vpop.f32.mrf.mxu0  ;;  %v382_v24 = vpop.f32.mrf.mxu1 }
 0x138   :  { %v4343_v11 = vpop.eup %2627  ;;  %v1228_v32 = vadd.f32 %v3609_v41, %v1227_v37  ;;  %v995_v6 = vand.u32 2147483648, %v3537_v52  ;;  %v1465_v29 = vmul.f32 %v3701_v23, %v3621_v21  ;;  %vm1469_vm15 = vweird.f32 %v3621_v21 }
 0x139   :  { %v2630_v51 = vpop.eup %2629  ;;  %v987_v46 = vmul.f32 %v3601_v22, %v986_v45  ;;  %vm4351_vm0 = vcmp.eq.f32.partialorder %v993_v43, 8.507059e+37  ;;  %vm1470_vm1 = vweird.f32 %v3701_v23  ;;  %v1473_v38 = vand.u32 2147483647, %v3621_v21  ;;  %v6031_v43 = vld [vmem:[#allocation18_spill] sm:$0xff] }
 0x13a   :  { %v4357_v16 = vadd.f32 1.0, %v2630_v51  ;;  %v1232_v53 = vsel %vm4338_vm14, %v3609_v41, %v1228_v32  ;;  %v996_v61 = vor.u32 1.1754944e-38, %v995_v6  ;;  %v1466_v0 = vsub.f32 1.0, %v1465_v29  ;;  %v430_v29 = vpop.f32.mrf.mxu2  ;;  %vm4390_vm5 = vmor %vm1469_vm15, %vm1470_vm1 }
 0x13b   :  { %v2632_v48 = vpop.eup %2631  ;;  %v1237_v37 = vsel %vm4330_vm11, %v1236_v34, %v1232_v53  ;;  %v988_v45 = vadd.f32 %v3601_v22, %v987_v46  ;;  %vm4373_vm3 = vcmp.eq.f32.partialorder %v1473_v38, 8.507059e+37  ;;  %v1475_v52 = vand.u32 2147483648, %v3621_v21 }
 0x13c   :  { %2635 = vrcp.f32 %v4357_v16  ;;  %v4379_v63 = vadd.f32 1.0, %v2632_v48  ;;  %v1862_v32 = vmul.f32 %v1237_v37, %v6031_v43  ;;  %v1467_v6 = vmul.f32 %v3701_v23, %v1466_v0 }
 0x13d   :  { %v2634_v51 = vpop.eup %2633  ;;  %v992_v47 = vsel %vm4366_vm2, %v3601_v22, %v988_v45  ;;  %v1476_v46 = vor.u32 1.1754944e-38, %v1475_v52  ;;  %v504_v38 = vmul.f32 %v3698_v12, %v334_v7  ;;  %v520_v53 = vmul.f32 %v3698_v12, %v382_v24  ;;  %v2097_v45 = vpop.permute.xlu2 %2096 }
 0x13e   :  { %2637 = vrcp.f32 %v4379_v63  ;;  %v4397_v0 = vadd.f32 1.0, %v2634_v51  ;;  %1927 = vst.msk [vmem:[%s5816_s4 + $0xb8] sm:$0xff] %vm1903_vm4, %v1862_v32  ;;  %2078 = vrot.lane.b32.xlu2 %v1862_v32, %s2693_s0  ;;  %v997_v22 = vsel %vm4351_vm0, %v996_v61, %v992_v47  ;;  %v1468_v21 = vadd.f32 %v3701_v23, %v1467_v6 }
 0x13f   :  { %v1846_v7 = vmul.f32 %v997_v22, %v6034_v35  ;;  %v4409_v24 = vadd.f32 %v3683_v42, %v504_v38  ;;  %v4412_v48 = vadd.f32 %v3683_v42, %v520_v53  ;;  %v536_v37 = vmul.f32 %v3698_v12, %v430_v29  ;;  %2256 = vst.msk [vmem:[%s5817_s5 + $0x100] sm:$0xff] %vm1903_vm4, %v2097_v45 }
 0x140   :  { %2639 = vrcp.f32 %v4397_v0  ;;  %v1472_v14 = vsel %vm4390_vm5, %v3701_v23, %v1468_v21  ;;  %v1705_v61 = vmul.f32 %v3722_v54, %v3636_v31  ;;  %vm1709_vm6 = vweird.f32 %v3636_v31 }
 0x141   :  { %6035 = vst [vmem:[#allocation7_spill] sm:$0xff] %v4409_v24  ;;  %2046 = vrot.lane.b32.xlu1 %v1846_v7, %s2693_s0  ;;  %v1477_v23 = vsel %vm4373_vm3, %v1476_v46, %v1472_v14  ;;  %v2373_v52 = vmul.f32 -1.442695, %v4409_v24  ;;  %v2389_v43 = vmul.f32 -1.442695, %v4412_v48  ;;  %v4436_v32 = vadd.f32 %v3683_v42, %v536_v37  ;;  %v6042_v14 = vld [vmem:[#allocation22_spill] sm:$0xff] }
 0x142   :  { %6036 = vst [vmem:[#allocation8_spill] sm:$0xff] %v4412_v48  ;;  %v4438_v6 = vpop.eup %2635  ;;  %v1878_v29 = vmul.f32 %v1477_v23, %v3546_v9  ;;  %v1706_v51 = vsub.f32 1.0, %v1705_v61  ;;  %vm1710_vm7 = vweird.f32 %v3722_v54  ;;  %v1713_v47 = vand.u32 2147483647, %v3636_v31  ;;  %v6043_v61 = vld [vmem:[#allocation26_spill] sm:$0xff] }
 0x143   :  { %1911 = vst.msk [vmem:[%s5816_s4 + $0x38] sm:$0xff] %vm1903_vm4, %v1846_v7  ;;  %2641 = vpow2.f32 %v2373_v52  ;;  %v2405_v41 = vmul.f32 -1.442695, %v4436_v32  ;;  %v1715_v34 = vand.u32 2147483648, %v3636_v31  ;;  %v1000_v46 = vmul.f32 %v3733_v5, %v3649_v18  ;;  %vm4462_vm10 = vmor %vm1709_vm6, %vm1710_vm7 }
 0x144   :  { %6037 = vst [vmem:[#allocation10_spill] sm:$0xff] %v4436_v32  ;;  %v4447_v38 = vpop.eup %2637  ;;  %2110 = vrot.lane.b32.xlu0 %v1878_v29, %s2693_s0  ;;  %2643 = vpow2.f32 %v2389_v43  ;;  %v1707_v9 = vmul.f32 %v3722_v54, %v1706_v51  ;;  %vm4455_vm8 = vcmp.eq.f32.partialorder %v1713_v47, 8.507059e+37  ;;  %vm1004_vm9 = vweird.f32 %v3649_v18  ;;  %v337_v43 = vpop.f32.mrf.mxu0  ;;  %v6050_v32 = vld [vmem:[#allocation19_spill] sm:$0xff] }
 0x145   :  { %1943 = vst.msk [vmem:[%s5816_s4 + $0x138] sm:$0xff] %vm1903_vm4, %v1878_v29  ;;  %2645 = vpow2.f32 %v2405_v41  ;;  %v1716_v22 = vor.u32 1.1754944e-38, %v1715_v34  ;;  %v1001_v21 = vsub.f32 1.0, %v1000_v46  ;;  %vm1005_vm11 = vweird.f32 %v3733_v5  ;;  %v385_v46 = vpop.f32.mrf.mxu1 }
 0x146   :  { %v4467_v35 = vpop.eup %2639  ;;  %v1708_v7 = vadd.f32 %v3722_v54, %v1707_v9  ;;  %v1008_v37 = vand.u32 2147483647, %v3649_v18  ;;  %v1010_v45 = vand.u32 2147483648, %v3649_v18  ;;  %v1240_v23 = vmul.f32 %v6043_v61, %v6042_v14  ;;  %vm4483_vm14 = vmor %vm1004_vm9, %vm1005_vm11 }
 0x147   :  { %v1002_v31 = vmul.f32 %v3733_v5, %v1001_v21  ;;  %vm1244_vm12 = vweird.f32 %v6042_v14  ;;  %vm1245_vm13 = vweird.f32 %v6043_v61  ;;  %v1248_v52 = vand.u32 2147483647, %v6042_v14 }
 0x148   :  { %v1712_v29 = vsel %vm4462_vm10, %v3722_v54, %v1708_v7  ;;  %vm4487_vm15 = vcmp.eq.f32.partialorder %v1008_v37, 8.507059e+37  ;;  %v1011_v41 = vor.u32 1.1754944e-38, %v1010_v45  ;;  %v1241_v34 = vsub.f32 1.0, %v1240_v23  ;;  %vm4513_vm1 = vmor %vm1244_vm12, %vm1245_vm13 }
 0x149   :  { %v2642_v9 = vpop.eup %2641  ;;  %v1717_v21 = vsel %vm4455_vm8, %v1716_v22, %v1712_v29  ;;  %v1003_v53 = vadd.f32 %v3733_v5, %v1002_v31  ;;  %vm4494_vm0 = vcmp.eq.f32.partialorder %v1248_v52, 8.507059e+37  ;;  %v1250_v18 = vand.u32 2147483648, %v6042_v14  ;;  %v478_v29 = vpop.f32.mrf.mxu3 }
 0x14a   :  { %v2644_v7 = vpop.eup %2643  ;;  %v4499_v37 = vadd.f32 1.0, %v2642_v9  ;;  %v1894_v24 = vmul.f32 %v1717_v21, %v6050_v32  ;;  %v1242_v45 = vmul.f32 %v6043_v61, %v1241_v34  ;;  %v505_v23 = vmul.f32 %v3698_v12, %v337_v43  ;;  %v4520_v12 = vld [vmem:[%s5814_s2] ss:$0 sm:$0xff]  ;;  %v433_v43 = vpop.f32.mrf.mxu2  ;;  %v6053_v34 = vld [vmem:[#allocation20_spill] sm:$0xff] }
 0x14b   :  { %v2646_v48 = vpop.eup %2645  ;;  %v4504_v42 = vadd.f32 1.0, %v2644_v7  ;;  %v1007_v22 = vsel %vm4483_vm14, %v3733_v5, %v1003_v53  ;;  %v1251_v32 = vor.u32 1.1754944e-38, %v1250_v18  ;;  %v521_v52 = vmul.f32 %v4520_v12, %v385_v46  ;;  %v2067_v53 = vpop.permute.xlu2 %2066 }
 0x14c   :  { %2647 = vrcp.f32 %v4499_v37  ;;  %v4524_v5 = vadd.f32 1.0, %v2646_v48  ;;  %1959 = vst.msk [vmem:[%s5816_s4 + $0x1b8] sm:$0xff] %vm1903_vm4, %v1894_v24  ;;  %2142 = vrot.lane.b32.xlu1 %v1894_v24, %s2693_s0  ;;  %v1012_v14 = vsel %vm4487_vm15, %v1011_v41, %v1007_v22  ;;  %v1243_v51 = vadd.f32 %v6043_v61, %v1242_v45  ;;  %v4539_v48 = vld [vmem:[%s5815_s3] ss:$0 sm:$0xff] }
 0x14d   :  { %2649 = vrcp.f32 %v4504_v42  ;;  %v1847_v46 = vmul.f32 %v1012_v14, %v6053_v34  ;;  %v4542_v9 = vadd.f32 %v4539_v48, %v505_v23  ;;  %v4545_v21 = vadd.f32 %v4539_v48, %v521_v52  ;;  %v6056_v23 = vld [vmem:[#allocation21_spill] sm:$0xff]  ;;  %2241 = vst.msk [vmem:[%s5817_s5 + $0x88] sm:$0xff] %vm1903_vm4, %v2067_v53 }
 0x14e   :  { %2651 = vrcp.f32 %v4524_v5  ;;  %v1247_v24 = vsel %vm4513_vm1, %v6043_v61, %v1243_v51  ;;  %v537_v47 = vmul.f32 %v4520_v12, %v433_v43  ;;  %v552_v41 = vmul.f32 %v4520_v12, %v478_v29 }
 0x14f   :  { %6054 = vst [vmem:[#allocation12_spill] sm:$0xff] %v4542_v9  ;;  %2048 = vrot.lane.b32.xlu2 %v1847_v46, %s2693_s0  ;;  %v1252_v18 = vsel %vm4494_vm0, %v1251_v32, %v1247_v24  ;;  %v2374_v7 = vmul.f32 -1.442695, %v4542_v9  ;;  %v2390_v45 = vmul.f32 -1.442695, %v4545_v21  ;;  %v1480_v61 = vmul.f32 %v3838_v36, %v3777_v1 }
 0x150   :  { %6055 = vst [vmem:[#allocation18_spill] sm:$0xff] %v4545_v21  ;;  %v1863_v22 = vmul.f32 %v1252_v18, %v6056_v23  ;;  %v4566_v31 = vadd.f32 %v4539_v48, %v537_v47  ;;  %v4569_v52 = vadd.f32 %v4539_v48, %v552_v41  ;;  %vm1484_vm2 = vweird.f32 %v3777_v1 }
 0x151   :  { %1912 = vst.msk [vmem:[%s5816_s4 + $0x40] sm:$0xff] %vm1903_vm4, %v1847_v46  ;;  %2653 = vpow2.f32 %v2374_v7  ;;  %v1481_v54 = vsub.f32 1.0, %v1480_v61  ;;  %vm1485_vm3 = vweird.f32 %v3838_v36  ;;  %v1488_v32 = vand.u32 2147483647, %v3777_v1 }
 0x152   :  { %6057 = vst [vmem:[#allocation17_spill] sm:$0xff] %v4566_v31  ;;  %v4578_v43 = vpop.eup %2647  ;;  %2080 = vrot.lane.b32.xlu0 %v1863_v22, %s2693_s0  ;;  %2655 = vpow2.f32 %v2390_v45  ;;  %v2406_v29 = vmul.f32 -1.442695, %v4566_v31  ;;  %v2421_v14 = vmul.f32 -1.442695, %v4569_v52  ;;  %v1490_v51 = vand.u32 2147483648, %v3777_v1  ;;  %vm4604_vm7 = vmor %vm1484_vm2, %vm1485_vm3  ;;  %v481_v31 = vpop.f32.mrf.mxu3 }
 0x153   :  { %6058 = vst [vmem:[#allocation22_spill] sm:$0xff] %v4569_v52  ;;  %v4588_v34 = vpop.eup %2649  ;;  %v1482_v46 = vmul.f32 %v3838_v36, %v1481_v54  ;;  %vm4591_vm5 = vcmp.eq.f32.partialorder %v1488_v32, 8.507059e+37  ;;  %v1720_v47 = vmul.f32 %v3844_v30, %v3786_v60  ;;  %vm1724_vm6 = vweird.f32 %v3786_v60  ;;  %v2133_v13 = vpop.permute.xlu2 %2132 }
 0x154   :  { %1928 = vst.msk [vmem:[%s5816_s4 + $0xc0] sm:$0xff] %vm1903_vm4, %v1863_v22  ;;  %v4598_v41 = vpop.eup %2651  ;;  %2657 = vpow2.f32 %v2406_v29  ;;  %v1491_v18 = vor.u32 1.1754944e-38, %v1490_v51  ;;  %vm1725_vm8 = vweird.f32 %v3844_v30  ;;  %v1728_v7 = vand.u32 2147483647, %v3786_v60 }
 0x155   :  { %2659 = vpow2.f32 %v2421_v14  ;;  %v1483_v45 = vadd.f32 %v3838_v36, %v1482_v46  ;;  %v1721_v61 = vsub.f32 1.0, %v1720_v47  ;;  %v1730_v23 = vand.u32 2147483648, %v3786_v60  ;;  %v340_v46 = vpop.f32.mrf.mxu0  ;;  %vm4633_vm12 = vmor %vm1724_vm6, %vm1725_vm8  ;;  %2274 = vst.msk [vmem:[%s5817_s5 + $0x190] sm:$0xff] %vm1903_vm4, %v2133_v13 }
 0x156   :  { %vm4612_vm9 = vcmp.eq.f32.partialorder %v1728_v7, 8.507059e+37  ;;  %v1015_v1 = vmul.f32 %v3867_v49, %v3799_v3  ;;  %vm1019_vm10 = vweird.f32 %v3799_v3  ;;  %vm1020_vm11 = vweird.f32 %v3867_v49 }
 0x157   :  { %v2654_v54 = vpop.eup %2653  ;;  %v1487_v32 = vsel %vm4604_vm7, %v3838_v36, %v1483_v45  ;;  %v1722_v29 = vmul.f32 %v3844_v30, %v1721_v61  ;;  %v1731_v14 = vor.u32 1.1754944e-38, %v1730_v23  ;;  %v1023_v51 = vand.u32 2147483647, %v3799_v3  ;;  %v388_v45 = vpop.f32.mrf.mxu1  ;;  %v6067_v23 = vld [vmem:[#allocation23_spill] sm:$0xff]  ;;  %vm4664_vm14 = vmor %vm1019_vm10, %vm1020_vm11 }
 0x158   :  { %v2656_v47 = vpop.eup %2655  ;;  %v4625_v7 = vadd.f32 1.0, %v2654_v54  ;;  %v1492_v52 = vsel %vm4591_vm5, %v1491_v18, %v1487_v32  ;;  %v1016_v36 = vsub.f32 1.0, %v1015_v1  ;;  %v1025_v53 = vand.u32 2147483648, %v3799_v3  ;;  %v6074_v3 = vld [vmem:[#allocation24_spill] sm:$0xff] }
 0x159   :  { %v4638_v61 = vadd.f32 1.0, %v2656_v47  ;;  %v1879_v54 = vmul.f32 %v1492_v52, %v6067_v23  ;;  %v1723_v9 = vadd.f32 %v3844_v30, %v1722_v29  ;;  %vm4642_vm13 = vcmp.eq.f32.partialorder %v1023_v51, 8.507059e+37 }
 0x15a   :  { %v2658_v18 = vpop.eup %2657  ;;  %2661 = vrcp.f32 %v4625_v7  ;;  %v1017_v60 = vmul.f32 %v3867_v49, %v1016_v36  ;;  %v1026_v32 = vor.u32 1.1754944e-38, %v1025_v53  ;;  %v506_v1 = vmul.f32 %v4520_v12, %v340_v46 }
 0x15b   :  { %v2660_v47 = vpop.eup %2659  ;;  %2663 = vrcp.f32 %v4638_v61  ;;  %v4650_v52 = vadd.f32 1.0, %v2658_v18  ;;  %1944 = vst.msk [vmem:[%s5816_s4 + $0x140] sm:$0xff] %vm1903_vm4, %v1879_v54  ;;  %2112 = vrot.lane.b32.xlu1 %v1879_v54, %s2693_s0  ;;  %v1727_v29 = vsel %vm4633_vm12, %v3844_v30, %v1723_v9  ;;  %v522_v46 = vmul.f32 %v4520_v12, %v388_v45  ;;  %v2033_v45 = vpop.permute.xlu0 %2032 }
 0x15c   :  { %v4669_v36 = vadd.f32 1.0, %v2660_v47  ;;  %v1732_v53 = vsel %vm4612_vm9, %v1731_v14, %v1727_v29  ;;  %v1018_v23 = vadd.f32 %v3867_v49, %v1017_v60  ;;  %v4675_v21 = vadd.f32 %v4539_v48, %v506_v1  ;;  %v2065_v14 = vpop.permute.xlu1 %2064  ;;  %v6076_v47 = vld [vmem:[#allocation25_spill] sm:$0xff]  ;;  %2224 = vst.msk [vmem:[%s5817_s5] sm:$0xff] %vm1903_vm4, %v2033_v45 }
 0x15d   :  { %2665 = vrcp.f32 %v4650_v52  ;;  %v1895_v30 = vmul.f32 %v1732_v53, %v6074_v3  ;;  %v4684_v9 = vadd.f32 %v4539_v48, %v522_v46  ;;  %v553_v22 = vmul.f32 %v4520_v12, %v481_v31  ;;  %2240 = vst.msk [vmem:[%s5817_s5 + $0x80] sm:$0xff] %vm1903_vm4, %v2065_v14 }
 0x15e   :  { %6072 = vst [vmem:[#allocation26_spill] sm:$0xff] %v4669_v36  ;;  %2667 = vrcp.f32 %v4669_v36  ;;  %v1022_v54 = vsel %vm4664_vm14, %v3867_v49, %v1018_v23  ;;  %v2375_v18 = vmul.f32 -1.442695, %v4675_v21  ;;  %v1255_v13 = vmul.f32 %v3952_v39, %v3881_v59 }
 0x15f   :  { %6073 = vst [vmem:[#allocation19_spill] sm:$0xff] %v4675_v21  ;;  %2144 = vrot.lane.b32.xlu2 %v1895_v30, %s2693_s0  ;;  %v1027_v49 = vsel %vm4642_vm13, %v1026_v32, %v1022_v54  ;;  %v2391_v31 = vmul.f32 -1.442695, %v4684_v9  ;;  %v4707_v60 = vadd.f32 %v4539_v48, %v553_v22  ;;  %vm1259_vm15 = vweird.f32 %v3881_v59 }
 0x160   :  { %1960 = vst.msk [vmem:[%s5816_s4 + $0x1c0] sm:$0xff] %vm1903_vm4, %v1895_v30  ;;  %v4710_v1 = vpop.eup %2661  ;;  %v1848_v29 = vmul.f32 %v1027_v49, %v6076_v47  ;;  %2669 = vpow2.f32 %v2375_v18  ;;  %v1256_v51 = vsub.f32 1.0, %v1255_v13  ;;  %vm1260_vm0 = vweird.f32 %v3952_v39  ;;  %v2103_v18 = vpop.permute.xlu2 %2102 }
 0x161   :  { %6075 = vst [vmem:[#allocation20_spill] sm:$0xff] %v4707_v60  ;;  %v4718_v24 = vpop.eup %2663  ;;  %2671 = vpow2.f32 %v2391_v31  ;;  %v2422_v32 = vmul.f32 -1.442695, %v4707_v60  ;;  %v1263_v46 = vand.u32 2147483647, %v3881_v59  ;;  %v1265_v53 = vand.u32 2147483648, %v3881_v59  ;;  %vm4739_vm3 = vmor %vm1259_vm15, %vm1260_vm0 }
 0x162   :  { %2050 = vrot.lane.b32.xlu0 %v1848_v29, %s2693_s0  ;;  %1913 = vst.msk [vmem:[%s5816_s4 + $0x48] sm:$0xff] %vm1903_vm4, %v1848_v29  ;;  %v1257_v23 = vmul.f32 %v3952_v39, %v1256_v51  ;;  %v1495_v3 = vmul.f32 %v3961_v15, %v3903_v58  ;;  %vm1499_vm1 = vweird.f32 %v3903_v58  ;;  %vm1500_vm2 = vweird.f32 %v3961_v15  ;;  %v6082_v59 = vld [vmem:[#allocation14_spill] sm:$0xff] }
 0x163   :  { %v4733_v30 = vpop.eup %2665  ;;  %2673 = vpow2.f32 %v2422_v32  ;;  %vm4743_vm5 = vcmp.eq.f32.partialorder %v1263_v46, 8.507059e+37  ;;  %v1266_v45 = vor.u32 1.1754944e-38, %v1265_v53  ;;  %v1503_v54 = vand.u32 2147483647, %v3903_v58  ;;  %2259 = vst.msk [vmem:[%s5817_s5 + $0x118] sm:$0xff] %vm1903_vm4, %v2103_v18  ;;  %v484_v18 = vpop.f32.mrf.mxu3  ;;  %vm4777_vm9 = vmor %vm1499_vm1, %vm1500_vm2 }
 0x164   :  { %v4748_v13 = vpop.eup %2667  ;;  %v1258_v49 = vadd.f32 %v3952_v39, %v1257_v23  ;;  %v1496_v31 = vsub.f32 1.0, %v1495_v3  ;;  %v1505_v47 = vand.u32 2147483648, %v3903_v58  ;;  %v1735_v29 = vmul.f32 %v6082_v59, %v3913_v50 }
 0x165   :  { %6081 = vst [vmem:[#allocation21_spill] sm:$0xff] %v4748_v13  ;;  %vm4758_vm6 = vcmp.eq.f32.partialorder %v1503_v54, 8.507059e+37  ;;  %vm1739_vm7 = vweird.f32 %v3913_v50  ;;  %vm1740_vm8 = vweird.f32 %v6082_v59  ;;  %v1743_v32 = vand.u32 2147483647, %v3913_v50 }
 0x166   :  { %v2670_v46 = vpop.eup %2669  ;;  %v1262_v53 = vsel %vm4739_vm3, %v3952_v39, %v1258_v49  ;;  %v1497_v23 = vmul.f32 %v3961_v15, %v1496_v31  ;;  %v1506_v3 = vor.u32 1.1754944e-38, %v1505_v47  ;;  %v1736_v60 = vsub.f32 1.0, %v1735_v29  ;;  %v6089_v31 = vld [vmem:[#allocation27_spill] sm:$0xff]  ;;  %vm4796_vm11 = vmor %vm1739_vm7, %vm1740_vm8 }
 0x167   :  { %v2672_v54 = vpop.eup %2671  ;;  %v4769_v21 = vadd.f32 1.0, %v2670_v46  ;;  %v1267_v13 = vsel %vm4743_vm5, %v1266_v45, %v1262_v53  ;;  %vm4781_vm10 = vcmp.eq.f32.partialorder %v1743_v32, 8.507059e+37  ;;  %v1745_v22 = vand.u32 2147483648, %v3913_v50 }
 0x168   :  { %v4786_v49 = vadd.f32 1.0, %v2672_v54  ;;  %v1864_v47 = vmul.f32 %v1267_v13, %v6089_v31  ;;  %v1498_v14 = vadd.f32 %v3961_v15, %v1497_v23  ;;  %v1737_v45 = vmul.f32 %v6082_v59, %v1736_v60 }
 0x169   :  { %v2674_v29 = vpop.eup %2673  ;;  %2675 = vrcp.f32 %v4769_v21  ;;  %v1746_v32 = vor.u32 1.1754944e-38, %v1745_v22  ;;  %v554_v46 = vmul.f32 %v4520_v12, %v484_v18  ;;  %v1270_v13 = vmul.f32 %v4087_v28, %v4018_v26  ;;  %v6092_v22 = vld [vmem:[#allocation28_spill] sm:$0xff] }
 0x16a   :  { %2677 = vrcp.f32 %v4786_v49  ;;  %v4804_v60 = vadd.f32 1.0, %v2674_v29  ;;  %1929 = vst.msk [vmem:[%s5816_s4 + $0xc8] sm:$0xff] %vm1903_vm4, %v1864_v47  ;;  %2082 = vrot.lane.b32.xlu1 %v1864_v47, %s2693_s0  ;;  %v1502_v50 = vsel %vm4777_vm9, %v3961_v15, %v1498_v14  ;;  %v1738_v53 = vadd.f32 %v6082_v59, %v1737_v45  ;;  %v2129_v14 = vpop.permute.xlu0 %2128 }
 0x16b   :  { %v1507_v23 = vsel %vm4758_vm6, %v1506_v3, %v1502_v50  ;;  %v4818_v18 = vadd.f32 %v4539_v48, %v554_v46  ;;  %v1271_v54 = vsub.f32 1.0, %v1270_v13  ;;  %vm1274_vm12 = vweird.f32 %v4018_v26  ;;  %2272 = vst.msk [vmem:[%s5817_s5 + $0x180] sm:$0xff] %vm1903_vm4, %v2129_v14  ;;  %v2041_v50 = vpop.permute.xlu2 %2040 }
 0x16c   :  { %2679 = vrcp.f32 %v4804_v60  ;;  %v1880_v31 = vmul.f32 %v1507_v23, %v6092_v22  ;;  %v1742_v36 = vsel %vm4796_vm11, %v6082_v59, %v1738_v53  ;;  %vm1275_vm13 = vweird.f32 %v4087_v28  ;;  %v6093_v59 = vld [vmem:[#allocation29_spill] sm:$0xff]  ;;  %2228 = vst.msk [vmem:[%s5817_s5 + $0x20] sm:$0xff] %vm1903_vm4, %v2041_v50 }
 0x16d   :  { %v1747_v15 = vsel %vm4781_vm10, %v1746_v32, %v1742_v36  ;;  %v2423_v51 = vmul.f32 -1.442695, %v4818_v18  ;;  %v1272_v3 = vmul.f32 %v4087_v28, %v1271_v54  ;;  %v1278_v47 = vand.u32 2147483647, %v4018_v26  ;;  %vm4838_vm14 = vmor %vm1274_vm12, %vm1275_vm13 }
 0x16e   :  { %1945 = vst.msk [vmem:[%s5816_s4 + $0x148] sm:$0xff] %vm1903_vm4, %v1880_v31  ;;  %2114 = vrot.lane.b32.xlu2 %v1880_v31, %s2693_s0  ;;  %v1896_v45 = vmul.f32 %v1747_v15, %v6093_v59  ;;  %v1280_v39 = vand.u32 2147483648, %v4018_v26  ;;  %v1030_v58 = vmul.f32 %v4077_v19, %v4013_v44  ;;  %vm1034_vm15 = vweird.f32 %v4013_v44  ;;  %v2131_v26 = vpop.permute.xlu1 %2130  ;;  %v6100_v59 = vld [vmem:[#allocation30_spill] sm:$0xff] }
 0x16f   :  { %v4846_v32 = vpop.eup %2675  ;;  %2681 = vpow2.f32 %v2423_v51  ;;  %v1273_v46 = vadd.f32 %v4087_v28, %v1272_v3  ;;  %vm4849_vm0 = vcmp.eq.f32.partialorder %v1278_v47, 8.507059e+37  ;;  %vm1035_vm1 = vweird.f32 %v4077_v19  ;;  %2273 = vst.msk [vmem:[%s5817_s5 + $0x188] sm:$0xff] %vm1903_vm4, %v2131_v26 }
 0x170   :  { %v4858_v53 = vpop.eup %2677  ;;  %1961 = vst.msk [vmem:[%s5816_s4 + $0x1c8] sm:$0xff] %vm1903_vm4, %v1896_v45  ;;  %2146 = vrot.lane.b32.xlu0 %v1896_v45, %s2693_s0  ;;  %v1281_v23 = vor.u32 1.1754944e-38, %v1280_v39  ;;  %v1031_v54 = vsub.f32 1.0, %v1030_v58  ;;  %v1038_v22 = vand.u32 2147483647, %v4013_v44  ;;  %v1040_v31 = vand.u32 2147483648, %v4013_v44  ;;  %vm4896_vm6 = vmor %vm1034_vm15, %vm1035_vm1 }
 0x171   :  { %v1277_v36 = vsel %vm4838_vm14, %v4087_v28, %v1273_v46  ;;  %v1510_v15 = vmul.f32 %v4100_v40, %v4033_v27  ;;  %vm1514_vm2 = vweird.f32 %v4033_v27  ;;  %vm1515_vm3 = vweird.f32 %v4100_v40 }
 0x172   :  { %v4878_v51 = vpop.eup %2679  ;;  %v1282_v3 = vsel %vm4849_vm0, %v1281_v23, %v1277_v36  ;;  %v1032_v47 = vmul.f32 %v4077_v19, %v1031_v54  ;;  %vm4883_vm5 = vcmp.eq.f32.partialorder %v1038_v22, 8.507059e+37  ;;  %v1041_v14 = vor.u32 1.1754944e-38, %v1040_v31  ;;  %v2035_v31 = vpop.permute.xlu0 %2034  ;;  %vm4927_vm10 = vmor %vm1514_vm2, %vm1515_vm3 }
 0x173   :  { %v1865_v45 = vmul.f32 %v1282_v3, %v6100_v59  ;;  %v1511_v39 = vsub.f32 1.0, %v1510_v15  ;;  %v1518_v58 = vand.u32 2147483647, %v4033_v27  ;;  %v1520_v46 = vand.u32 2147483648, %v4033_v27  ;;  %2225 = vst.msk [vmem:[%s5817_s5 + $0x8] sm:$0xff] %vm1903_vm4, %v2035_v31 }
 0x174   :  { %v1033_v13 = vadd.f32 %v4077_v19, %v1032_v47  ;;  %v1750_v26 = vmul.f32 %v4223_v17, %v4163_v56  ;;  %vm1754_vm7 = vweird.f32 %v4163_v56  ;;  %vm1755_vm8 = vweird.f32 %v4223_v17 }
 0x175   :  { %v2682_v50 = vpop.eup %2681  ;;  %1930 = vst.msk [vmem:[%s5816_s4 + $0xd0] sm:$0xff] %vm1903_vm4, %v1865_v45  ;;  %v1512_v44 = vmul.f32 %v4100_v40, %v1511_v39  ;;  %vm4912_vm9 = vcmp.eq.f32.partialorder %v1518_v58, 8.507059e+37  ;;  %v1521_v54 = vor.u32 1.1754944e-38, %v1520_v46  ;;  %v1758_v22 = vand.u32 2147483647, %v4163_v56  ;;  %v6109_v39 = vld [vmem:[#allocation2_spill] sm:$0xff]  ;;  %vm4955_vm12 = vmor %vm1754_vm7, %vm1755_vm8 }
 0x176   :  { %v4917_v36 = vadd.f32 1.0, %v2682_v50  ;;  %2084 = vrot.lane.b32.xlu2 %v1865_v45, %s2693_s0  ;;  %v1037_v15 = vsel %vm4896_vm6, %v4077_v19, %v1033_v13  ;;  %v1751_v47 = vsub.f32 1.0, %v1750_v26  ;;  %v1760_v59 = vand.u32 2147483648, %v4163_v56  ;;  %v2037_v26 = vpop.permute.xlu1 %2036  ;;  %v2073_v50 = vpop.permute.xlu2 %2072 }
 0x177   :  { %v1042_v45 = vsel %vm4883_vm5, %v1041_v14, %v1037_v15  ;;  %v1513_v19 = vadd.f32 %v4100_v40, %v1512_v44  ;;  %vm4939_vm11 = vcmp.eq.f32.partialorder %v1758_v22, 8.507059e+37  ;;  %v1045_v27 = vmul.f32 %v4194_v10, %v4128_v25  ;;  %2226 = vst.msk [vmem:[%s5817_s5 + $0x10] sm:$0xff] %vm1903_vm4, %v2037_v26  ;;  %v6112_v15 = vld [vmem:[#allocation9_spill] sm:$0xff] }
 0x178   :  { %2683 = vrcp.f32 %v4917_v36  ;;  %v1849_v58 = vmul.f32 %v1042_v45, %v6109_v39  ;;  %v1752_v46 = vmul.f32 %v4223_v17, %v1751_v47  ;;  %v1761_v13 = vor.u32 1.1754944e-38, %v1760_v59  ;;  %v6113_v59 = vld [vmem:[#allocation5_spill] sm:$0xff]  ;;  %2244 = vst.msk [vmem:[%s5817_s5 + $0xa0] sm:$0xff] %vm1903_vm4, %v2073_v50 }
 0x179   :  { %v1517_v28 = vsel %vm4927_vm10, %v4100_v40, %v1513_v19  ;;  %v1046_v44 = vsub.f32 1.0, %v1045_v27  ;;  %vm1049_vm13 = vweird.f32 %v4128_v25  ;;  %vm1050_vm14 = vweird.f32 %v4194_v10  ;;  %v436_v19 = vpop.f32.mrf.mxu2 }
 0x17a   :  { %2052 = vrot.lane.b32.xlu1 %v1849_v58, %s2693_s0  ;;  %1914 = vst.msk [vmem:[%s5816_s4 + $0x50] sm:$0xff] %vm1903_vm4, %v1849_v58  ;;  %v1522_v40 = vsel %vm4912_vm9, %v1521_v54, %v1517_v28  ;;  %v1753_v56 = vadd.f32 %v4223_v17, %v1752_v46  ;;  %v1053_v22 = vand.u32 2147483647, %v4128_v25  ;;  %v1055_v31 = vand.u32 2147483648, %v4128_v25  ;;  %vm4991_vm0 = vmor %vm1049_vm13, %vm1050_vm14  ;;  %v2099_v26 = vpop.permute.xlu0 %2098  ;;  %v6118_v28 = vld [vmem:[#allocation15_spill] sm:$0xff] }
 0x17b   :  { %v1881_v3 = vmul.f32 %v1522_v40, %v6112_v15  ;;  %v1047_v47 = vmul.f32 %v4194_v10, %v1046_v44  ;;  %v1285_v45 = vmul.f32 %v6113_v59, %v4136_v8  ;;  %vm1289_vm15 = vweird.f32 %v4136_v8  ;;  %2257 = vst.msk [vmem:[%s5817_s5 + $0x108] sm:$0xff] %vm1903_vm4, %v2099_v26 }
 0x17c   :  { %v1757_v23 = vsel %vm4955_vm12, %v4223_v17, %v1753_v56  ;;  %vm4995_vm1 = vcmp.eq.f32.partialorder %v1053_v22, 8.507059e+37  ;;  %v1056_v39 = vor.u32 1.1754944e-38, %v1055_v31  ;;  %vm1290_vm2 = vweird.f32 %v6113_v59 }
 0x17d   :  { %1946 = vst.msk [vmem:[%s5816_s4 + $0x150] sm:$0xff] %vm1903_vm4, %v1881_v3  ;;  %2116 = vrot.lane.b32.xlu0 %v1881_v3, %s2693_s0  ;;  %v1762_v25 = vsel %vm4939_vm11, %v1761_v13, %v1757_v23  ;;  %v1048_v17 = vadd.f32 %v4194_v10, %v1047_v47  ;;  %v1286_v58 = vsub.f32 1.0, %v1285_v45  ;;  %v1293_v46 = vand.u32 2147483647, %v4136_v8  ;;  %vm5039_vm6 = vmor %vm1289_vm15, %vm1290_vm2  ;;  %v6123_v47 = vld [vmem:[#allocation3_spill] sm:$0xff] }
 0x17e   :  { %v5009_v50 = vpop.eup %2683  ;;  %v1897_v14 = vmul.f32 %v1762_v25, %v6118_v28  ;;  %v1295_v44 = vand.u32 2147483648, %v4136_v8  ;;  %v538_v40 = vmul.f32 %v4520_v12, %v436_v19  ;;  %v1525_v56 = vmul.f32 %v4322_v4, %v4259_v62  ;;  %v2043_v25 = vpop.permute.xlu2 %2042 }
 0x17f   :  { %v1052_v29 = vsel %vm4991_vm0, %v4194_v10, %v1048_v17  ;;  %v1287_v13 = vmul.f32 %v6113_v59, %v1286_v58  ;;  %vm5024_vm3 = vcmp.eq.f32.partialorder %v1293_v46, 8.507059e+37  ;;  %vm1529_vm5 = vweird.f32 %v4259_v62  ;;  %2229 = vst.msk [vmem:[%s5817_s5 + $0x28] sm:$0xff] %vm1903_vm4, %v2043_v25 }
 0x180   :  { %1962 = vst.msk [vmem:[%s5816_s4 + $0x1d0] sm:$0xff] %vm1903_vm4, %v1897_v14  ;;  %v1057_v12 = vsel %vm4995_vm1, %v1056_v39, %v1052_v29  ;;  %v1296_v31 = vor.u32 1.1754944e-38, %v1295_v44  ;;  %v5044_v15 = vadd.f32 %v4539_v48, %v538_v40  ;;  %v1526_v3 = vsub.f32 1.0, %v1525_v56  ;;  %v2101_v39 = vpop.permute.xlu1 %2100 }
 0x181   :  { %v1850_v45 = vmul.f32 %v1057_v12, %v6123_v47  ;;  %v1288_v19 = vadd.f32 %v6113_v59, %v1287_v13  ;;  %vm1530_vm7 = vweird.f32 %v4322_v4  ;;  %v1533_v23 = vand.u32 2147483647, %v4259_v62  ;;  %2258 = vst.msk [vmem:[%s5817_s5 + $0x110] sm:$0xff] %vm1903_vm4, %v2101_v39 }
 0x182   :  { %2148 = vrot.lane.b32.xlu1 %v1897_v14, %s2693_s0  ;;  %v2407_v8 = vmul.f32 -1.442695, %v5044_v15  ;;  %v1527_v54 = vmul.f32 %v4322_v4, %v1526_v3  ;;  %v1535_v27 = vand.u32 2147483648, %v4259_v62  ;;  %v1765_v48 = vmul.f32 %v4343_v11, %v4279_v2  ;;  %vm5066_vm8 = vmor %vm1529_vm5, %vm1530_vm7  ;;  %v6128_v62 = vld [vmem:[#allocation11_spill] sm:$0xff]  ;;  %v2069_v29 = vpop.permute.xlu0 %2068  ;;  %v6131_v3 = vld [vmem:[#allocation16_spill] sm:$0xff] }
 0x183   :  { %2054 = vrot.lane.b32.xlu2 %v1850_v45, %s2693_s0  ;;  %1915 = vst.msk [vmem:[%s5816_s4 + $0x58] sm:$0xff] %vm1903_vm4, %v1850_v45  ;;  %v1292_v17 = vsel %vm5039_vm6, %v6113_v59, %v1288_v19  ;;  %vm5070_vm9 = vcmp.eq.f32.partialorder %v1533_v23, 8.507059e+37  ;;  %vm1769_vm10 = vweird.f32 %v4279_v2  ;;  %vm1770_vm11 = vweird.f32 %v4343_v11  ;;  %v6143_v45 = vld [vmem:[#allocation13_spill] sm:$0xff] }
 0x184   :  { %v1297_v26 = vsel %vm5024_vm3, %v1296_v31, %v1292_v17  ;;  %2685 = vpow2.f32 %v2407_v8  ;;  %v1528_v59 = vadd.f32 %v4322_v4, %v1527_v54  ;;  %v1536_v28 = vor.u32 1.1754944e-38, %v1535_v27  ;;  %2242 = vst.msk [vmem:[%s5817_s5 + $0x90] sm:$0xff] %vm1903_vm4, %v2069_v29  ;;  %vm5118_vm15 = vmor %vm1769_vm10, %vm1770_vm11 }
 0x185   :  { %v1866_v14 = vmul.f32 %v1297_v26, %v6128_v62  ;;  %v1766_v44 = vsub.f32 1.0, %v1765_v48  ;;  %v1773_v40 = vand.u32 2147483647, %v4279_v2  ;;  %v1775_v56 = vand.u32 2147483648, %v4279_v2 }
 0x186   :  { %v1532_v13 = vsel %vm5066_vm8, %v4322_v4, %v1528_v59  ;;  %v1060_v22 = vmul.f32 %v4313_v33, %v4236_v57  ;;  %vm1064_vm12 = vweird.f32 %v4236_v57  ;;  %vm1065_vm13 = vweird.f32 %v4313_v33 }
 0x187   :  { %1931 = vst.msk [vmem:[%s5816_s4 + $0xd8] sm:$0xff] %vm1903_vm4, %v1866_v14  ;;  %2086 = vrot.lane.b32.xlu0 %v1866_v14, %s2693_s0  ;;  %v1537_v4 = vsel %vm5070_vm9, %v1536_v28, %v1532_v13  ;;  %v1767_v12 = vmul.f32 %v4343_v11, %v1766_v44  ;;  %vm5109_vm14 = vcmp.eq.f32.partialorder %v1773_v40, 8.507059e+37  ;;  %v1776_v31 = vor.u32 1.1754944e-38, %v1775_v56  ;;  %vm5149_vm3 = vmor %vm1064_vm12, %vm1065_vm13  ;;  %v2139_v40 = vpop.permute.xlu2 %2138  ;;  %v6140_v56 = vld [vmem:[#allocation4_spill] sm:$0xff] }
 0x188   :  { %v1882_v47 = vmul.f32 %v1537_v4, %v6131_v3  ;;  %v1061_v19 = vsub.f32 1.0, %v1060_v22  ;;  %v1068_v23 = vand.u32 2147483647, %v4236_v57  ;;  %v1070_v8 = vand.u32 2147483648, %v4236_v57  ;;  %v2039_v57 = vpop.permute.xlu1 %2038  ;;  %2277 = vst.msk [vmem:[%s5817_s5 + $0x1a8] sm:$0xff] %vm1903_vm4, %v2139_v40 }
 0x189   :  { %v1768_v54 = vadd.f32 %v4343_v11, %v1767_v12  ;;  %v1300_v27 = vmul.f32 %v4438_v6, %v4357_v16  ;;  %vm1304_vm0 = vweird.f32 %v4357_v16  ;;  %vm1305_vm1 = vweird.f32 %v4438_v6  ;;  %2227 = vst.msk [vmem:[%s5817_s5 + $0x18] sm:$0xff] %vm1903_vm4, %v2039_v57 }
 0x18a   :  { %v2686_v48 = vpop.eup %2685  ;;  %1947 = vst.msk [vmem:[%s5816_s4 + $0x158] sm:$0xff] %vm1903_vm4, %v1882_v47  ;;  %2118 = vrot.lane.b32.xlu1 %v1882_v47, %s2693_s0  ;;  %v1062_v2 = vmul.f32 %v4313_v33, %v1061_v19  ;;  %vm5135_vm2 = vcmp.eq.f32.partialorder %v1068_v23, 8.507059e+37  ;;  %v1071_v25 = vor.u32 1.1754944e-38, %v1070_v8  ;;  %v1308_v17 = vand.u32 2147483647, %v4357_v16  ;;  %vm5177_vm6 = vmor %vm1304_vm0, %vm1305_vm1  ;;  %v2135_v47 = vpop.permute.xlu0 %2134 }
 0x18b   :  { %v5140_v58 = vadd.f32 1.0, %v2686_v48  ;;  %v1772_v46 = vsel %vm5118_vm15, %v4343_v11, %v1768_v54  ;;  %v1301_v59 = vsub.f32 1.0, %v1300_v27  ;;  %v1310_v28 = vand.u32 2147483648, %v4357_v16  ;;  %2275 = vst.msk [vmem:[%s5817_s5 + $0x198] sm:$0xff] %vm1903_vm4, %v2135_v47 }
 0x18c   :  { %v1777_v62 = vsel %vm5109_vm14, %v1776_v31, %v1772_v46  ;;  %v1063_v14 = vadd.f32 %v4313_v33, %v1062_v2  ;;  %vm5157_vm5 = vcmp.eq.f32.partialorder %v1308_v17, 8.507059e+37  ;;  %v1540_v11 = vmul.f32 %v4447_v38, %v4379_v63 }
 0x18d   :  { %2687 = vrcp.f32 %v5140_v58  ;;  %v1898_v29 = vmul.f32 %v1777_v62, %v6140_v56  ;;  %v1302_v13 = vmul.f32 %v4438_v6, %v1301_v59  ;;  %v1311_v22 = vor.u32 1.1754944e-38, %v1310_v28 }
 0x18e   :  { %v1067_v4 = vsel %vm5149_vm3, %v4313_v33, %v1063_v14  ;;  %v1541_v10 = vsub.f32 1.0, %v1540_v11  ;;  %vm1544_vm7 = vweird.f32 %v4379_v63  ;;  %vm1545_vm8 = vweird.f32 %v4447_v38 }
 0x18f   :  { %1963 = vst.msk [vmem:[%s5816_s4 + $0x1d8] sm:$0xff] %vm1903_vm4, %v1898_v29  ;;  %2150 = vrot.lane.b32.xlu2 %v1898_v29, %s2693_s0  ;;  %v1072_v33 = vsel %vm5135_vm2, %v1071_v25, %v1067_v4  ;;  %v1303_v16 = vadd.f32 %v4438_v6, %v1302_v13  ;;  %v1548_v31 = vand.u32 2147483647, %v4379_v63  ;;  %v1550_v3 = vand.u32 2147483648, %v4379_v63  ;;  %vm5213_vm10 = vmor %vm1544_vm7, %vm1545_vm8  ;;  %v2109_v4 = vpop.permute.xlu2 %2108 }
 0x190   :  { %v1851_v19 = vmul.f32 %v1072_v33, %v6143_v45  ;;  %v1542_v23 = vmul.f32 %v4447_v38, %v1541_v10  ;;  %v1780_v8 = vmul.f32 %v4467_v35, %v4397_v0  ;;  %vm1784_vm9 = vweird.f32 %v4397_v0  ;;  %2262 = vst.msk [vmem:[%s5817_s5 + $0x130] sm:$0xff] %vm1903_vm4, %v2109_v4 }
 0x191   :  { %v1307_v54 = vsel %vm5177_vm6, %v4438_v6, %v1303_v16  ;;  %vm5217_vm11 = vcmp.eq.f32.partialorder %v1548_v31, 8.507059e+37  ;;  %v1551_v2 = vor.u32 1.1754944e-38, %v1550_v3  ;;  %vm1785_vm12 = vweird.f32 %v4467_v35 }
 0x192   :  { %2056 = vrot.lane.b32.xlu0 %v1851_v19, %s2693_s0  ;;  %1916 = vst.msk [vmem:[%s5816_s4 + $0x60] sm:$0xff] %vm1903_vm4, %v1851_v19  ;;  %v1312_v63 = vsel %vm5157_vm5, %v1311_v22, %v1307_v54  ;;  %v1543_v6 = vadd.f32 %v4447_v38, %v1542_v23  ;;  %v1781_v39 = vsub.f32 1.0, %v1780_v8  ;;  %v1788_v25 = vand.u32 2147483647, %v4397_v0  ;;  %vm5258_vm0 = vmor %vm1784_vm9, %vm1785_vm12  ;;  %v2071_v22 = vpop.permute.xlu1 %2070  ;;  %v6156_v19 = vld [vmem:[#allocation6_spill] sm:$0xff] }
 0x193   :  { %v5231_v17 = vpop.eup %2687  ;;  %v1867_v46 = vmul.f32 %v1312_v63, %v4275_v20  ;;  %v1790_v26 = vand.u32 2147483648, %v4397_v0  ;;  %v1315_v59 = vmul.f32 %v4588_v34, %v4504_v42  ;;  %vm1319_vm13 = vweird.f32 %v4504_v42  ;;  %2243 = vst.msk [vmem:[%s5817_s5 + $0x98] sm:$0xff] %vm1903_vm4, %v2071_v22 }
 0x194   :  { %v1547_v28 = vsel %vm5213_vm10, %v4447_v38, %v1543_v6  ;;  %v1782_v62 = vmul.f32 %v4467_v35, %v1781_v39  ;;  %vm5242_vm14 = vcmp.eq.f32.partialorder %v1788_v25, 8.507059e+37  ;;  %vm1320_vm15 = vweird.f32 %v4588_v34  ;;  %v6161_v25 = vld [vmem:[#allocation8_spill] sm:$0xff] }
 0x195   :  { %1932 = vst.msk [vmem:[%s5816_s4 + $0xe0] sm:$0xff] %vm1903_vm4, %v1867_v46  ;;  %2088 = vrot.lane.b32.xlu1 %v1867_v46, %s2693_s0  ;;  %v1552_v20 = vsel %vm5217_vm11, %v1551_v2, %v1547_v28  ;;  %v1791_v44 = vor.u32 1.1754944e-38, %v1790_v26  ;;  %v1316_v11 = vsub.f32 1.0, %v1315_v59  ;;  %v1323_v57 = vand.u32 2147483647, %v4504_v42  ;;  %vm5291_vm5 = vmor %vm1319_vm13, %vm1320_vm15 }
 0x196   :  { %v1883_v40 = vmul.f32 %v1552_v20, %v4292_v55  ;;  %v1783_v56 = vadd.f32 %v4467_v35, %v1782_v62  ;;  %v1325_v29 = vand.u32 2147483648, %v4504_v42  ;;  %v1075_v13 = vmul.f32 %v4578_v43, %v4499_v37  ;;  %v2105_v42 = vpop.permute.xlu0 %2104 }
 0x197   :  { %v1317_v0 = vmul.f32 %v4588_v34, %v1316_v11  ;;  %vm5269_vm1 = vcmp.eq.f32.partialorder %v1323_v57, 8.507059e+37  ;;  %vm1079_vm2 = vweird.f32 %v4499_v37  ;;  %vm1080_vm3 = vweird.f32 %v4578_v43  ;;  %2260 = vst.msk [vmem:[%s5817_s5 + $0x120] sm:$0xff] %vm1903_vm4, %v2105_v42  ;;  %v6191_v42 = vld [vmem:[#allocation26_spill] sm:$0xff] }
 0x198   :  { %1948 = vst.msk [vmem:[%s5816_s4 + $0x160] sm:$0xff] %vm1903_vm4, %v1883_v40  ;;  %2120 = vrot.lane.b32.xlu2 %v1883_v40, %s2693_s0  ;;  %v1787_v55 = vsel %vm5258_vm0, %v4467_v35, %v1783_v56  ;;  %v1326_v33 = vor.u32 1.1754944e-38, %v1325_v29  ;;  %v1076_v16 = vsub.f32 1.0, %v1075_v13  ;;  %v1083_v31 = vand.u32 2147483647, %v4499_v37  ;;  %vm5324_vm8 = vmor %vm1079_vm2, %vm1080_vm3  ;;  %v2079_v57 = vpop.permute.xlu2 %2078  ;;  %v6166_v40 = vld [vmem:[#allocation7_spill] sm:$0xff] }
 0x199   :  { %v1792_v3 = vsel %vm5242_vm14, %v1791_v44, %v1787_v55  ;;  %v1318_v47 = vadd.f32 %v4588_v34, %v1317_v0  ;;  %v1085_v45 = vand.u32 2147483648, %v4499_v37  ;;  %v1555_v35 = vmul.f32 %v4598_v41, %v4524_v5  ;;  %2247 = vst.msk [vmem:[%s5817_s5 + $0xb8] sm:$0xff] %vm1903_vm4, %v2079_v57 }
 0x19a   :  { %v1899_v23 = vmul.f32 %v1792_v3, %v6156_v19  ;;  %v1077_v8 = vmul.f32 %v4578_v43, %v1076_v16  ;;  %vm5308_vm6 = vcmp.eq.f32.partialorder %v1083_v31, 8.507059e+37  ;;  %vm1559_vm7 = vweird.f32 %v4524_v5  ;;  %v2137_v11 = vpop.permute.xlu1 %2136  ;;  %v6171_v16 = vld [vmem:[#allocation10_spill] sm:$0xff] }
 0x19b   :  { %v1322_v27 = vsel %vm5291_vm5, %v4588_v34, %v1318_v47  ;;  %v1086_v2 = vor.u32 1.1754944e-38, %v1085_v45  ;;  %v1556_v63 = vsub.f32 1.0, %v1555_v35  ;;  %vm1560_vm9 = vweird.f32 %v4598_v41  ;;  %2276 = vst.msk [vmem:[%s5817_s5 + $0x1a0] sm:$0xff] %vm1903_vm4, %v2137_v11 }
 0x19c   :  { %1964 = vst.msk [vmem:[%s5816_s4 + $0x1e0] sm:$0xff] %vm1903_vm4, %v1899_v23  ;;  %2152 = vrot.lane.b32.xlu0 %v1899_v23, %s2693_s0  ;;  %v1327_v34 = vsel %vm5269_vm1, %v1326_v33, %v1322_v27  ;;  %v1078_v37 = vadd.f32 %v4578_v43, %v1077_v8  ;;  %v1563_v6 = vand.u32 2147483647, %v4524_v5  ;;  %v1565_v39 = vand.u32 2147483648, %v4524_v5  ;;  %vm5349_vm11 = vmor %vm1559_vm7, %vm1560_vm9 }
 0x19d   :  { %v1868_v46 = vmul.f32 %v1327_v34, %v6161_v25  ;;  %v1557_v26 = vmul.f32 %v4598_v41, %v1556_v63  ;;  %v1570_v59 = vmul.f32 %v4733_v30, %v4650_v52  ;;  %vm1574_vm10 = vweird.f32 %v4650_v52  ;;  %v6176_v34 = vld [vmem:[#allocation17_spill] sm:$0xff] }
 0x19e   :  { %v1082_v28 = vsel %vm5324_vm8, %v4578_v43, %v1078_v37  ;;  %vm5353_vm12 = vcmp.eq.f32.partialorder %v1563_v6, 8.507059e+37  ;;  %v1566_v20 = vor.u32 1.1754944e-38, %v1565_v39  ;;  %vm1575_vm13 = vweird.f32 %v4733_v30  ;;  %v2075_v35 = vpop.permute.xlu0 %2074 }
 0x19f   :  { %1933 = vst.msk [vmem:[%s5816_s4 + $0xe8] sm:$0xff] %vm1903_vm4, %v1868_v46  ;;  %v1087_v43 = vsel %vm5308_vm6, %v1086_v2, %v1082_v28  ;;  %v1558_v5 = vadd.f32 %v4598_v41, %v1557_v26  ;;  %v1571_v38 = vsub.f32 1.0, %v1570_v59  ;;  %v1578_v44 = vand.u32 2147483647, %v4650_v52  ;;  %vm5400_vm1 = vmor %vm1574_vm10, %vm1575_vm13 }
 0x1a0   :  { %2090 = vrot.lane.b32.xlu2 %v1868_v46, %s2693_s0  ;;  %v1852_v56 = vmul.f32 %v1087_v43, %v6166_v40  ;;  %v1580_v29 = vand.u32 2147483648, %v4650_v52  ;;  %v1090_v13 = vmul.f32 %v4710_v1, %v4625_v7  ;;  %vm1094_vm14 = vweird.f32 %v4625_v7  ;;  %2245 = vst.msk [vmem:[%s5817_s5 + $0xa8] sm:$0xff] %vm1903_vm4, %v2075_v35 }
 0x1a1   :  { %v1562_v22 = vsel %vm5349_vm11, %v4598_v41, %v1558_v5  ;;  %v1572_v4 = vmul.f32 %v4733_v30, %v1571_v38  ;;  %vm5380_vm15 = vcmp.eq.f32.partialorder %v1578_v44, 8.507059e+37  ;;  %vm1095_vm0 = vweird.f32 %v4710_v1 }
 0x1a2   :  { %2058 = vrot.lane.b32.xlu1 %v1852_v56, %s2693_s0  ;;  %1917 = vst.msk [vmem:[%s5816_s4 + $0x68] sm:$0xff] %vm1903_vm4, %v1852_v56  ;;  %v1567_v41 = vsel %vm5353_vm12, %v1566_v20, %v1562_v22  ;;  %v1581_v55 = vor.u32 1.1754944e-38, %v1580_v29  ;;  %v1091_v10 = vsub.f32 1.0, %v1090_v13  ;;  %v1098_v33 = vand.u32 2147483647, %v4625_v7  ;;  %vm5433_vm6 = vmor %vm1094_vm14, %vm1095_vm0  ;;  %v2107_v39 = vpop.permute.xlu1 %2106  ;;  %v6181_v20 = vld [vmem:[#allocation12_spill] sm:$0xff] }
 0x1a3   :  { %v1884_v31 = vmul.f32 %v1567_v41, %v6171_v16  ;;  %v1573_v3 = vadd.f32 %v4733_v30, %v1572_v4  ;;  %v1100_v47 = vand.u32 2147483648, %v4625_v7  ;;  %v1330_v45 = vmul.f32 %v4718_v24, %v4638_v61  ;;  %2261 = vst.msk [vmem:[%s5817_s5 + $0x128] sm:$0xff] %vm1903_vm4, %v2107_v39  ;;  %v6186_v22 = vld [vmem:[#allocation18_spill] sm:$0xff] }
 0x1a4   :  { %v1092_v52 = vmul.f32 %v4710_v1, %v1091_v10  ;;  %vm5411_vm2 = vcmp.eq.f32.partialorder %v1098_v33, 8.507059e+37  ;;  %vm1334_vm3 = vweird.f32 %v4638_v61  ;;  %vm1335_vm5 = vweird.f32 %v4718_v24 }
 0x1a5   :  { %1949 = vst.msk [vmem:[%s5816_s4 + $0x168] sm:$0xff] %vm1903_vm4, %v1884_v31  ;;  %2122 = vrot.lane.b32.xlu0 %v1884_v31, %s2693_s0  ;;  %v1577_v19 = vsel %vm5400_vm1, %v4733_v30, %v1573_v3  ;;  %v1101_v8 = vor.u32 1.1754944e-38, %v1100_v47  ;;  %v1331_v54 = vsub.f32 1.0, %v1330_v45  ;;  %v1338_v27 = vand.u32 2147483647, %v4638_v61  ;;  %vm5458_vm9 = vmor %vm1334_vm3, %vm1335_vm5 }
 0x1a6   :  { %v1582_v48 = vsel %vm5380_vm15, %v1581_v55, %v1577_v19  ;;  %v1093_v2 = vadd.f32 %v4710_v1, %v1092_v52  ;;  %v1340_v63 = vand.u32 2147483648, %v4638_v61  ;;  %v1345_v30 = vmul.f32 %v4858_v53, %v4786_v49  ;;  %v2045_v56 = vpop.permute.xlu0 %2044  ;;  %v6192_v19 = vld [vmem:[#allocation21_spill] sm:$0xff] }
 0x1a7   :  { %v1885_v7 = vmul.f32 %v1582_v48, %v6176_v34  ;;  %v1332_v37 = vmul.f32 %v4718_v24, %v1331_v54  ;;  %vm5446_vm7 = vcmp.eq.f32.partialorder %v1338_v27, 8.507059e+37  ;;  %vm1349_vm8 = vweird.f32 %v4786_v49  ;;  %2230 = vst.msk [vmem:[%s5817_s5 + $0x30] sm:$0xff] %vm1903_vm4, %v2045_v56 }
 0x1a8   :  { %v1097_v25 = vsel %vm5433_vm6, %v4710_v1, %v1093_v2  ;;  %v1341_v26 = vor.u32 1.1754944e-38, %v1340_v63  ;;  %v1346_v59 = vsub.f32 1.0, %v1345_v30  ;;  %vm1350_vm10 = vweird.f32 %v4858_v53 }
 0x1a9   :  { %1950 = vst.msk [vmem:[%s5816_s4 + $0x170] sm:$0xff] %vm1903_vm4, %v1885_v7  ;;  %v1102_v61 = vsel %vm5411_vm2, %v1101_v8, %v1097_v25  ;;  %v1333_v1 = vadd.f32 %v4718_v24, %v1332_v37  ;;  %v1353_v28 = vand.u32 2147483647, %v4786_v49  ;;  %v1355_v62 = vand.u32 2147483648, %v4786_v49  ;;  %v2049_v14 = vpop.permute.xlu2 %2048  ;;  %vm5493_vm12 = vmor %vm1349_vm8, %vm1350_vm10 }
 0x1aa   :  { %2124 = vrot.lane.b32.xlu1 %v1885_v7, %s2693_s0  ;;  %v1853_v43 = vmul.f32 %v1102_v61, %v6181_v20  ;;  %v1347_v5 = vmul.f32 %v4858_v53, %v1346_v59  ;;  %v1585_v38 = vmul.f32 %v5231_v17, %v5140_v58  ;;  %vm1589_vm11 = vweird.f32 %v5140_v58  ;;  %2232 = vst.msk [vmem:[%s5817_s5 + $0x40] sm:$0xff] %vm1903_vm4, %v2049_v14  ;;  %v2077_v47 = vpop.permute.xlu1 %2076 }
 0x1ab   :  { %v1337_v44 = vsel %vm5458_vm9, %v4718_v24, %v1333_v1  ;;  %vm5497_vm13 = vcmp.eq.f32.partialorder %v1353_v28, 8.507059e+37  ;;  %v1356_v40 = vor.u32 1.1754944e-38, %v1355_v62  ;;  %vm1590_vm14 = vweird.f32 %v5231_v17  ;;  %2246 = vst.msk [vmem:[%s5817_s5 + $0xb0] sm:$0xff] %vm1903_vm4, %v2077_v47  ;;  %v6201_v1 = vld [vmem:[#allocation19_spill] sm:$0xff] }
 0x1ac   :  { %2060 = vrot.lane.b32.xlu2 %v1853_v43, %s2693_s0  ;;  %1918 = vst.msk [vmem:[%s5816_s4 + $0x70] sm:$0xff] %vm1903_vm4, %v1853_v43  ;;  %v1342_v24 = vsel %vm5446_vm7, %v1341_v26, %v1337_v44  ;;  %v1348_v49 = vadd.f32 %v4858_v53, %v1347_v5  ;;  %v1586_v29 = vsub.f32 1.0, %v1585_v38  ;;  %v1593_v13 = vand.u32 2147483647, %v5140_v58  ;;  %vm5540_vm2 = vmor %vm1589_vm11, %vm1590_vm14 }
 0x1ad   :  { %v1869_v4 = vmul.f32 %v1342_v24, %v6186_v22  ;;  %v1595_v0 = vand.u32 2147483648, %v5140_v58  ;;  %v1105_v41 = vmul.f32 %v4846_v32, %v4769_v21  ;;  %vm1109_vm15 = vweird.f32 %v4769_v21  ;;  %v6206_v24 = vld [vmem:[#allocation22_spill] sm:$0xff] }
 0x1ae   :  { %v1352_v12 = vsel %vm5493_vm12, %v4858_v53, %v1348_v49  ;;  %v1587_v55 = vmul.f32 %v5231_v17, %v1586_v29  ;;  %vm5524_vm0 = vcmp.eq.f32.partialorder %v1593_v13, 8.507059e+37  ;;  %vm1110_vm1 = vweird.f32 %v4846_v32  ;;  %v2141_v7 = vpop.permute.xlu0 %2140 }
 0x1af   :  { %1934 = vst.msk [vmem:[%s5816_s4 + $0xf0] sm:$0xff] %vm1903_vm4, %v1869_v4  ;;  %2092 = vrot.lane.b32.xlu0 %v1869_v4, %s2693_s0  ;;  %v1357_v33 = vsel %vm5497_vm13, %v1356_v40, %v1352_v12  ;;  %v1596_v16 = vor.u32 1.1754944e-38, %v1595_v0  ;;  %v1106_v31 = vsub.f32 1.0, %v1105_v41  ;;  %v1113_v3 = vand.u32 2147483647, %v4769_v21  ;;  %vm5573_vm7 = vmor %vm1109_vm15, %vm1110_vm1 }
 0x1b0   :  { %v1870_v45 = vmul.f32 %v1357_v33, %v4684_v9  ;;  %v1588_v35 = vadd.f32 %v5231_v17, %v1587_v55  ;;  %v1115_v52 = vand.u32 2147483648, %v4769_v21  ;;  %v1795_v23 = vmul.f32 %v6192_v19, %v6191_v42  ;;  %2278 = vst.msk [vmem:[%s5817_s5 + $0x1b0] sm:$0xff] %vm1903_vm4, %v2141_v7 }
 0x1b1   :  { %v1107_v58 = vmul.f32 %v4846_v32, %v1106_v31  ;;  %vm5555_vm3 = vcmp.eq.f32.partialorder %v1113_v3, 8.507059e+37  ;;  %vm1799_vm5 = vweird.f32 %v6191_v42  ;;  %vm1800_vm6 = vweird.f32 %v6192_v19 }
 0x1b2   :  { %1935 = vst.msk [vmem:[%s5816_s4 + $0xf8] sm:$0xff] %vm1903_vm4, %v1870_v45  ;;  %2094 = vrot.lane.b32.xlu1 %v1870_v45, %s2693_s0  ;;  %v1592_v9 = vsel %vm5540_vm2, %v5231_v17, %v1588_v35  ;;  %v1116_v27 = vor.u32 1.1754944e-38, %v1115_v52  ;;  %v1796_v48 = vsub.f32 1.0, %v1795_v23  ;;  %v1803_v2 = vand.u32 2147483647, %v6191_v42  ;;  %vm5602_vm10 = vmor %vm1799_vm5, %vm1800_vm6 }
 0x1b3   :  { %v1597_v63 = vsel %vm5524_vm0, %v1596_v16, %v1592_v9  ;;  %v1108_v30 = vadd.f32 %v4846_v32, %v1107_v58  ;;  %v1805_v34 = vand.u32 2147483648, %v6191_v42  ;;  %v1810_v17 = vmul.f32 %v4878_v51, %v4804_v60  ;;  %v2047_v20 = vpop.permute.xlu1 %2046 }
 0x1b4   :  { %v1886_v21 = vmul.f32 %v1597_v63, %v5044_v15  ;;  %v1797_v37 = vmul.f32 %v6192_v19, %v1796_v48  ;;  %vm5586_vm8 = vcmp.eq.f32.partialorder %v1803_v2, 8.507059e+37  ;;  %vm1814_vm9 = vweird.f32 %v4804_v60  ;;  %2231 = vst.msk [vmem:[%s5817_s5 + $0x38] sm:$0xff] %vm1903_vm4, %v2047_v20 }
 0x1b5   :  { %v1112_v39 = vsel %vm5573_vm7, %v4846_v32, %v1108_v30  ;;  %v1806_v25 = vor.u32 1.1754944e-38, %v1805_v34  ;;  %v1811_v46 = vsub.f32 1.0, %v1810_v17  ;;  %vm1815_vm11 = vweird.f32 %v4878_v51 }
 0x1b6   :  { %1951 = vst.msk [vmem:[%s5816_s4 + $0x178] sm:$0xff] %vm1903_vm4, %v1886_v21  ;;  %2126 = vrot.lane.b32.xlu2 %v1886_v21, %s2693_s0  ;;  %v1117_v32 = vsel %vm5555_vm3, %v1116_v27, %v1112_v39  ;;  %v1798_v26 = vadd.f32 %v6192_v19, %v1797_v37  ;;  %v1818_v59 = vand.u32 2147483647, %v4804_v60  ;;  %v1820_v61 = vand.u32 2147483648, %v4804_v60  ;;  %vm5627_vm13 = vmor %vm1814_vm9, %vm1815_vm11  ;;  %v2111_v4 = vpop.permute.xlu0 %2110 }
 0x1b7   :  { %v1854_v28 = vmul.f32 %v1117_v32, %v6201_v1  ;;  %v1812_v62 = vmul.f32 %v4878_v51, %v1811_v46  ;;  %v1825_v14 = vmul.f32 %v5009_v50, %v4917_v36  ;;  %vm1829_vm12 = vweird.f32 %v4917_v36  ;;  %2263 = vst.msk [vmem:[%s5817_s5 + $0x138] sm:$0xff] %vm1903_vm4, %v2111_v4 }
 0x1b8   :  { %v1802_v43 = vsel %vm5602_vm10, %v6192_v19, %v1798_v26  ;;  %vm5631_vm14 = vcmp.eq.f32.partialorder %v1818_v59, 8.507059e+37  ;;  %v1821_v44 = vor.u32 1.1754944e-38, %v1820_v61  ;;  %vm1830_vm15 = vweird.f32 %v5009_v50 }
 0x1b9   :  { %2062 = vrot.lane.b32.xlu0 %v1854_v28, %s2693_s0  ;;  %1919 = vst.msk [vmem:[%s5816_s4 + $0x78] sm:$0xff] %vm1903_vm4, %v1854_v28  ;;  %v1807_v60 = vsel %vm5586_vm8, %v1806_v25, %v1802_v43  ;;  %v1813_v11 = vadd.f32 %v4878_v51, %v1812_v62  ;;  %v1826_v57 = vsub.f32 1.0, %v1825_v14  ;;  %v1833_v40 = vand.u32 2147483647, %v4917_v36  ;;  %v2145_v56 = vpop.permute.xlu2 %2144  ;;  %vm1831_vm0 = vmor %vm1829_vm12, %vm1830_vm15 }
 0x1ba   :  { %v1900_v49 = vmul.f32 %v1807_v60, %v6206_v24  ;;  %v1835_v29 = vand.u32 2147483648, %v4917_v36  ;;  %2280 = vst.msk [vmem:[%s5817_s5 + $0x1c0] sm:$0xff] %vm1903_vm4, %v2145_v56 }
 0x1bb   :  { %v1817_v13 = vsel %vm5627_vm13, %v4878_v51, %v1813_v11  ;;  %v1827_v22 = vmul.f32 %v5009_v50, %v1826_v57  ;;  %v6207_v51 = vld [vmem:[#allocation20_spill] sm:$0xff]  ;;  %vm1834_vm1 = vcmp.eq.f32.partialorder %v1833_v40, 8.507059e+37 }
 0x1bc   :  { %1965 = vst.msk [vmem:[%s5816_s4 + $0x1e8] sm:$0xff] %vm1903_vm4, %v1900_v49  ;;  %2154 = vrot.lane.b32.xlu1 %v1900_v49, %s2693_s0  ;;  %v1822_v0 = vsel %vm5631_vm14, %v1821_v44, %v1817_v13  ;;  %v1836_v41 = vor.u32 1.1754944e-38, %v1835_v29 }
 0x1bd   :  { %v1901_v12 = vmul.f32 %v1822_v0, %v6207_v51  ;;  %v1828_v55 = vadd.f32 %v5009_v50, %v1827_v22 }
 0x1be   :  { %v2143_v10 = vpop.permute.xlu1 %2142 }
 0x1bf   :  { %1966 = vst.msk [vmem:[%s5816_s4 + $0x1f0] sm:$0xff] %vm1903_vm4, %v1901_v12  ;;  %2156 = vrot.lane.b32.xlu2 %v1901_v12, %s2693_s0  ;;  %v1832_v36 = vsel %vm1831_vm0, %v5009_v50, %v1828_v55 }
 0x1c0   :  { %v1837_v33 = vsel %vm1834_vm1, %v1836_v41, %v1832_v36  ;;  %2279 = vst.msk [vmem:[%s5817_s5 + $0x1b8] sm:$0xff] %vm1903_vm4, %v2143_v10 }
 0x1c1   :  { %v1902_v53 = vmul.f32 %v1837_v33, %v4818_v18 }
 0x1c3   :  { %1967 = vst.msk [vmem:[%s5816_s4 + $0x1f8] sm:$0xff] %vm1903_vm4, %v1902_v53  ;;  %2158 = vrot.lane.b32.xlu0 %v1902_v53, %s2693_s0 }
 0x1c4   :  { %v2081_v16 = vpop.permute.xlu0 %2080 }
 0x1c5   :  { %2248 = vst.msk [vmem:[%s5817_s5 + $0xc0] sm:$0xff] %vm1903_vm4, %v2081_v16 }
 0x1c8   :  { %v2115_v50 = vpop.permute.xlu2 %2114 }
 0x1c9   :  { %2265 = vst.msk [vmem:[%s5817_s5 + $0x148] sm:$0xff] %vm1903_vm4, %v2115_v50 }
 0x1cd   :  { %v2113_v18 = vpop.permute.xlu1 %2112 }
 0x1ce   :  { %2264 = vst.msk [vmem:[%s5817_s5 + $0x140] sm:$0xff] %vm1903_vm4, %v2113_v18 }
 0x1d0   :  { %v2085_v31 = vpop.permute.xlu2 %2084 }
 0x1d1   :  { %2250 = vst.msk [vmem:[%s5817_s5 + $0xd0] sm:$0xff] %vm1903_vm4, %v2085_v31 }
 0x1d4   :  { %v2051_v3 = vpop.permute.xlu0 %2050 }
 0x1d5   :  { %2233 = vst.msk [vmem:[%s5817_s5 + $0x48] sm:$0xff] %vm1903_vm4, %v2051_v3 }
 0x1dc   :  { %v2083_v47 = vpop.permute.xlu1 %2082 }
 0x1dd   :  { %v2055_v45 = vpop.permute.xlu2 %2054  ;;  %2249 = vst.msk [vmem:[%s5817_s5 + $0xc8] sm:$0xff] %vm1903_vm4, %v2083_v47 }
 0x1de   :  { %2235 = vst.msk [vmem:[%s5817_s5 + $0x58] sm:$0xff] %vm1903_vm4, %v2055_v45 }
 0x1e2   :  { %v2147_v35 = vpop.permute.xlu0 %2146 }
 0x1e3   :  { %2281 = vst.msk [vmem:[%s5817_s5 + $0x1c8] sm:$0xff] %vm1903_vm4, %v2147_v35 }
 0x1e9   :  { %v2151_v52 = vpop.permute.xlu2 %2150 }
 0x1ea   :  { %2283 = vst.msk [vmem:[%s5817_s5 + $0x1d8] sm:$0xff] %vm1903_vm4, %v2151_v52 }
 0x1ec   :  { %v2053_v42 = vpop.permute.xlu1 %2052 }
 0x1ed   :  { %2234 = vst.msk [vmem:[%s5817_s5 + $0x50] sm:$0xff] %vm1903_vm4, %v2053_v42 }
 0x1ef   :  { %v2117_v19 = vpop.permute.xlu0 %2116 }
 0x1f0   :  { %2266 = vst.msk [vmem:[%s5817_s5 + $0x150] sm:$0xff] %vm1903_vm4, %v2117_v19 }
 0x1f2   :  { %v2121_v23 = vpop.permute.xlu2 %2120 }
 0x1f3   :  { %2268 = vst.msk [vmem:[%s5817_s5 + $0x160] sm:$0xff] %vm1903_vm4, %v2121_v23 }
 0x1f4   :  { %v2149_v58 = vpop.permute.xlu1 %2148 }
 0x1f5   :  { %2282 = vst.msk [vmem:[%s5817_s5 + $0x1d0] sm:$0xff] %vm1903_vm4, %v2149_v58 }
 0x1f9   :  { %v2087_v8 = vpop.permute.xlu0 %2086 }
 0x1fa   :  { %v2091_v9 = vpop.permute.xlu2 %2090  ;;  %2251 = vst.msk [vmem:[%s5817_s5 + $0xd8] sm:$0xff] %vm1903_vm4, %v2087_v8 }
 0x1fb   :  { %2253 = vst.msk [vmem:[%s5817_s5 + $0xe8] sm:$0xff] %vm1903_vm4, %v2091_v9 }
 0x1fc   :  { %v2119_v54 = vpop.permute.xlu1 %2118 }
 0x1fd   :  { %2267 = vst.msk [vmem:[%s5817_s5 + $0x158] sm:$0xff] %vm1903_vm4, %v2119_v54 }
 0x204   :  { %v2057_v27 = vpop.permute.xlu0 %2056 }
 0x205   :  { %2236 = vst.msk [vmem:[%s5817_s5 + $0x60] sm:$0xff] %vm1903_vm4, %v2057_v27 }
 0x206   :  { %v2061_v48 = vpop.permute.xlu2 %2060 }
 0x207   :  { %2238 = vst.msk [vmem:[%s5817_s5 + $0x70] sm:$0xff] %vm1903_vm4, %v2061_v48  ;;  %v2089_v2 = vpop.permute.xlu1 %2088 }
 0x208   :  { %2252 = vst.msk [vmem:[%s5817_s5 + $0xe0] sm:$0xff] %vm1903_vm4, %v2089_v2 }
 0x20e   :  { %v2153_v63 = vpop.permute.xlu0 %2152 }
 0x20f   :  { %2284 = vst.msk [vmem:[%s5817_s5 + $0x1e0] sm:$0xff] %vm1903_vm4, %v2153_v63 }
 0x210   :  { %v2127_v30 = vpop.permute.xlu2 %2126 }
 0x211   :  { %2271 = vst.msk [vmem:[%s5817_s5 + $0x178] sm:$0xff] %vm1903_vm4, %v2127_v30 }
 0x214   :  { %v2059_v34 = vpop.permute.xlu1 %2058 }
 0x215   :  { %2237 = vst.msk [vmem:[%s5817_s5 + $0x68] sm:$0xff] %vm1903_vm4, %v2059_v34 }
 0x217   :  { %v2123_v17 = vpop.permute.xlu0 %2122 }
 0x218   :  { %2269 = vst.msk [vmem:[%s5817_s5 + $0x168] sm:$0xff] %vm1903_vm4, %v2123_v17 }
 0x219   :  { %v2157_v7 = vpop.permute.xlu2 %2156 }
 0x21a   :  { %2286 = vst.msk [vmem:[%s5817_s5 + $0x1f0] sm:$0xff] %vm1903_vm4, %v2157_v7 }
 0x21c   :  { %v2125_v21 = vpop.permute.xlu1 %2124 }
 0x21d   :  { %2270 = vst.msk [vmem:[%s5817_s5 + $0x170] sm:$0xff] %vm1903_vm4, %v2125_v21 }
 0x221   :  { %v2093_v37 = vpop.permute.xlu0 %2092 }
 0x222   :  { %2254 = vst.msk [vmem:[%s5817_s5 + $0xf0] sm:$0xff] %vm1903_vm4, %v2093_v37 }
 0x224   :  { %v2095_v6 = vpop.permute.xlu1 %2094 }
 0x225   :  { %2255 = vst.msk [vmem:[%s5817_s5 + $0xf8] sm:$0xff] %vm1903_vm4, %v2095_v6 }
 0x22b   :  { %v2063_v39 = vpop.permute.xlu0 %2062 }
 0x22c   :  { %2239 = vst.msk [vmem:[%s5817_s5 + $0x78] sm:$0xff] %vm1903_vm4, %v2063_v39 }
 0x22e   :  { %v2155_v15 = vpop.permute.xlu1 %2154 }
 0x22f   :  { %2285 = vst.msk [vmem:[%s5817_s5 + $0x1e8] sm:$0xff] %vm1903_vm4, %v2155_v15 }
 0x235   :  { %v2159_v25 = vpop.permute.xlu0 %2158 }
 0x236   :  { %2287 = vst.msk [vmem:[%s5817_s5 + $0x1f8] sm:$0xff] %vm1903_vm4, %v2159_v25 }

</bundles_post_ra>
